<compile_context>
chip_gen: v5e
topology: v5e:2x2
jax: 0.10.0
libtpu: 0.0.40
codegen_flags: <defaults>
</compile_context>

<pallas_src>
import jax
import jax.numpy as jnp
import numpy as np
from jax import lax
from jax.experimental import pallas as pl
from jax.experimental.pallas import tpu as pltpu


def _round_up(a, m):
    return (a + m - 1) // m * m


def aux_head_kernel(x_ref, w1_ref, b1_ref, w2_ref, b2_ref, wc_ref, bc_ref, o_ref):
    # x tile: (tn, K) bf16, lane-dense. ReLU on the VPU (bf16 VALU on v6e/v7x).
    # On the pre-pooled path x >= 0 already, so this ReLU is a no-op there.
    x = jnp.maximum(x_ref[...], 0)

    # Matmul 1 (MXU, bf16 in / f32 acc): fused ReLU->AvgPool(5,3)->1x1 conv->BN1-scale
    # (or plain conv1+BN1-scale on the pre-pooled slab). Then BN1 shift + ReLU on the VPU.
    h = jnp.dot(x, w1_ref[...], preferred_element_type=jnp.float32)        # (tn, 512)
    h = jnp.maximum(h + b1_ref[...], 0.0)

    # Matmul 2: 2x2 conv over the 2x2 pooled map; BN2 scale pre-folded into the weight.
    z = jnp.dot(h.astype(w2_ref.dtype), w2_ref[...],
                preferred_element_type=jnp.float32)                        # (tn, 768)
    z = jnp.maximum(z + b2_ref[...], 0.0)

    # Matmul 3: classifier, padded to a lane-dense 128-wide output.
    y = jnp.dot(z.astype(wc_ref.dtype), wc_ref[...],
                preferred_element_type=jnp.float32) + bc_ref[...]
    o_ref[...] = y.astype(o_ref.dtype)


def _vmem_estimate(tn, k_in, ncp):
    xb = 2 * tn * k_in * 2             # bf16 x tile, double-buffered
    wb = k_in * 512 * 2                # matmul-1 weight (single-buffered)
    w2 = 512 * 768 * 2                 # conv2 weight
    wc = 768 * ncp * 2                 # classifier weight
    ob = 2 * tn * ncp * 2              # bf16 out tile, double-buffered
    tmp = tn * (512 + 768 + ncp) * 4   # f32 intermediates (h, z, y)
    vec = (512 + 768 + 2 * ncp) * 4    # shift / bias vectors
    return xb + wb + w2 + wc + ob + tmp + vec


def _pick_tile_n(n, k_in, ncp, budget=24 * 2**20):
    # Small batches: one grid step, bf16-sublane aligned (multiple of 16).
    if n <= 128:
        return _round_up(max(n, 16), 16)
    # Multiples of 128 keep the MXU fully fed on all chips (v5e 128x128, v6e/v7x 256x256);
    # the 24 MiB pick budget keeps the worst case (with margin) inside v7x's 64 MiB/TC.
    tn = 128
    for cand in (1024, 512, 256, 128):
        if _vmem_estimate(cand, k_in, ncp) <= budget:
            tn = cand
            break
    return min(tn, _round_up(n, 128))


def aux_head_sr(x, conv1_w, g1, be1, m1, v1, conv2_w, g2, be2, m2, v2,
                wc, bc, eps=1e-5, tile_n=None, prepool=None, mxu_dtype=jnp.bfloat16):
    """x: (N, C, 8, 8) NCHW. Returns (N, num_classes) in x.dtype (eval-mode BN)."""
    N, C, H, W = x.shape
    assert (H, W) == (8, 8), "AuxiliaryHeadSR assumes an 8x8 input"
    num_classes = wc.shape[0]

    if prepool is None:
        # v5e is MXU-bound on the 16x-inflated fused pool matmul -> hoist pooling to XLA there.
        # v6e/v7x are HBM-bound on the x stream -> keep the fully fused form (single HBM read).
        try:
            prepool = "v5" in jax.devices()[0].device_kind.lower()
        except Exception:
            prepool = False

    f32 = jnp.float32
    # ---------- fold BN1 into the 1x1 conv ----------
    inv1 = 1.0 / jnp.sqrt(v1.astype(f32) + eps)
    a1 = g1.astype(f32) * inv1                                       # (128,)
    b1 = be1.astype(f32) - m1.astype(f32) * a1                       # (128,)
    scaled_w1 = conv1_w[:, :, 0, 0].astype(f32).T * a1[None, :]      # (C, 128)
    b1_t = jnp.tile(b1.reshape(1, -1), (1, 4))                       # (1, 512): col p*128+o -> b1[o]

    if prepool:
        # ReLU + AvgPool2d(5, stride=3, padding=0) in XLA; kernel matmul-1 has K = 4C.
        h0 = jnp.maximum(x.astype(f32), 0.0)
        pooled = lax.reduce_window(h0, 0.0, lax.add, (1, 1, 5, 5), (1, 1, 3, 3),
                                   "VALID") / 25.0                   # (N, C, 2, 2)
        x_slab = pooled.reshape(N, C * 4).astype(mxu_dtype)          # row idx c*4 + p
        k_in = C * 4
        # W1[(c*4+p), (q*128+o)] = w1[o,c] * a1[o] * [p == q]
        w1_mat = jnp.einsum('co,pq->cpqo', scaled_w1, jnp.eye(4, dtype=f32))
        w1_mat = w1_mat.reshape(k_in, 512).astype(mxu_dtype)
    else:
        # Fused ReLU->pool->conv1->BN1-scale: pooling masks folded into one (64C, 512) matmul.
        x_slab = x.reshape(N, C * H * W).astype(mxu_dtype)           # bf16 slab: halves HBM read
        k_in = C * H * W
        masks = np.zeros((4, H, W), np.float32)
        for p, (ph, pw) in enumerate([(0, 0), (0, 3), (3, 0), (3, 3)]):
            masks[p, ph:ph + 5, pw:pw + 5] = 1.0 / 25.0              # all windows fully inside -> /25
        masks = jnp.asarray(masks).reshape(4, H * W)                 # (4, 64)
        # W1[(c*64+s), (p*128+o)] = mask[p,s] * w1[o,c] * a1[o]
        w1_mat = jnp.einsum('ps,co->cspo', masks, scaled_w1).reshape(k_in, 512).astype(mxu_dtype)

    # ---------- 2x2 conv (rows ordered (pos, in_ch) to match matmul-1 cols); BN2 scale folded ----------
    inv2 = 1.0 / jnp.sqrt(v2.astype(f32) + eps)
    a2 = (g2.astype(f32) * inv2).reshape(1, -1)                      # (1, 768)
    b2 = (be2.astype(f32) - m2.astype(f32) * g2.astype(f32) * inv2).reshape(1, -1)
    w2_mat = (jnp.transpose(conv2_w.astype(f32), (2, 3, 1, 0)).reshape(512, 768)
              * a2).astype(mxu_dtype)

    # ---------- classifier padded to a lane-dense 128-wide output ----------
    ncp = _round_up(num_classes, 128)
    wc_p = jnp.zeros((768, ncp), f32).at[:, :num_classes].set(wc.astype(f32).T).astype(mxu_dtype)
    bc_p = jnp.zeros((1, ncp), f32).at[:, :num_classes].set(bc.astype(f32).reshape(1, -1))

    # ---------- batch tiling (bf16 sublane packing -> multiples of 16) ----------
    tn = tile_n if tile_n is not None else _pick_tile_n(N, k_in, ncp)
    tn = _round_up(tn, 16)
    Np = _round_up(N, tn)                                            # for large N, Np >= 2*tn so
    if Np != N:                                                      # both v7x TCs get grid steps
        x_slab = jnp.pad(x_slab, ((0, Np - N), (0, 0)))

    vmem_limit = int(min(64 * 2**20, max(2 * _vmem_estimate(tn, k_in, ncp), 32 * 2**20)))

    def build_and_call(single_buffer_weights):
        def const_spec(shape):
            # Revisited every grid step: single-buffer to halve the resident weight footprint.
            if single_buffer_weights:
                return pl.BlockSpec(shape, lambda i: (0, 0), pipeline_mode=pl.Buffered(1))
            return pl.BlockSpec(shape, lambda i: (0, 0))

        return pl.pallas_call(
            aux_head_kernel,
            out_shape=jax.ShapeDtypeStruct((Np, ncp), mxu_dtype),    # bf16 writeback, 128-lane
            grid=(Np // tn,),
            in_specs=[
                pl.BlockSpec((tn, k_in), lambda i: (i, 0)),          # x batch tile (bf16)
                const_spec((k_in, 512)),                             # pool+conv1+BN1 weight
                const_spec((1, 512)),                                # BN1 shift
                const_spec((512, 768)),                              # conv2 weight (BN2 scale folded)
                const_spec((1, 768)),                                # BN2 shift
                const_spec((768, ncp)),                              # classifier weight (padded)
                const_spec((1, ncp)),                                # classifier bias (padded)
            ],
            out_specs=pl.BlockSpec((tn, ncp), lambda i: (i, 0)),
            compiler_params=pltpu.CompilerParams(
                dimension_semantics=("parallel",),
                vmem_limit_bytes=vmem_limit),
        )(x_slab, w1_mat, b1_t, w2_mat, b2, wc_p, bc_p)

    try:
        out = build_and_call(single_buffer_weights=True)
    except Exception:
        # Fallback in case this JAX build rejects pipeline_mode=pl.Buffered(1).
        out = build_and_call(single_buffer_weights=False)

    return out[:N, :num_classes].astype(x.dtype)


def ref_forward(x, conv1_w, g1, be1, m1, v1, conv2_w, g2, be2, m2, v2,
                wc, bc, eps=1e-5):
    """Pure-JAX f32 reference (eval-mode BN), NCHW convs via lax."""
    def bn(h, g, be, m, v):
        sh = (1, -1, 1, 1)
        return (h - m.reshape(sh)) / jnp.sqrt(v.reshape(sh) + eps) * g.reshape(sh) \
               + be.reshape(sh)

    h = jnp.maximum(x, 0.0)
    h = lax.reduce_window(h, 0.0, lax.add,
                          window_dimensions=(1, 1, 5, 5),
                          window_strides=(1, 1, 3, 3),
                          padding="VALID") / 25.0
    h = lax.conv_general_dilated(h, conv1_w, (1, 1), "VALID",
                                 dimension_numbers=("NCHW", "OIHW", "NCHW"))
    h = jnp.maximum(bn(h, g1, be1, m1, v1), 0.0)
    h = lax.conv_general_dilated(h, conv2_w, (1, 1), "VALID",
                                 dimension_numbers=("NCHW", "OIHW", "NCHW"))
    h = jnp.maximum(bn(h, g2, be2, m2, v2), 0.0)
    h = h.reshape(h.shape[0], -1)                                    # (N, 768)
    return h @ wc.T + bc


if __name__ == "__main__":
    N, C = 2, 4
    num_classes = 10

    key = jax.random.PRNGKey(0)
    ks = jax.random.split(key, 13)

    x = jax.random.normal(ks[0], (N, C, 8, 8), jnp.float32)

    conv1_w = jax.random.normal(ks[1], (128, C, 1, 1), jnp.float32) * 0.1
    g1 = 1.0 + 0.1 * jax.random.normal(ks[2], (128,), jnp.float32)
    be1 = 0.1 * jax.random.normal(ks[3], (128,), jnp.float32)
    m1 = 0.1 * jax.random.normal(ks[4], (128,), jnp.float32)
    v1 = jax.random.uniform(ks[5], (128,), jnp.float32, minval=0.5, maxval=1.5)

    conv2_w = jax.random.normal(ks[6], (768, 128, 2, 2), jnp.float32) * 0.05
    g2 = 1.0 + 0.1 * jax.random.normal(ks[7], (768,), jnp.float32)
    be2 = 0.1 * jax.random.normal(ks[8], (768,), jnp.float32)
    m2 = 0.1 * jax.random.normal(ks[9], (768,), jnp.float32)
    v2 = jax.random.uniform(ks[10], (768,), jnp.float32, minval=0.5, maxval=1.5)

    wc = jax.random.normal(ks[11], (num_classes, 768), jnp.float32) * 0.05
    bc = 0.1 * jax.random.normal(ks[12], (num_classes,), jnp.float32)

    params = (conv1_w, g1, be1, m1, v1, conv2_w, g2, be2, m2, v2, wc, bc)

    y_ref = ref_forward(x, *params)

    # Exercise both paths: fully fused pooling (v6e/v7x default) and pre-pooled slab (v5e default).
    for prepool in (False, True):
        y = aux_head_sr(x, *params, prepool=prepool)
        jax.block_until_ready(y)
        # bf16 x / MXU operands / writeback vs f32 reference -> loosened tolerance.
        np.testing.assert_allclose(np.asarray(y), np.asarray(y_ref), rtol=5e-2, atol=5e-2)

    print("KERNEL_OK")
</pallas_src>

<mosaic_0001>
module attributes {stable_mosaic.version = 11 : i64} {
  func.func @aux_head_kernel(%arg0: i32, %arg1: memref<16x256xbf16, #tpu.memory_space<vmem>>, %arg2: memref<256x512xbf16, #tpu.memory_space<vmem>>, %arg3: memref<1x512xf32, #tpu.memory_space<vmem>>, %arg4: memref<512x768xbf16, #tpu.memory_space<vmem>>, %arg5: memref<1x768xf32, #tpu.memory_space<vmem>>, %arg6: memref<768x128xbf16, #tpu.memory_space<vmem>>, %arg7: memref<1x128xf32, #tpu.memory_space<vmem>>, %arg8: memref<16x128xbf16, #tpu.memory_space<vmem>>) attributes {dimension_semantics = [#tpu.dimension_semantics<parallel>], iteration_bounds = array<i64: 1>, scalar_prefetch = 0 : i64, scratch_operands = 0 : i64, tpu.core_type = #tpu.core_type<tc>, window_params = [{transform_indices = @transform_0, window_bounds = array<i64: 16, 256>}, {pipeline_mode = #tpu.pipeline_mode<synchronous>, transform_indices = @transform_1, window_bounds = array<i64: 256, 512>}, {pipeline_mode = #tpu.pipeline_mode<synchronous>, transform_indices = @transform_2, window_bounds = array<i64: 1, 512>}, {pipeline_mode = #tpu.pipeline_mode<synchronous>, transform_indices = @transform_3, window_bounds = array<i64: 512, 768>}, {pipeline_mode = #tpu.pipeline_mode<synchronous>, transform_indices = @transform_4, window_bounds = array<i64: 1, 768>}, {pipeline_mode = #tpu.pipeline_mode<synchronous>, transform_indices = @transform_5, window_bounds = array<i64: 768, 128>}, {pipeline_mode = #tpu.pipeline_mode<synchronous>, transform_indices = @transform_6, window_bounds = array<i64: 1, 128>}, {transform_indices = @transform_7, window_bounds = array<i64: 16, 128>}]} {
    %c0 = arith.constant 0 : index
    %c0_0 = arith.constant 0 : index
    %0 = vector.load %arg1[%c0, %c0_0] : memref<16x256xbf16, #tpu.memory_space<vmem>>, vector<16x256xbf16>
    %cst = arith.constant 0.000000e+00 : bf16
    %1 = vector.broadcast %cst : bf16 to vector<16x256xbf16>
    %2 = arith.maximumf %0, %1 : vector<16x256xbf16>
    %c0_1 = arith.constant 0 : index
    %c0_2 = arith.constant 0 : index
    %3 = vector.load %arg2[%c0_1, %c0_2] : memref<256x512xbf16, #tpu.memory_space<vmem>>, vector<256x512xbf16>
    %cst_3 = arith.constant dense<0.000000e+00> : vector<16x512xf32>
    %4 = tpu.matmul %2, %3, %cst_3 {dimension_numbers = #tpu.dot_dimension_numbers<[1], [0], [0], [1], [0, 0, 1, 1], [], []>} : vector<16x256xbf16>, vector<256x512xbf16>, vector<16x512xf32> -> vector<16x512xf32>
    %c0_4 = arith.constant 0 : index
    %c0_5 = arith.constant 0 : index
    %5 = vector.load %arg3[%c0_4, %c0_5] : memref<1x512xf32, #tpu.memory_space<vmem>>, vector<1x512xf32>
    %6 = vector.broadcast %5 : vector<1x512xf32> to vector<16x512xf32>
    %7 = arith.addf %4, %6 : vector<16x512xf32>
    %cst_6 = arith.constant 0.000000e+00 : f32
    %8 = vector.broadcast %cst_6 : f32 to vector<16x512xf32>
    %9 = arith.maximumf %7, %8 : vector<16x512xf32>
    %10 = arith.truncf %9 : vector<16x512xf32> to vector<16x512xbf16>
    %c0_7 = arith.constant 0 : index
    %c0_8 = arith.constant 0 : index
    %11 = vector.load %arg4[%c0_7, %c0_8] : memref<512x768xbf16, #tpu.memory_space<vmem>>, vector<512x768xbf16>
    %cst_9 = arith.constant dense<0.000000e+00> : vector<16x768xf32>
    %12 = tpu.matmul %10, %11, %cst_9 {dimension_numbers = #tpu.dot_dimension_numbers<[1], [0], [0], [1], [0, 0, 1, 1], [], []>} : vector<16x512xbf16>, vector<512x768xbf16>, vector<16x768xf32> -> vector<16x768xf32>
    %c0_10 = arith.constant 0 : index
    %c0_11 = arith.constant 0 : index
    %13 = vector.load %arg5[%c0_10, %c0_11] : memref<1x768xf32, #tpu.memory_space<vmem>>, vector<1x768xf32>
    %14 = vector.broadcast %13 : vector<1x768xf32> to vector<16x768xf32>
    %15 = arith.addf %12, %14 : vector<16x768xf32>
    %cst_12 = arith.constant 0.000000e+00 : f32
    %16 = vector.broadcast %cst_12 : f32 to vector<16x768xf32>
    %17 = arith.maximumf %15, %16 : vector<16x768xf32>
    %18 = arith.truncf %17 : vector<16x768xf32> to vector<16x768xbf16>
    %c0_13 = arith.constant 0 : index
    %c0_14 = arith.constant 0 : index
    %19 = vector.load %arg6[%c0_13, %c0_14] : memref<768x128xbf16, #tpu.memory_space<vmem>>, vector<768x128xbf16>
    %cst_15 = arith.constant dense<0.000000e+00> : vector<16x128xf32>
    %20 = tpu.matmul %18, %19, %cst_15 {dimension_numbers = #tpu.dot_dimension_numbers<[1], [0], [0], [1], [0, 0, 1, 1], [], []>} : vector<16x768xbf16>, vector<768x128xbf16>, vector<16x128xf32> -> vector<16x128xf32>
    %c0_16 = arith.constant 0 : index
    %c0_17 = arith.constant 0 : index
    %21 = vector.load %arg7[%c0_16, %c0_17] : memref<1x128xf32, #tpu.memory_space<vmem>>, vector<1x128xf32>
    %22 = vector.broadcast %21 : vector<1x128xf32> to vector<16x128xf32>
    %23 = arith.addf %20, %22 : vector<16x128xf32>
    %24 = arith.truncf %23 : vector<16x128xf32> to vector<16x128xbf16>
    %c0_18 = arith.constant 0 : index
    %c0_19 = arith.constant 0 : index
    %25 = vector.load %arg8[%c0_18, %c0_19] : memref<16x128xbf16, #tpu.memory_space<vmem>>, vector<16x128xbf16>
    tpu.vector_store %arg8[%c0_18, %c0_19], %24 {strides = array<i32>} : memref<16x128xbf16, #tpu.memory_space<vmem>>, vector<16x128xbf16>,
    return
  }
  func.func @transform_0(%arg0: i32) -> (i32, i32) {
    %c0_i32 = arith.constant 0 : i32
    %c0_i32_0 = arith.constant 0 : i32
    return %arg0, %c0_i32 : i32, i32
  }
  func.func @transform_1(%arg0: i32) -> (i32, i32) {
    %c0_i32 = arith.constant 0 : i32
    %c0_i32_0 = arith.constant 0 : i32
    %c0_i32_1 = arith.constant 0 : i32
    return %c0_i32, %c0_i32_0 : i32, i32
  }
  func.func @transform_2(%arg0: i32) -> (i32, i32) {
    %c0_i32 = arith.constant 0 : i32
    %c0_i32_0 = arith.constant 0 : i32
    %c0_i32_1 = arith.constant 0 : i32
    return %c0_i32, %c0_i32_0 : i32, i32
  }
  func.func @transform_3(%arg0: i32) -> (i32, i32) {
    %c0_i32 = arith.constant 0 : i32
    %c0_i32_0 = arith.constant 0 : i32
    %c0_i32_1 = arith.constant 0 : i32
    return %c0_i32, %c0_i32_0 : i32, i32
  }
  func.func @transform_4(%arg0: i32) -> (i32, i32) {
    %c0_i32 = arith.constant 0 : i32
    %c0_i32_0 = arith.constant 0 : i32
    %c0_i32_1 = arith.constant 0 : i32
    return %c0_i32, %c0_i32_0 : i32, i32
  }
  func.func @transform_5(%arg0: i32) -> (i32, i32) {
    %c0_i32 = arith.constant 0 : i32
    %c0_i32_0 = arith.constant 0 : i32
    %c0_i32_1 = arith.constant 0 : i32
    return %c0_i32, %c0_i32_0 : i32, i32
  }
  func.func @transform_6(%arg0: i32) -> (i32, i32) {
    %c0_i32 = arith.constant 0 : i32
    %c0_i32_0 = arith.constant 0 : i32
    %c0_i32_1 = arith.constant 0 : i32
    return %c0_i32, %c0_i32_0 : i32, i32
  }
  func.func @transform_7(%arg0: i32) -> (i32, i32) {
    %c0_i32 = arith.constant 0 : i32
    %c0_i32_0 = arith.constant 0 : i32
    return %arg0, %c0_i32 : i32, i32
  }
}

module attributes {stable_mosaic.version = 11 : i64} {
  func.func @aux_head_kernel(%arg0: i32, %arg1: memref<16x256xbf16, #tpu.memory_space<vmem>>, %arg2: memref<256x512xbf16, #tpu.memory_space<vmem>>, %arg3: memref<1x512xf32, #tpu.memory_space<vmem>>, %arg4: memref<512x768xbf16, #tpu.memory_space<vmem>>, %arg5: memref<1x768xf32, #tpu.memory_space<vmem>>, %arg6: memref<768x128xbf16, #tpu.memory_space<vmem>>, %arg7: memref<1x128xf32, #tpu.memory_space<vmem>>, %arg8: memref<16x128xbf16, #tpu.memory_space<vmem>>) attributes {dimension_semantics = [#tpu.dimension_semantics<parallel>], iteration_bounds = array<i64: 1>, scalar_prefetch = 0 : i64, scratch_operands = 0 : i64, tpu.core_type = #tpu.core_type<tc>, window_params = [{transform_indices = @transform_0, window_bounds = array<i64: 16, 256>}, {pipeline_mode = #tpu.pipeline_mode<synchronous>, transform_indices = @transform_1, window_bounds = array<i64: 256, 512>}, {pipeline_mode = #tpu.pipeline_mode<synchronous>, transform_indices = @transform_2, window_bounds = array<i64: 1, 512>}, {pipeline_mode = #tpu.pipeline_mode<synchronous>, transform_indices = @transform_3, window_bounds = array<i64: 512, 768>}, {pipeline_mode = #tpu.pipeline_mode<synchronous>, transform_indices = @transform_4, window_bounds = array<i64: 1, 768>}, {pipeline_mode = #tpu.pipeline_mode<synchronous>, transform_indices = @transform_5, window_bounds = array<i64: 768, 128>}, {pipeline_mode = #tpu.pipeline_mode<synchronous>, transform_indices = @transform_6, window_bounds = array<i64: 1, 128>}, {transform_indices = @transform_7, window_bounds = array<i64: 16, 128>}]} {
    %c0 = arith.constant 0 : index
    %c0_0 = arith.constant 0 : index
    %0 = vector.load %arg1[%c0, %c0_0] : memref<16x256xbf16, #tpu.memory_space<vmem>>, vector<16x256xbf16>
    %cst = arith.constant 0.000000e+00 : bf16
    %1 = vector.broadcast %cst : bf16 to vector<16x256xbf16>
    %2 = arith.maximumf %0, %1 : vector<16x256xbf16>
    %c0_1 = arith.constant 0 : index
    %c0_2 = arith.constant 0 : index
    %3 = vector.load %arg2[%c0_1, %c0_2] : memref<256x512xbf16, #tpu.memory_space<vmem>>, vector<256x512xbf16>
    %cst_3 = arith.constant dense<0.000000e+00> : vector<16x512xf32>
    %4 = tpu.matmul %2, %3, %cst_3 {dimension_numbers = #tpu.dot_dimension_numbers<[1], [0], [0], [1], [0, 0, 1, 1], [], []>} : vector<16x256xbf16>, vector<256x512xbf16>, vector<16x512xf32> -> vector<16x512xf32>
    %c0_4 = arith.constant 0 : index
    %c0_5 = arith.constant 0 : index
    %5 = vector.load %arg3[%c0_4, %c0_5] : memref<1x512xf32, #tpu.memory_space<vmem>>, vector<1x512xf32>
    %6 = vector.broadcast %5 : vector<1x512xf32> to vector<16x512xf32>
    %7 = arith.addf %4, %6 : vector<16x512xf32>
    %cst_6 = arith.constant 0.000000e+00 : f32
    %8 = vector.broadcast %cst_6 : f32 to vector<16x512xf32>
    %9 = arith.maximumf %7, %8 : vector<16x512xf32>
    %10 = arith.truncf %9 : vector<16x512xf32> to vector<16x512xbf16>
    %c0_7 = arith.constant 0 : index
    %c0_8 = arith.constant 0 : index
    %11 = vector.load %arg4[%c0_7, %c0_8] : memref<512x768xbf16, #tpu.memory_space<vmem>>, vector<512x768xbf16>
    %cst_9 = arith.constant dense<0.000000e+00> : vector<16x768xf32>
    %12 = tpu.matmul %10, %11, %cst_9 {dimension_numbers = #tpu.dot_dimension_numbers<[1], [0], [0], [1], [0, 0, 1, 1], [], []>} : vector<16x512xbf16>, vector<512x768xbf16>, vector<16x768xf32> -> vector<16x768xf32>
    %c0_10 = arith.constant 0 : index
    %c0_11 = arith.constant 0 : index
    %13 = vector.load %arg5[%c0_10, %c0_11] : memref<1x768xf32, #tpu.memory_space<vmem>>, vector<1x768xf32>
    %14 = vector.broadcast %13 : vector<1x768xf32> to vector<16x768xf32>
    %15 = arith.addf %12, %14 : vector<16x768xf32>
    %cst_12 = arith.constant 0.000000e+00 : f32
    %16 = vector.broadcast %cst_12 : f32 to vector<16x768xf32>
    %17 = arith.maximumf %15, %16 : vector<16x768xf32>
    %18 = arith.truncf %17 : vector<16x768xf32> to vector<16x768xbf16>
    %c0_13 = arith.constant 0 : index
    %c0_14 = arith.constant 0 : index
    %19 = vector.load %arg6[%c0_13, %c0_14] : memref<768x128xbf16, #tpu.memory_space<vmem>>, vector<768x128xbf16>
    %cst_15 = arith.constant dense<0.000000e+00> : vector<16x128xf32>
    %20 = tpu.matmul %18, %19, %cst_15 {dimension_numbers = #tpu.dot_dimension_numbers<[1], [0], [0], [1], [0, 0, 1, 1], [], []>} : vector<16x768xbf16>, vector<768x128xbf16>, vector<16x128xf32> -> vector<16x128xf32>
    %c0_16 = arith.constant 0 : index
    %c0_17 = arith.constant 0 : index
    %21 = vector.load %arg7[%c0_16, %c0_17] : memref<1x128xf32, #tpu.memory_space<vmem>>, vector<1x128xf32>
    %22 = vector.broadcast %21 : vector<1x128xf32> to vector<16x128xf32>
    %23 = arith.addf %20, %22 : vector<16x128xf32>
    %24 = arith.truncf %23 : vector<16x128xf32> to vector<16x128xbf16>
    %c0_18 = arith.constant 0 : index
    %c0_19 = arith.constant 0 : index
    %25 = vector.load %arg8[%c0_18, %c0_19] : memref<16x128xbf16, #tpu.memory_space<vmem>>, vector<16x128xbf16>
    tpu.vector_store %arg8[%c0_18, %c0_19], %24 {strides = array<i32>} : memref<16x128xbf16, #tpu.memory_space<vmem>>, vector<16x128xbf16>,
    return
  }
  func.func @transform_0(%arg0: i32) -> (i32, i32) {
    %c0_i32 = arith.constant 0 : i32
    %c0_i32_0 = arith.constant 0 : i32
    return %arg0, %c0_i32 : i32, i32
  }
  func.func @transform_1(%arg0: i32) -> (i32, i32) {
    %c0_i32 = arith.constant 0 : i32
    %c0_i32_0 = arith.constant 0 : i32
    %c0_i32_1 = arith.constant 0 : i32
    return %c0_i32, %c0_i32_0 : i32, i32
  }
  func.func @transform_2(%arg0: i32) -> (i32, i32) {
    %c0_i32 = arith.constant 0 : i32
    %c0_i32_0 = arith.constant 0 : i32
    %c0_i32_1 = arith.constant 0 : i32
    return %c0_i32, %c0_i32_0 : i32, i32
  }
  func.func @transform_3(%arg0: i32) -> (i32, i32) {
    %c0_i32 = arith.constant 0 : i32
    %c0_i32_0 = arith.constant 0 : i32
    %c0_i32_1 = arith.constant 0 : i32
    return %c0_i32, %c0_i32_0 : i32, i32
  }
  func.func @transform_4(%arg0: i32) -> (i32, i32) {
    %c0_i32 = arith.constant 0 : i32
    %c0_i32_0 = arith.constant 0 : i32
    %c0_i32_1 = arith.constant 0 : i32
    return %c0_i32, %c0_i32_0 : i32, i32
  }
  func.func @transform_5(%arg0: i32) -> (i32, i32) {
    %c0_i32 = arith.constant 0 : i32
    %c0_i32_0 = arith.constant 0 : i32
    %c0_i32_1 = arith.constant 0 : i32
    return %c0_i32, %c0_i32_0 : i32, i32
  }
  func.func @transform_6(%arg0: i32) -> (i32, i32) {
    %c0_i32 = arith.constant 0 : i32
    %c0_i32_0 = arith.constant 0 : i32
    %c0_i32_1 = arith.constant 0 : i32
    return %c0_i32, %c0_i32_0 : i32, i32
  }
  func.func @transform_7(%arg0: i32) -> (i32, i32) {
    %c0_i32 = arith.constant 0 : i32
    %c0_i32_0 = arith.constant 0 : i32
    return %arg0, %c0_i32 : i32, i32
  }
}

</mosaic_0001>

<bundles_post_ra>
// kernel: tpu_custom_call.1
= control target key start
LH: loop header
LB: loop body
LE: loop exit
PB: predicated region body
PF: predicated region fallthrough
CT: control target
= control target key end

     0   :  { %12 = vsyncpa [#allocation3], 0  ;;  %s4527_s0 = inlined_call_operand.hbm [shape: bf16[16,256], index: 0, kind: input, shape index: {}]   ;;  %s4528_s1 = inlined_call_operand.hbm [shape: bf16[256,512], index: 1, kind: input, shape index: {}]   ;;  %s4529_s2 = inlined_call_operand.hbm [shape: f32[1,512], index: 2, kind: input, shape index: {}]   ;;  %s4530_s3 = inlined_call_operand.hbm [shape: bf16[512,768], index: 3, kind: input, shape index: {}]   ;;  %s4531_s4 = inlined_call_operand.hbm [shape: f32[1,768], index: 4, kind: input, shape index: {}]   ;;  %s4532_s5 = inlined_call_operand.hbm [shape: bf16[768,128], index: 5, kind: input, shape index: {}]   ;;  %s4533_s6 = inlined_call_operand.vmem [shape: f32[1,128], index: 6, kind: input, shape index: {}]   ;;  %s4534_s7 = inlined_call_operand.hbm [shape: bf16[16,128], index: 7, kind: output, shape index: {}]  }
   0x1   :  { %13 = vsyncpa [#allocation6], 0 }
   0x2   :  { %14 = vsyncpa [#allocation9], 0 }
   0x3   :  { %15 = vsyncpa [#allocation12], 0  ;;  %s34_s26 = sshll.u32 %s4528_s1, 4  ;;  %s35_s26 = int_to_ptr.hbm [resolvable:$true] %s34_s26 }
   0x4   :  { %16 = vsyncpa [#allocation4], 0  ;;  %s4384_s27 = smov [#allocation5]   ;;  %s58_s8 = sshll.u32 %s4530_s3, 4  ;;  %s59_s8 = int_to_ptr.hbm [resolvable:$true] %s58_s8 }
   0x5   :  { %s36_s28 = sshll.u32 %s4384_s27, 4  ;;  %s4385_s9 = smov 256   ;;  %s37_s28 = int_to_ptr.vmem [resolvable:$true] %s36_s28 }
   0x6   :  { %s4386_s10 = smov 16   ;;  %s4387_s11 = smov [#allocation8]  }
   0x7   :  { %42 = dma.hbm_to_vmem [thread:$0]  %s35_s26, 8192, %s37_s28, [#allocation6], %s4385_s9, %s4385_s9, %s4386_s10  }
   0x8   :  { %s60_s12 = sshll.u32 %s4387_s11, 4  ;;  %s4388_s13 = smov 384   ;;  %s61_s12 = int_to_ptr.vmem [resolvable:$true] %s60_s12 }
   0x9   :  { %s4389_s14 = smov 24   ;;  %s21_s16 = sshll.u32 %s4527_s0, 4  ;;  %s22_s16 = int_to_ptr.hbm [resolvable:$true] %s21_s16 }
   0xa   :  { %66 = dma.hbm_to_vmem [thread:$0]  %s59_s8, 24576, %s61_s12, [#allocation9], %s4388_s13, %s4388_s13, %s4389_s14  }
   0xb   :  { %s4390_s17 = smov [#allocation2]   ;;  %s48_s20 = sshll.u32 %s4529_s2, 4  ;;  %s49_s20 = int_to_ptr.hbm [resolvable:$true] %s48_s20 }
   0xc   :  { %s23_s18 = sshll.u32 %s4390_s17, 4  ;;  %s4391_s21 = smov 128   ;;  %s24_s18 = int_to_ptr.vmem [resolvable:$true] %s23_s18 }
   0xd   :  { %s4392_s22 = smov 8   ;;  %s4393_s23 = smov [#allocation7]  }
   0xe   :  { %29 = dma.hbm_to_vmem [thread:$0]  %s22_s16, 256, %s24_s18, [#allocation3], %s4391_s21, %s4391_s21, %s4392_s22  }
   0xf   :  { %s50_s24 = sshll.u32 %s4393_s23, 4  ;;  %s72_s27 = sshll.u32 %s4531_s4, 4  ;;  %s51_s24 = int_to_ptr.vmem [resolvable:$true] %s50_s24  ;;  %s73_s27 = int_to_ptr.hbm [resolvable:$true] %s72_s27 }
  0x10   :  { %53 = dma.hbm_to_vmem [thread:$0]  %s49_s20, 64, %s51_s24, [#allocation6]  }
  0x11   :  { %s82_s29 = sshll.u32 %s4532_s5, 4  ;;  %s4394_s30 = smov [#allocation10]   ;;  %s83_s29 = int_to_ptr.hbm [resolvable:$true] %s82_s29 }
  0x12   :  { %s74_s8 = sshll.u32 %s4394_s30, 4  ;;  %s4395_s2 = smov [#allocation11]   ;;  %s75_s8 = int_to_ptr.vmem [resolvable:$true] %s74_s8 }
  0x13   :  { %77 = dma.hbm_to_vmem [thread:$0]  %s73_s27, 96, %s75_s8, [#allocation9]  }
  0x14   :  { %s84_s9 = sshll.u32 %s4395_s2, 4  ;;  %s4396_s10 = smov 64   ;;  %s85_s9 = int_to_ptr.vmem [resolvable:$true] %s84_s9 }
  0x15   :  { %s4397_s11 = smov 4  }
  0x16   :  { %90 = dma.hbm_to_vmem [thread:$0]  %s83_s29, 6144, %s85_s9, [#allocation12], %s4396_s10, %s4396_s10, %s4397_s11  }
  0x17   :  { %4374 = dma.done.wait [#allocation3], 256  }
  0x18   :  { %4375 = vsyncadd [#allocation3], 4294967040 }
  0x19   :  { %4376 = dma.done.wait [#allocation6], 8256  }
  0x1a   :  { %4377 = vsyncadd [#allocation6], 4294959040 }
  0x1b   :  { %4378 = dma.done.wait [#allocation9], 24672  }
  0x1c   :  { %4379 = vsyncadd [#allocation9], 4294942624 }
  0x1d   :  { %4380 = dma.done.wait [#allocation12], 6144  }
  0x1e   :  { %4381 = vsyncadd [#allocation12], 4294961152  ;;  %v2779_v0 = vld [vmem:[#allocation5 + $0xe0] sm:$0xf]  ;;  %v3911_v1 = vld [vmem:[#allocation5 + $0xec] sm:$0xf0] }
  0x1f   :  { %v2907_v2 = vld [vmem:[#allocation5 + $0x1e0] sm:$0xf]  ;;  %v2780_v3 = vor.u32 %v3911_v1, %v2779_v0  ;;  %v3943_v4 = vld [vmem:[#allocation5 + $0x1ec] sm:$0xf0]  ;;  %v3909_v5 = vld [vmem:[#allocation5 + $0xe4] sm:$0xf] }
  0x20   :  { %v2781_v6 = vld [vmem:[#allocation5 + $0xf0] sm:$0xf0]  ;;  %v2908_v7 = vor.u32 %v3943_v4, %v2907_v2  ;;  %v3941_v9 = vld [vmem:[#allocation5 + $0x1e4] sm:$0xf]  ;;  %v2763_v11 = vld [vmem:[#allocation5 + $0xc0] sm:$0xf] }
  0x21   :  { %v2784_v8 = vor.u32 %v3909_v5, %v2781_v6  ;;  %v2909_v10 = vld [vmem:[#allocation5 + $0x1f0] sm:$0xf0]  ;;  %523 = vmatpush.bf16.msra.mxu0 %v2780_v3  ;;  %v3907_v13 = vld [vmem:[#allocation5 + $0xcc] sm:$0xf0]  ;;  %v2891_v14 = vld [vmem:[#allocation5 + $0x1c0] sm:$0xf] }
  0x22   :  { %v2912_v12 = vor.u32 %v3941_v9, %v2909_v10  ;;  %v3939_v15 = vld [vmem:[#allocation5 + $0x1cc] sm:$0xf0]  ;;  %537 = vmatpush.bf16.msra.mxu1 %v2908_v7  ;;  %v2764_v16 = vor.u32 %v3907_v13, %v2763_v11  ;;  %v3905_v18 = vld [vmem:[#allocation5 + $0xc4] sm:$0xf]  ;;  %v2765_v19 = vld [vmem:[#allocation5 + $0xd0] sm:$0xf0] }
  0x23   :  { %551 = vmatpush.bf16.msra.mxu2 %v2784_v8  ;;  %v2892_v17 = vor.u32 %v3939_v15, %v2891_v14  ;;  %v3937_v20 = vld [vmem:[#allocation5 + $0x1c4] sm:$0xf]  ;;  %v2768_v21 = vor.u32 %v3905_v18, %v2765_v19  ;;  %v2893_v22 = vld [vmem:[#allocation5 + $0x1d0] sm:$0xf0]  ;;  %v2747_v23 = vld [vmem:[#allocation5 + $0xa0] sm:$0xf] }
  0x24   :  { %565 = vmatpush.bf16.msra.mxu3 %v2912_v12  ;;  %v3903_v24 = vld [vmem:[#allocation5 + $0xac] sm:$0xf0]  ;;  %v2896_v25 = vor.u32 %v3937_v20, %v2893_v22  ;;  %v2875_v26 = vld [vmem:[#allocation5 + $0x1a0] sm:$0xf]  ;;  %v3901_v28 = vld [vmem:[#allocation5 + $0xa4] sm:$0xf] }
  0x25   :  { %v3935_v27 = vld [vmem:[#allocation5 + $0x1ac] sm:$0xf0]  ;;  %524 = vmatpush.bf16.msra.mxu0 %v2764_v16  ;;  %v2748_v29 = vor.u32 %v3903_v24, %v2747_v23  ;;  %v2749_v30 = vld [vmem:[#allocation5 + $0xb0] sm:$0xf0]  ;;  %v3933_v31 = vld [vmem:[#allocation5 + $0x1a4] sm:$0xf] }
  0x26   :  { %v2877_v32 = vld [vmem:[#allocation5 + $0x1b0] sm:$0xf0]  ;;  %538 = vmatpush.bf16.msra.mxu1 %v2892_v17  ;;  %v2876_v33 = vor.u32 %v3935_v27, %v2875_v26  ;;  %v2752_v34 = vor.u32 %v3901_v28, %v2749_v30  ;;  %v2731_v35 = vld [vmem:[#allocation5 + $0x80] sm:$0xf]  ;;  %v3899_v36 = vld [vmem:[#allocation5 + $0x8c] sm:$0xf0] }
  0x27   :  { %552 = vmatpush.bf16.msra.mxu2 %v2768_v21  ;;  %v2859_v37 = vld [vmem:[#allocation5 + $0x180] sm:$0xf]  ;;  %v2880_v38 = vor.u32 %v3933_v31, %v2877_v32  ;;  %v3931_v39 = vld [vmem:[#allocation5 + $0x18c] sm:$0xf0]  ;;  %v3897_v40 = vld [vmem:[#allocation5 + $0x84] sm:$0xf]  ;;  %v2732_v44 = vor.u32 %v3899_v36, %v2731_v35 }
  0x28   :  { %566 = vmatpush.bf16.msra.mxu3 %v2896_v25  ;;  %v2733_v41 = vld [vmem:[#allocation5 + $0x90] sm:$0xf0]  ;;  %v3929_v42 = vld [vmem:[#allocation5 + $0x184] sm:$0xf]  ;;  %v2860_v45 = vor.u32 %v3931_v39, %v2859_v37  ;;  %v2715_v47 = vld [vmem:[#allocation5 + $0x60] sm:$0xf] }
  0x29   :  { %v2861_v43 = vld [vmem:[#allocation5 + $0x190] sm:$0xf0]  ;;  %525 = vmatpush.bf16.msra.mxu0 %v2748_v29  ;;  %v2736_v46 = vor.u32 %v3897_v40, %v2733_v41  ;;  %v3895_v48 = vld [vmem:[#allocation5 + $0x6c] sm:$0xf0]  ;;  %v2843_v49 = vld [vmem:[#allocation5 + $0x160] sm:$0xf] }
  0x2a   :  { %539 = vmatpush.bf16.msra.mxu1 %v2876_v33  ;;  %v2864_v50 = vor.u32 %v3929_v42, %v2861_v43  ;;  %v3927_v51 = vld [vmem:[#allocation5 + $0x16c] sm:$0xf0]  ;;  %v3893_v52 = vld [vmem:[#allocation5 + $0x64] sm:$0xf]  ;;  %v2717_v53 = vld [vmem:[#allocation5 + $0x70] sm:$0xf0]  ;;  %v2716_v56 = vor.u32 %v3895_v48, %v2715_v47 }
  0x2b   :  { %553 = vmatpush.bf16.msra.mxu2 %v2752_v34  ;;  %v3925_v54 = vld [vmem:[#allocation5 + $0x164] sm:$0xf]  ;;  %v2845_v55 = vld [vmem:[#allocation5 + $0x170] sm:$0xf0]  ;;  %v2844_v57 = vor.u32 %v3927_v51, %v2843_v49  ;;  %v2720_v58 = vor.u32 %v3893_v52, %v2717_v53  ;;  %v2699_v59 = vld [vmem:[#allocation5 + $0x40] sm:$0xf] }
  0x2c   :  { %567 = vmatpush.bf16.msra.mxu3 %v2880_v38  ;;  %v3891_v60 = vld [vmem:[#allocation5 + $0x4c] sm:$0xf0]  ;;  %v2827_v61 = vld [vmem:[#allocation5 + $0x140] sm:$0xf]  ;;  %v2848_v62 = vor.u32 %v3925_v54, %v2845_v55  ;;  %v3889_v0 = vld [vmem:[#allocation5 + $0x44] sm:$0xf] }
  0x2d   :  { %526 = vmatpush.bf16.msra.mxu0 %v2732_v44  ;;  %v3923_v63 = vld [vmem:[#allocation5 + $0x14c] sm:$0xf0]  ;;  %v2701_v1 = vld [vmem:[#allocation5 + $0x50] sm:$0xf0]  ;;  %v3921_v2 = vld [vmem:[#allocation5 + $0x144] sm:$0xf]  ;;  %v2700_v4 = vor.u32 %v3891_v60, %v2699_v59 }
  0x2e   :  { %540 = vmatpush.bf16.msra.mxu1 %v2860_v45  ;;  %v2829_v3 = vld [vmem:[#allocation5 + $0x150] sm:$0xf0]  ;;  %v2683_v5 = vld [vmem:[#allocation5 + $0x20] sm:$0xf]  ;;  %v3887_v6 = vld [vmem:[#allocation5 + $0x2c] sm:$0xf0]  ;;  %v2828_v7 = vor.u32 %v3923_v63, %v2827_v61  ;;  %v2704_v8 = vor.u32 %v3889_v0, %v2701_v1 }
  0x2f   :  { %554 = vmatpush.bf16.msra.mxu2 %v2736_v46  ;;  %v2811_v9 = vld [vmem:[#allocation5 + $0x120] sm:$0xf]  ;;  %v3919_v10 = vld [vmem:[#allocation5 + $0x12c] sm:$0xf0]  ;;  %v3885_v11 = vld [vmem:[#allocation5 + $0x24] sm:$0xf]  ;;  %v2832_v12 = vor.u32 %v3921_v2, %v2829_v3  ;;  %v2684_v18 = vor.u32 %v3887_v6, %v2683_v5 }
  0x30   :  { %568 = vmatpush.bf16.msra.mxu3 %v2864_v50  ;;  %v2685_v13 = vld [vmem:[#allocation5 + $0x30] sm:$0xf0]  ;;  %v3917_v14 = vld [vmem:[#allocation5 + $0x124] sm:$0xf]  ;;  %v2667_v16 = vld [vmem:[#allocation5] sm:$0xf]  ;;  %v2812_v22 = vor.u32 %v3919_v10, %v2811_v9 }
  0x31   :  { %527 = vmatpush.bf16.msra.mxu0 %v2716_v56  ;;  %v2813_v15 = vld [vmem:[#allocation5 + $0x130] sm:$0xf0]  ;;  %v3883_v17 = vld [vmem:[#allocation5 + $0xc] sm:$0xf0]  ;;  %v2795_v19 = vld [vmem:[#allocation5 + $0x100] sm:$0xf]  ;;  %v2688_v23 = vor.u32 %v3885_v11, %v2685_v13 }
  0x32   :  { %541 = vmatpush.bf16.msra.mxu1 %v2844_v57  ;;  %v3915_v20 = vld [vmem:[#allocation5 + $0x10c] sm:$0xf0]  ;;  %v3881_v21 = vld [vmem:[#allocation5 + $0x4] sm:$0xf]  ;;  %v2816_v24 = vor.u32 %v3917_v14, %v2813_v15  ;;  %v2669_v25 = vld [vmem:[#allocation5 + $0x10] sm:$0xf0]  ;;  %v2668_v38 = vor.u32 %v3883_v17, %v2667_v16 }
  0x33   :  { %555 = vmatpush.bf16.msra.mxu2 %v2720_v58  ;;  %v117_v26 = vld [vmem:[#allocation2] sm:$0xff]  ;;  %v118_v27 = vld [vmem:[#allocation2 + $0x8] sm:$0xff]  ;;  %v3913_v28 = vld [vmem:[#allocation5 + $0x104] sm:$0xf]  ;;  %v2796_v43 = vor.u32 %v3915_v20, %v2795_v19  ;;  %v2672_v44 = vor.u32 %v3881_v21, %v2669_v25  ;;  %s4398_s12 = smov [#allocation13]  }
  0x34   :  { %569 = vmatpush.bf16.msra.mxu3 %v2848_v62  ;;  %v2797_v29 = vld [vmem:[#allocation5 + $0x110] sm:$0xf0]  ;;  %v2787_v30 = vld [vmem:[#allocation5 + $0xe8] sm:$0xf]  ;;  %v119_v31 = vunpack.c.l.bf16 %v117_v26  ;;  %v121_v32 = vunpack.c.l.bf16 %v118_v27  ;;  %v120_v33 = vunpack.c.h.bf16 %v117_v26  ;;  %v122_v34 = vunpack.c.h.bf16 %v118_v27  ;;  %v3912_v35 = vld [vmem:[#allocation5 + $0xf4] sm:$0xf0] }
  0x35   :  { %528 = vmatpush.bf16.msra.mxu0 %v2700_v4  ;;  %v2915_v36 = vld [vmem:[#allocation5 + $0x1e8] sm:$0xf]  ;;  %v3944_v37 = vld [vmem:[#allocation5 + $0x1f4] sm:$0xf0]  ;;  %v3910_v39 = vld [vmem:[#allocation5 + $0xec] sm:$0xf]  ;;  %v2800_v49 = vor.u32 %v3913_v28, %v2797_v29  ;;  %v2788_v50 = vor.u32 %v3912_v35, %v2787_v30 }
  0x36   :  { %542 = vmatpush.bf16.msra.mxu1 %v2828_v7  ;;  %v2789_v40 = vld [vmem:[#allocation5 + $0xf8] sm:$0xf0]  ;;  %v123_v41 = vmax.f32 %v119_v31, 0.0  ;;  %v125_v42 = vmax.f32 %v121_v32, 0.0  ;;  %v3942_v45 = vld [vmem:[#allocation5 + $0x1ec] sm:$0xf]  ;;  %v2916_v51 = vor.u32 %v3944_v37, %v2915_v36 }
  0x37   :  { %556 = vmatpush.bf16.msra.mxu2 %v2704_v8  ;;  %v2917_v46 = vld [vmem:[#allocation5 + $0x1f8] sm:$0xf0]  ;;  %v124_v47 = vmax.f32 %v120_v33, 0.0  ;;  %v126_v48 = vmax.f32 %v122_v34, 0.0  ;;  %v2792_v52 = vor.u32 %v3910_v39, %v2789_v40  ;;  %v2771_v53 = vld [vmem:[#allocation5 + $0xc8] sm:$0xf] }
  0x38   :  { %570 = vmatpush.bf16.msra.mxu3 %v2832_v12  ;;  %v3908_v54 = vld [vmem:[#allocation5 + $0xd4] sm:$0xf0]  ;;  %v2899_v55 = vld [vmem:[#allocation5 + $0x1c8] sm:$0xf]  ;;  %v2920_v56 = vor.u32 %v3942_v45, %v2917_v46  ;;  %v4460_v57 = vpack.c.bf16 %v125_v42, %v123_v41  ;;  %v3906_v59 = vld [vmem:[#allocation5 + $0xcc] sm:$0xf] }
  0x39   :  { %529 = vmatpush.bf16.msra.mxu0 %v2684_v18  ;;  %v3940_v58 = vld [vmem:[#allocation5 + $0x1d4] sm:$0xf0]  ;;  %v2773_v60 = vld [vmem:[#allocation5 + $0xd8] sm:$0xf0]  ;;  %v4462_v61 = vpack.c.bf16 %v126_v48, %v124_v47  ;;  %v3938_v62 = vld [vmem:[#allocation5 + $0x1cc] sm:$0xf]  ;;  %v2772_v0 = vor.u32 %v3908_v54, %v2771_v53 }
  0x3a   :  { %543 = vmatpush.bf16.msra.mxu1 %v2812_v22  ;;  %v2901_v63 = vld [vmem:[#allocation5 + $0x1d8] sm:$0xf0]  ;;  %v2900_v1 = vor.u32 %v3940_v58, %v2899_v55  ;;  %v2776_v2 = vor.u32 %v3906_v59, %v2773_v60  ;;  %v2755_v3 = vld [vmem:[#allocation5 + $0xa8] sm:$0xf]  ;;  %v3904_v4 = vld [vmem:[#allocation5 + $0xb4] sm:$0xf0] }
  0x3b   :  { %557 = vmatpush.bf16.msra.mxu2 %v2688_v23  ;;  %v2883_v5 = vld [vmem:[#allocation5 + $0x1a8] sm:$0xf]  ;;  %v2904_v6 = vor.u32 %v3938_v62, %v2901_v63  ;;  %v3936_v7 = vld [vmem:[#allocation5 + $0x1b4] sm:$0xf0]  ;;  %v3902_v8 = vld [vmem:[#allocation5 + $0xac] sm:$0xf]  ;;  %v2756_v12 = vor.u32 %v3904_v4, %v2755_v3 }
  0x3c   :  { %571 = vmatpush.bf16.msra.mxu3 %v2816_v24  ;;  %v2757_v9 = vld [vmem:[#allocation5 + $0xb8] sm:$0xf0]  ;;  %v3934_v10 = vld [vmem:[#allocation5 + $0x1ac] sm:$0xf]  ;;  %v2884_v13 = vor.u32 %v3936_v7, %v2883_v5  ;;  %v2739_v15 = vld [vmem:[#allocation5 + $0x88] sm:$0xf] }
  0x3d   :  { %530 = vmatpush.bf16.msra.mxu0 %v2668_v38  ;;  %v2885_v11 = vld [vmem:[#allocation5 + $0x1b8] sm:$0xf0]  ;;  %v2760_v14 = vor.u32 %v3902_v8, %v2757_v9  ;;  %v3900_v16 = vld [vmem:[#allocation5 + $0x94] sm:$0xf0]  ;;  %v2867_v17 = vld [vmem:[#allocation5 + $0x188] sm:$0xf] }
  0x3e   :  { %544 = vmatpush.bf16.msra.mxu1 %v2796_v43  ;;  %v2888_v18 = vor.u32 %v3934_v10, %v2885_v11  ;;  %v3932_v19 = vld [vmem:[#allocation5 + $0x194] sm:$0xf0]  ;;  %v3898_v20 = vld [vmem:[#allocation5 + $0x8c] sm:$0xf]  ;;  %v2741_v21 = vld [vmem:[#allocation5 + $0x98] sm:$0xf0]  ;;  %v2740_v24 = vor.u32 %v3900_v16, %v2739_v15 }
  0x3f   :  { %558 = vmatpush.bf16.msra.mxu2 %v2672_v44  ;;  %v3930_v22 = vld [vmem:[#allocation5 + $0x18c] sm:$0xf]  ;;  %v2869_v23 = vld [vmem:[#allocation5 + $0x198] sm:$0xf0]  ;;  %v2868_v25 = vor.u32 %v3932_v19, %v2867_v17  ;;  %v2744_v26 = vor.u32 %v3898_v20, %v2741_v21  ;;  %v2723_v27 = vld [vmem:[#allocation5 + $0x68] sm:$0xf] }
  0x40   :  { %572 = vmatpush.bf16.msra.mxu3 %v2800_v49  ;;  %531 = vmatmul.bf16.vlgmr.msra.gmra.mxu0 %v4460_v57  ;;  %v3896_v28 = vld [vmem:[#allocation5 + $0x74] sm:$0xf0]  ;;  %v2851_v29 = vld [vmem:[#allocation5 + $0x168] sm:$0xf]  ;;  %v2872_v30 = vor.u32 %v3930_v22, %v2869_v23  ;;  %v3894_v32 = vld [vmem:[#allocation5 + $0x6c] sm:$0xf] }
  0x41   :  { %579 = vmatpush.bf16.msrb.mxu0 %v2788_v50  ;;  %545 = vmatmul.bf16.vlgmr.msra.gmra.mxu1 %v4462_v61  ;;  %v3928_v31 = vld [vmem:[#allocation5 + $0x174] sm:$0xf0]  ;;  %v2725_v33 = vld [vmem:[#allocation5 + $0x78] sm:$0xf0]  ;;  %v3926_v34 = vld [vmem:[#allocation5 + $0x16c] sm:$0xf]  ;;  %v2724_v36 = vor.u32 %v3896_v28, %v2723_v27 }
  0x42   :  { %593 = vmatpush.bf16.msrb.mxu1 %v2916_v51  ;;  %559 = vmatmul.bf16.vlgmr.msra.gmra.mxu2 %v4460_v57  ;;  %v2853_v35 = vld [vmem:[#allocation5 + $0x178] sm:$0xf0]  ;;  %v2852_v37 = vor.u32 %v3928_v31, %v2851_v29  ;;  %v2728_v38 = vor.u32 %v3894_v32, %v2725_v33  ;;  %v2707_v39 = vld [vmem:[#allocation5 + $0x48] sm:$0xf]  ;;  %v3892_v40 = vld [vmem:[#allocation5 + $0x54] sm:$0xf0] }
  0x43   :  { %607 = vmatpush.bf16.msrb.mxu2 %v2792_v52  ;;  %573 = vmatmul.bf16.vlgmr.msra.gmra.mxu3 %v4462_v61  ;;  %v2835_v41 = vld [vmem:[#allocation5 + $0x148] sm:$0xf]  ;;  %v2856_v42 = vor.u32 %v3926_v34, %v2853_v35  ;;  %v3924_v43 = vld [vmem:[#allocation5 + $0x154] sm:$0xf0]  ;;  %v3890_v44 = vld [vmem:[#allocation5 + $0x4c] sm:$0xf]  ;;  %v2708_v48 = vor.u32 %v3892_v40, %v2707_v39 }
  0x44   :  { %621 = vmatpush.bf16.msrb.mxu3 %v2920_v56  ;;  %v2709_v45 = vld [vmem:[#allocation5 + $0x58] sm:$0xf0]  ;;  %v3922_v46 = vld [vmem:[#allocation5 + $0x14c] sm:$0xf]  ;;  %v2691_v49 = vld [vmem:[#allocation5 + $0x28] sm:$0xf]  ;;  %v2836_v50 = vor.u32 %v3924_v43, %v2835_v41 }
  0x45   :  { %580 = vmatpush.bf16.msrb.mxu0 %v2772_v0  ;;  %v2837_v47 = vld [vmem:[#allocation5 + $0x158] sm:$0xf0]  ;;  %v2712_v51 = vor.u32 %v3890_v44, %v2709_v45  ;;  %v3888_v52 = vld [vmem:[#allocation5 + $0x34] sm:$0xf0]  ;;  %v2819_v53 = vld [vmem:[#allocation5 + $0x128] sm:$0xf] }
  0x46   :  { %594 = vmatpush.bf16.msrb.mxu1 %v2900_v1  ;;  %v2840_v54 = vor.u32 %v3922_v46, %v2837_v47  ;;  %v3920_v55 = vld [vmem:[#allocation5 + $0x134] sm:$0xf0]  ;;  %v3886_v56 = vld [vmem:[#allocation5 + $0x2c] sm:$0xf]  ;;  %v2693_v58 = vld [vmem:[#allocation5 + $0x38] sm:$0xf0]  ;;  %v2692_v62 = vor.u32 %v3888_v52, %v2691_v49 }
  0x47   :  { %608 = vmatpush.bf16.msrb.mxu2 %v2776_v2  ;;  %v3918_v59 = vld [vmem:[#allocation5 + $0x12c] sm:$0xf]  ;;  %v2821_v60 = vld [vmem:[#allocation5 + $0x138] sm:$0xf0]  ;;  %v2675_v63 = vld [vmem:[#allocation5 + $0x8] sm:$0xf]  ;;  %v2820_v0 = vor.u32 %v3920_v55, %v2819_v53  ;;  %v2696_v1 = vor.u32 %v3886_v56, %v2693_v58 }
  0x48   :  { %622 = vmatpush.bf16.msrb.mxu3 %v2904_v6  ;;  %v3884_v2 = vld [vmem:[#allocation5 + $0x14] sm:$0xf0]  ;;  %v2803_v3 = vld [vmem:[#allocation5 + $0x108] sm:$0xf]  ;;  %v2824_v5 = vor.u32 %v3918_v59, %v2821_v60  ;;  %v3882_v6 = vld [vmem:[#allocation5 + $0xc] sm:$0xf] }
  0x49   :  { %581 = vmatpush.bf16.msrb.mxu0 %v2756_v12  ;;  %v3916_v4 = vld [vmem:[#allocation5 + $0x114] sm:$0xf0]  ;;  %v2677_v7 = vld [vmem:[#allocation5 + $0x18] sm:$0xf0]  ;;  %v3914_v8 = vld [vmem:[#allocation5 + $0x10c] sm:$0xf]  ;;  %v2676_v12 = vor.u32 %v3884_v2, %v2675_v63 }
  0x4a   :  { %595 = vmatpush.bf16.msrb.mxu1 %v2884_v13  ;;  %v2805_v9 = vld [vmem:[#allocation5 + $0x118] sm:$0xf0]  ;;  %v3091_v10 = vld [vmem:[#allocation8 + $0x150] sm:$0xf]  ;;  %v3990_v11 = vld [vmem:[#allocation8 + $0x164] sm:$0xf0]  ;;  %v2804_v15 = vor.u32 %v3916_v4, %v2803_v3  ;;  %v2680_v16 = vor.u32 %v3882_v6, %v2677_v7 }
  0x4b   :  { %609 = vmatpush.bf16.msrb.mxu2 %v2760_v14  ;;  %v3283_v13 = vld [vmem:[#allocation8 + $0x2d0] sm:$0xf]  ;;  %v4038_v14 = vld [vmem:[#allocation8 + $0x2e4] sm:$0xf0]  ;;  %v2808_v17 = vor.u32 %v3914_v8, %v2805_v9  ;;  %v3067_v21 = vld [vmem:[#allocation8 + $0x120] sm:$0xf] }
  0x4c   :  { %623 = vmatpush.bf16.msrb.mxu3 %v2888_v18  ;;  %v3092_v18 = vor.u32 %v3990_v11, %v3091_v10  ;;  %v3475_v19 = vld [vmem:[#allocation8 + $0x450] sm:$0xf]  ;;  %v4086_v20 = vld [vmem:[#allocation8 + $0x464] sm:$0xf0]  ;;  %v3984_v22 = vld [vmem:[#allocation8 + $0x134] sm:$0xf0]  ;;  %v3284_v23 = vor.u32 %v4038_v14, %v3283_v13 }
  0x4d   :  { %582 = vmatpush.bf16.msrb.mxu0 %v2740_v24  ;;  %v3259_v24 = vld [vmem:[#allocation8 + $0x2a0] sm:$0xf]  ;;  %v3068_v27 = vor.u32 %v3984_v22, %v3067_v21  ;;  %v4080_v29 = vld [vmem:[#allocation8 + $0x434] sm:$0xf0]  ;;  %v3978_v31 = vld [vmem:[#allocation8 + $0x104] sm:$0xf0] }
  0x4e   :  { %596 = vmatpush.bf16.msrb.mxu1 %v2868_v25  ;;  %v4032_v25 = vld [vmem:[#allocation8 + $0x2b4] sm:$0xf0]  ;;  %v3451_v28 = vld [vmem:[#allocation8 + $0x420] sm:$0xf]  ;;  %v3667_v33 = vld [vmem:[#allocation8 + $0x5d0] sm:$0xf] }
  0x4f   :  { %610 = vmatpush.bf16.msrb.mxu2 %v2744_v26  ;;  %v3476_v26 = vor.u32 %v4086_v20, %v3475_v19  ;;  %v3260_v32 = vor.u32 %v4032_v25, %v3259_v24  ;;  %v3235_v34 = vld [vmem:[#allocation8 + $0x270] sm:$0xf]  ;;  %v4026_v35 = vld [vmem:[#allocation8 + $0x284] sm:$0xf0]  ;;  %v3019_v40 = vld [vmem:[#allocation8 + $0xc0] sm:$0xf] }
  0x50   :  { %624 = vmatpush.bf16.msrb.mxu3 %v2872_v30  ;;  %v3043_v30 = vld [vmem:[#allocation8 + $0xf0] sm:$0xf]  ;;  %v3972_v43 = vld [vmem:[#allocation8 + $0xd4] sm:$0xf0]  ;;  %v3236_v44 = vor.u32 %v4026_v35, %v3235_v34  ;;  %v3643_v45 = vld [vmem:[#allocation8 + $0x5a0] sm:$0xf] }
  0x51   :  { %583 = vmatpush.bf16.msrb.mxu0 %v2724_v36  ;;  %v4134_v36 = vld [vmem:[#allocation8 + $0x5e4] sm:$0xf0]  ;;  %v3044_v39 = vor.u32 %v3978_v31, %v3043_v30  ;;  %v3427_v41 = vld [vmem:[#allocation8 + $0x3f0] sm:$0xf]  ;;  %v4128_v46 = vld [vmem:[#allocation8 + $0x5b4] sm:$0xf0] }
  0x52   :  { %597 = vmatpush.bf16.msrb.mxu1 %v2852_v37  ;;  %v3452_v37 = vor.u32 %v4080_v29, %v3451_v28  ;;  %v4020_v47 = vld [vmem:[#allocation8 + $0x254] sm:$0xf0]  ;;  %v3187_v53 = vld [vmem:[#allocation8 + $0x210] sm:$0xf]  ;;  %v2971_v56 = vld [vmem:[#allocation8 + $0x60] sm:$0xf] }
  0x53   :  { %611 = vmatpush.bf16.msrb.mxu2 %v2728_v38  ;;  %v3668_v38 = vor.u32 %v4134_v36, %v3667_v33  ;;  %v3960_v58 = vld [vmem:[#allocation8 + $0x74] sm:$0xf0]  ;;  %v3163_v60 = vld [vmem:[#allocation8 + $0x1e0] sm:$0xf]  ;;  %v3139_v3 = vld [vmem:[#allocation8 + $0x1b0] sm:$0xf] }
  0x54   :  { %625 = vmatpush.bf16.msrb.mxu3 %v2856_v42  ;;  %v4074_v42 = vld [vmem:[#allocation8 + $0x404] sm:$0xf0]  ;;  %v2972_v63 = vor.u32 %v3960_v58, %v2971_v56  ;;  %v2923_v6 = vld [vmem:[#allocation8] sm:$0xf]  ;;  %v3948_v7 = vld [vmem:[#allocation8 + $0x14] sm:$0xf0] }
  0x55   :  { %584 = vmatpush.bf16.msrb.mxu0 %v2708_v48  ;;  %v3644_v48 = vor.u32 %v4128_v46, %v3643_v45  ;;  %v3428_v49 = vor.u32 %v4074_v42, %v3427_v41  ;;  %v4002_v4 = vld [vmem:[#allocation8 + $0x1c4] sm:$0xf0]  ;;  %v3987_v8 = vld [vmem:[#allocation8 + $0x154] sm:$0xf]  ;;  %v3093_v10 = vld [vmem:[#allocation8 + $0x168] sm:$0xf0] }
  0x56   :  { %598 = vmatpush.bf16.msrb.mxu1 %v2836_v50  ;;  %v2995_v50 = vld [vmem:[#allocation8 + $0x90] sm:$0xf]  ;;  %v3140_v9 = vor.u32 %v4002_v4, %v3139_v3  ;;  %v3115_v11 = vld [vmem:[#allocation8 + $0x180] sm:$0xf]  ;;  %v4035_v13 = vld [vmem:[#allocation8 + $0x2d4] sm:$0xf] }
  0x57   :  { %612 = vmatpush.bf16.msrb.mxu2 %v2712_v51  ;;  %v3966_v51 = vld [vmem:[#allocation8 + $0xa4] sm:$0xf0]  ;;  %v3285_v14 = vld [vmem:[#allocation8 + $0x2e8] sm:$0xf0]  ;;  %v3069_v19 = vld [vmem:[#allocation8 + $0x138] sm:$0xf0] }
  0x58   :  { %626 = vmatpush.bf16.msrb.mxu3 %v2840_v54  ;;  %v4014_v54 = vld [vmem:[#allocation8 + $0x224] sm:$0xf0]  ;;  %v2996_v55 = vor.u32 %v3966_v51, %v2995_v50  ;;  %v3288_v20 = vor.u32 %v4035_v13, %v3285_v14  ;;  %v4029_v21 = vld [vmem:[#allocation8 + $0x2a4] sm:$0xf]  ;;  %v3261_v22 = vld [vmem:[#allocation8 + $0x2b8] sm:$0xf0] }
  0x59   :  { %585 = vmatpush.bf16.msrb.mxu0 %v2692_v62  ;;  %v3188_v59 = vor.u32 %v4014_v54, %v3187_v53  ;;  %v4008_v62 = vld [vmem:[#allocation8 + $0x1f4] sm:$0xf0]  ;;  %v3975_v24 = vld [vmem:[#allocation8 + $0xf4] sm:$0xf]  ;;  %v3045_v25 = vld [vmem:[#allocation8 + $0x108] sm:$0xf0] }
  0x5a   :  { %599 = vmatpush.bf16.msrb.mxu1 %v2820_v0  ;;  %v2947_v0 = vld [vmem:[#allocation8 + $0x30] sm:$0xf]  ;;  %v3164_v2 = vor.u32 %v4008_v62, %v3163_v60  ;;  %v3403_v28 = vld [vmem:[#allocation8 + $0x3c0] sm:$0xf]  ;;  %v4068_v29 = vld [vmem:[#allocation8 + $0x3d4] sm:$0xf0] }
  0x5b   :  { %613 = vmatpush.bf16.msrb.mxu2 %v2696_v1  ;;  %v3954_v1 = vld [vmem:[#allocation8 + $0x44] sm:$0xf0]  ;;  %v3969_v30 = vld [vmem:[#allocation8 + $0xc4] sm:$0xf]  ;;  %v3404_v31 = vor.u32 %v4068_v29, %v3403_v28  ;;  %v3619_v34 = vld [vmem:[#allocation8 + $0x570] sm:$0xf] }
  0x5c   :  { %627 = vmatpush.bf16.msrb.mxu3 %v2824_v5  ;;  %v2948_v5 = vor.u32 %v3954_v1, %v2947_v0  ;;  %v4122_v35 = vld [vmem:[#allocation8 + $0x584] sm:$0xf0]  ;;  %v4023_v36 = vld [vmem:[#allocation8 + $0x274] sm:$0xf]  ;;  %v3595_v46 = vld [vmem:[#allocation8 + $0x540] sm:$0xf] }
  0x5d   :  { %586 = vmatpush.bf16.msrb.mxu0 %v2676_v12  ;;  %v3996_v12 = vld [vmem:[#allocation8 + $0x194] sm:$0xf0]  ;;  %v4062_v41 = vld [vmem:[#allocation8 + $0x3a4] sm:$0xf0]  ;;  %v3963_v42 = vld [vmem:[#allocation8 + $0x94] sm:$0xf] }
  0x5e   :  { %600 = vmatpush.bf16.msrb.mxu1 %v2804_v15  ;;  %v2924_v15 = vor.u32 %v3948_v7, %v2923_v6  ;;  %v3355_v50 = vld [vmem:[#allocation8 + $0x360] sm:$0xf]  ;;  %v4056_v51 = vld [vmem:[#allocation8 + $0x374] sm:$0xf0]  ;;  %v2973_v54 = vld [vmem:[#allocation8 + $0x78] sm:$0xf0] }
  0x5f   :  { %614 = vmatpush.bf16.msrb.mxu2 %v2680_v16  ;;  %v3096_v16 = vor.u32 %v3987_v8, %v3093_v10  ;;  %v3356_v53 = vor.u32 %v4056_v51, %v3355_v50  ;;  %v3571_v56 = vld [vmem:[#allocation8 + $0x510] sm:$0xf]  ;;  %v4110_v58 = vld [vmem:[#allocation8 + $0x524] sm:$0xf0]  ;;  %v3189_v62 = vld [vmem:[#allocation8 + $0x228] sm:$0xf0] }
  0x60   :  { %628 = vmatpush.bf16.msrb.mxu3 %v2808_v17  ;;  %587 = vmatmul.bf16.vlgmr.msrb.gmra.mxu0 %v4460_v57  ;;  %v3116_v17 = vor.u32 %v3996_v12, %v3115_v11  ;;  %v3572_v60 = vor.u32 %v4110_v58, %v3571_v56  ;;  %v3331_v0 = vld [vmem:[#allocation8 + $0x330] sm:$0xf]  ;;  %v4050_v1 = vld [vmem:[#allocation8 + $0x344] sm:$0xf0]  ;;  %v2949_v4 = vld [vmem:[#allocation8 + $0x48] sm:$0xf0] }
  0x61   :  { %1813 = vmatpush.bf16.msra.mxu0 %v3092_v18  ;;  %601 = vmatmul.bf16.vlgmr.msrb.gmra.mxu1 %v4462_v61  ;;  %v3981_v18 = vld [vmem:[#allocation8 + $0x124] sm:$0xf]  ;;  %v3332_v3 = vor.u32 %v4050_v1, %v3331_v0  ;;  %v3547_v6 = vld [vmem:[#allocation8 + $0x4e0] sm:$0xf]  ;;  %v4104_v7 = vld [vmem:[#allocation8 + $0x4f4] sm:$0xf0] }
  0x62   :  { %1827 = vmatpush.bf16.msra.mxu1 %v3284_v23  ;;  %615 = vmatmul.bf16.vlgmr.msrb.gmra.mxu2 %v4460_v57  ;;  %v3211_v57 = vld [vmem:[#allocation8 + $0x240] sm:$0xf]  ;;  %v3072_v23 = vor.u32 %v3981_v18, %v3069_v19  ;;  %v4005_v8 = vld [vmem:[#allocation8 + $0x1e4] sm:$0xf]  ;;  %v3165_v10 = vld [vmem:[#allocation8 + $0x1f8] sm:$0xf0] }
  0x63   :  { %629 = vmatmul.bf16.vlgmr.msrb.gmra.mxu3 %v4462_v61  ;;  %1841 = vmatpush.bf16.msra.mxu2 %v3476_v26  ;;  %v3020_v61 = vor.u32 %v3972_v43, %v3019_v40  ;;  %v3212_v52 = vor.u32 %v4020_v47, %v3211_v57  ;;  %v3264_v26 = vor.u32 %v4029_v21, %v3261_v22  ;;  %v3379_v40 = vld [vmem:[#allocation8 + $0x390] sm:$0xf]  ;;  %v4116_v57 = vld [vmem:[#allocation8 + $0x554] sm:$0xf0]  ;;  %v3307_v12 = vld [vmem:[#allocation8 + $0x300] sm:$0xf] }
  0x64   :  { %1855 = vmatpush.bf16.msra.mxu3 %v3668_v38  ;;  %v3237_v38 = vld [vmem:[#allocation8 + $0x288] sm:$0xf0]  ;;  %v3380_v43 = vor.u32 %v4062_v41, %v3379_v40  ;;  %v3596_v47 = vor.u32 %v4116_v57, %v3595_v46  ;;  %v3168_v11 = vor.u32 %v4005_v8, %v3165_v10  ;;  %v4044_v13 = vld [vmem:[#allocation8 + $0x314] sm:$0xf0]  ;;  %v3945_v14 = vld [vmem:[#allocation8 + $0x4] sm:$0xf] }
  0x65   :  { %1814 = vmatpush.bf16.msra.mxu0 %v3068_v27  ;;  %v3048_v27 = vor.u32 %v3975_v24, %v3045_v25  ;;  %v3477_v18 = vld [vmem:[#allocation8 + $0x468] sm:$0xf0]  ;;  %v3523_v21 = vld [vmem:[#allocation8 + $0x4b0] sm:$0xf]  ;;  %v4098_v22 = vld [vmem:[#allocation8 + $0x4c4] sm:$0xf0] }
  0x66   :  { %1828 = vmatpush.bf16.msra.mxu1 %v3260_v32  ;;  %v3021_v32 = vld [vmem:[#allocation8 + $0xd8] sm:$0xf0]  ;;  %v3141_v24 = vld [vmem:[#allocation8 + $0x1c8] sm:$0xf0]  ;;  %v3524_v25 = vor.u32 %v4098_v22, %v3523_v21  ;;  %v4065_v46 = vld [vmem:[#allocation8 + $0x3c4] sm:$0xf] }
  0x67   :  { %1842 = vmatpush.bf16.msra.mxu2 %v3452_v37  ;;  %v3024_v33 = vor.u32 %v3969_v30, %v3021_v32  ;;  %v3620_v37 = vor.u32 %v4122_v35, %v3619_v34  ;;  %v3453_v28 = vld [vmem:[#allocation8 + $0x438] sm:$0xf0]  ;;  %v3499_v30 = vld [vmem:[#allocation8 + $0x480] sm:$0xf]  ;;  %v4131_v35 = vld [vmem:[#allocation8 + $0x5d4] sm:$0xf] }
  0x68   :  { %1856 = vmatpush.bf16.msra.mxu3 %v3644_v48  ;;  %v4017_v48 = vld [vmem:[#allocation8 + $0x244] sm:$0xf]  ;;  %v3117_v34 = vld [vmem:[#allocation8 + $0x198] sm:$0xf0]  ;;  %v3429_v40 = vld [vmem:[#allocation8 + $0x408] sm:$0xf0] }
  0x69   :  { %1815 = vmatpush.bf16.msra.mxu0 %v3044_v39  ;;  %v3240_v39 = vor.u32 %v4023_v36, %v3237_v38  ;;  %v3405_v57 = vld [vmem:[#allocation8 + $0x3d8] sm:$0xf0]  ;;  %v4113_v56 = vld [vmem:[#allocation8 + $0x544] sm:$0xf]  ;;  %v3333_v10 = vld [vmem:[#allocation8 + $0x348] sm:$0xf0] }
  0x6a   :  { %1829 = vmatpush.bf16.msra.mxu1 %v3236_v44  ;;  %v2997_v44 = vld [vmem:[#allocation8 + $0xa8] sm:$0xf0]  ;;  %v3597_v58 = vld [vmem:[#allocation8 + $0x558] sm:$0xf0]  ;;  %v4041_v22 = vld [vmem:[#allocation8 + $0x304] sm:$0xf] }
  0x6b   :  { %1843 = vmatpush.bf16.msra.mxu2 %v3428_v49  ;;  %v3000_v45 = vor.u32 %v3963_v42, %v2997_v44  ;;  %v3213_v49 = vld [vmem:[#allocation8 + $0x258] sm:$0xf0]  ;;  %v4125_v42 = vld [vmem:[#allocation8 + $0x5a4] sm:$0xf]  ;;  %s2647_s13 = sshll.u32 %s4398_s12, 4  ;;  %s2648_s13 = int_to_ptr.vmem [resolvable:$true] %s2647_s13 }
  0x6c   :  { %1857 = vmatpush.bf16.msra.mxu3 %v3620_v37  ;;  %v3669_v37 = vld [vmem:[#allocation8 + $0x5e8] sm:$0xf0] }
  0x6d   :  { %1816 = vmatpush.bf16.msra.mxu0 %v3020_v61  ;;  %v3216_v61 = vor.u32 %v4017_v48, %v3213_v49  ;;  %v3672_v38 = vor.u32 %v4131_v35, %v3669_v37  ;;  %v4119_v48 = vld [vmem:[#allocation8 + $0x574] sm:$0xf]  ;;  %v3621_v49 = vld [vmem:[#allocation8 + $0x588] sm:$0xf0]  ;;  %v3291_v37 = vld [vmem:[#allocation8 + $0x2d8] sm:$0xf] }
  0x6e   :  { %1830 = vmatpush.bf16.msra.mxu1 %v3212_v52  ;;  %v3957_v52 = vld [vmem:[#allocation8 + $0x64] sm:$0xf]  ;;  %v3624_v50 = vor.u32 %v4119_v48, %v3621_v49 }
  0x6f   :  { %1844 = vmatpush.bf16.msra.mxu2 %v3404_v31  ;;  %v4092_v31 = vld [vmem:[#allocation8 + $0x494] sm:$0xf0] }
  0x70   :  { %1858 = vmatpush.bf16.msra.mxu3 %v3596_v47  ;;  %v3500_v32 = vor.u32 %v4092_v31, %v3499_v30  ;;  %v3408_v47 = vor.u32 %v4065_v46, %v3405_v57  ;;  %v3985_v31 = vld [vmem:[#allocation8 + $0x13c] sm:$0xf0]  ;;  %v3979_v46 = vld [vmem:[#allocation8 + $0x10c] sm:$0xf0] }
  0x71   :  { %1817 = vmatpush.bf16.msra.mxu0 %v2996_v55  ;;  %v2976_v55 = vor.u32 %v3957_v52, %v2973_v54  ;;  %v4059_v52 = vld [vmem:[#allocation8 + $0x394] sm:$0xf] }
  0x72   :  { %1831 = vmatpush.bf16.msra.mxu1 %v3188_v59  ;;  %v4011_v59 = vld [vmem:[#allocation8 + $0x214] sm:$0xf] }
  0x73   :  { %1845 = vmatpush.bf16.msra.mxu2 %v3380_v43  ;;  %v3645_v43 = vld [vmem:[#allocation8 + $0x5b8] sm:$0xf0] }
  0x74   :  { %1859 = vmatpush.bf16.msra.mxu3 %v3572_v60  ;;  %v3648_v44 = vor.u32 %v4125_v42, %v3645_v43  ;;  %v3600_v60 = vor.u32 %v4113_v56, %v3597_v58  ;;  %v4089_v42 = vld [vmem:[#allocation8 + $0x484] sm:$0xf]  ;;  %v3501_v43 = vld [vmem:[#allocation8 + $0x498] sm:$0xf0]  ;;  %v3243_v56 = vld [vmem:[#allocation8 + $0x278] sm:$0xf] }
  0x75   :  { %1818 = vmatpush.bf16.msra.mxu0 %v2972_v63  ;;  %v3192_v63 = vor.u32 %v4011_v59, %v3189_v62  ;;  %v4053_v62 = vld [vmem:[#allocation8 + $0x364] sm:$0xf]  ;;  %v3504_v57 = vor.u32 %v4089_v42, %v3501_v43  ;;  %v4027_v58 = vld [vmem:[#allocation8 + $0x28c] sm:$0xf0] }
  0x76   :  { %1832 = vmatpush.bf16.msra.mxu1 %v3164_v2  ;;  %v3951_v2 = vld [vmem:[#allocation8 + $0x34] sm:$0xf] }
  0x77   :  { %1846 = vmatpush.bf16.msra.mxu2 %v3356_v53  ;;  %v3381_v53 = vld [vmem:[#allocation8 + $0x3a8] sm:$0xf0] }
  0x79   :  { %1819 = vmatpush.bf16.msra.mxu0 %v2948_v5  ;;  %v2952_v5 = vor.u32 %v3951_v2, %v2949_v4  ;;  %v4107_v2 = vld [vmem:[#allocation8 + $0x514] sm:$0xf] }
  0x7a   :  { %1833 = vmatpush.bf16.msra.mxu1 %v3140_v9  ;;  %v3548_v9 = vor.u32 %v4104_v7, %v3547_v6 }
  0x7b   :  { %1847 = vmatpush.bf16.msra.mxu2 %v3332_v3  ;;  %v3573_v3 = vld [vmem:[#allocation8 + $0x528] sm:$0xf0] }
  0x7c   :  { %1860 = vmatpush.bf16.msra.mxu3 %v3548_v9  ;;  %v3576_v6 = vor.u32 %v4107_v2, %v3573_v3  ;;  %v4047_v9 = vld [vmem:[#allocation8 + $0x334] sm:$0xf]  ;;  %v3219_v3 = vld [vmem:[#allocation8 + $0x248] sm:$0xf] }
  0x7d   :  { %1820 = vmatpush.bf16.msra.mxu0 %v2924_v15  ;;  %v3308_v15 = vor.u32 %v4044_v13, %v3307_v12  ;;  %v3336_v13 = vor.u32 %v4047_v9, %v3333_v10  ;;  %v3195_v10 = vld [vmem:[#allocation8 + $0x218] sm:$0xf] }
  0x7e   :  { %1834 = vmatpush.bf16.msra.mxu1 %v3116_v17  ;;  %v4083_v17 = vld [vmem:[#allocation8 + $0x454] sm:$0xf] }
  0x7f   :  { %1848 = vmatpush.bf16.msra.mxu2 %v3308_v15  ;;  %v4101_v15 = vld [vmem:[#allocation8 + $0x4e4] sm:$0xf] }
  0x80   :  { %1861 = vmatpush.bf16.msra.mxu3 %v3524_v25 }
  0x81   :  { %1869 = vmatpush.bf16.msrb.mxu0 %v3096_v16  ;;  %v2925_v16 = vld [vmem:[#allocation8 + $0x18] sm:$0xf0] }
  0x82   :  { %1883 = vmatpush.bf16.msrb.mxu1 %v3288_v20  ;;  %v2928_v19 = vor.u32 %v3945_v14, %v2925_v16  ;;  %v3480_v20 = vor.u32 %v4083_v17, %v3477_v18  ;;  %v3549_v16 = vld [vmem:[#allocation8 + $0x4f8] sm:$0xf0] }
  0x83   :  { %v3552_v21 = vor.u32 %v4101_v15, %v3549_v16 }
  0x84   :  { %1897 = vmatpush.bf16.msrb.mxu2 %v3480_v20  ;;  %1862 = vmatpush.bf16.msra.mxu3 %v3500_v32  ;;  %v3991_v20 = vld [vmem:[#allocation8 + $0x16c] sm:$0xf0]  ;;  %v4095_v32 = vld [vmem:[#allocation8 + $0x4b4] sm:$0xf] }
  0x85   :  { %1870 = vmatpush.bf16.msrb.mxu0 %v3072_v23  ;;  %v3999_v23 = vld [vmem:[#allocation8 + $0x1b4] sm:$0xf] }
  0x86   :  { %1884 = vmatpush.bf16.msrb.mxu1 %v3264_v26  ;;  %v3144_v26 = vor.u32 %v3999_v23, %v3141_v24  ;;  %v3309_v23 = vld [vmem:[#allocation8 + $0x318] sm:$0xf0] }
  0x87   :  { %v3312_v25 = vor.u32 %v4041_v22, %v3309_v23  ;;  %v3171_v22 = vld [vmem:[#allocation8 + $0x1e8] sm:$0xf]  ;;  %v4009_v23 = vld [vmem:[#allocation8 + $0x1fc] sm:$0xf0] }
  0x88   :  { %1911 = vmatpush.bf16.msrb.mxu3 %v3672_v38  ;;  %v4039_v38 = vld [vmem:[#allocation8 + $0x2ec] sm:$0xf0] }
  0x89   :  { %1871 = vmatpush.bf16.msrb.mxu0 %v3048_v27  ;;  %v4077_v27 = vld [vmem:[#allocation8 + $0x424] sm:$0xf]  ;;  %v3292_v48 = vor.u32 %v4039_v38, %v3291_v37  ;;  %v3147_v37 = vld [vmem:[#allocation8 + $0x1b8] sm:$0xf]  ;;  %v4003_v38 = vld [vmem:[#allocation8 + $0x1cc] sm:$0xf0] }
  0x8a   :  { %1885 = vmatpush.bf16.msrb.mxu1 %v3240_v39  ;;  %v3456_v29 = vor.u32 %v4077_v27, %v3453_v28  ;;  %v4071_v39 = vld [vmem:[#allocation8 + $0x3f4] sm:$0xf]  ;;  %v3075_v28 = vld [vmem:[#allocation8 + $0x128] sm:$0xf] }
  0x8b   :  { %v3432_v41 = vor.u32 %v4071_v39, %v3429_v40 }
  0x8c   :  { %1898 = vmatpush.bf16.msrb.mxu2 %v3456_v29  ;;  %1912 = vmatpush.bf16.msrb.mxu3 %v3648_v44  ;;  %v3051_v44 = vld [vmem:[#allocation8 + $0xf8] sm:$0xf] }
  0x8d   :  { %1872 = vmatpush.bf16.msrb.mxu0 %v3024_v33  ;;  %v3993_v33 = vld [vmem:[#allocation8 + $0x184] sm:$0xf] }
  0x8e   :  { %1886 = vmatpush.bf16.msrb.mxu1 %v3216_v61  ;;  %v3120_v36 = vor.u32 %v3993_v33, %v3117_v34  ;;  %v3525_v33 = vld [vmem:[#allocation8 + $0x4c8] sm:$0xf0] }
  0x90   :  { %1899 = vmatpush.bf16.msrb.mxu2 %v3432_v41  ;;  %1913 = vmatpush.bf16.msrb.mxu3 %v3624_v50  ;;  %v3076_v41 = vor.u32 %v3985_v31, %v3075_v28  ;;  %v3267_v50 = vld [vmem:[#allocation8 + $0x2a8] sm:$0xf]  ;;  %v3988_v31 = vld [vmem:[#allocation8 + $0x15c] sm:$0xf] }
  0x91   :  { %1873 = vmatpush.bf16.msrb.mxu0 %v3000_v45  ;;  %v4472_v45 = vld [vmem:[#allocation7] sm:$0xf] }
  0x92   :  { %1887 = vmatpush.bf16.msrb.mxu1 %v3192_v63  ;;  %v195_v61 = vperm.slane %v4472_v45, 0  ;;  %v3357_v63 = vld [vmem:[#allocation8 + $0x378] sm:$0xf0]  ;;  %v196_v1 = vperm.slane %v4472_v45, 1  ;;  %v198_v15 = vperm.slane %v4472_v45, 3 }
  0x93   :  { %v3360_v0 = vor.u32 %v4053_v62, %v3357_v63  ;;  %v3244_v63 = vor.u32 %v4027_v58, %v3243_v56 }
  0x94   :  { %1900 = vmatpush.bf16.msrb.mxu2 %v3408_v47  ;;  %1914 = vmatpush.bf16.msrb.mxu3 %v3600_v60  ;;  %v3967_v60 = vld [vmem:[#allocation8 + $0xac] sm:$0xf0] }
  0x95   :  { %1874 = vmatpush.bf16.msrb.mxu0 %v2976_v55  ;;  %v3384_v55 = vor.u32 %v4059_v52, %v3381_v53  ;;  %v3027_v52 = vld [vmem:[#allocation8 + $0xc8] sm:$0xf]  ;;  %v3973_v53 = vld [vmem:[#allocation8 + $0xdc] sm:$0xf0] }
  0x96   :  { %1888 = vmatpush.bf16.msrb.mxu1 %v3168_v11 }
  0x98   :  { %1901 = vmatpush.bf16.msrb.mxu2 %v3384_v55  ;;  %1915 = vmatpush.bf16.msrb.mxu3 %v3576_v6  ;;  %v3028_v55 = vor.u32 %v3973_v53, %v3027_v52  ;;  %v3961_v6 = vld [vmem:[#allocation8 + $0x7c] sm:$0xf0]  ;;  %v3675_v53 = vld [vmem:[#allocation8 + $0x5d8] sm:$0xf] }
  0x99   :  { %1875 = vmatpush.bf16.msrb.mxu0 %v2952_v5  ;;  %v3997_v52 = vld [vmem:[#allocation8 + $0x19c] sm:$0xf0] }
  0x9a   :  { %1889 = vmatpush.bf16.msrb.mxu1 %v3144_v26 }
  0x9c   :  { %1902 = vmatpush.bf16.msrb.mxu2 %v3360_v0  ;;  %1916 = vmatpush.bf16.msrb.mxu3 %v3552_v21  ;;  %v197_v0 = vperm.slane %v4472_v45, 2  ;;  %v3101_v45 = vld [vmem:[#allocation8 + $0x170] sm:$0xf0] }
  0x9d   :  { %1876 = vmatpush.bf16.msrb.mxu0 %v2928_v19  ;;  %v3099_v19 = vld [vmem:[#allocation8 + $0x158] sm:$0xf] }
  0x9e   :  { %1890 = vmatpush.bf16.msrb.mxu1 %v3120_v36  ;;  %v3100_v27 = vor.u32 %v3991_v20, %v3099_v19  ;;  %v3528_v36 = vor.u32 %v4095_v32, %v3525_v33  ;;  %v3172_v33 = vor.u32 %v4009_v23, %v3171_v22  ;;  %v4123_v23 = vld [vmem:[#allocation8 + $0x58c] sm:$0xf0] }
  0xa0   :  { %1903 = vmatpush.bf16.msrb.mxu2 %v3336_v13  ;;  %1917 = vmatpush.bf16.msrb.mxu3 %v3528_v36  ;;  %v3955_v13 = vld [vmem:[#allocation8 + $0x4c] sm:$0xf0] }
  0xa4   :  { %1904 = vmatpush.bf16.msrb.mxu2 %v3312_v25  ;;  %1918 = vmatpush.bf16.msrb.mxu3 %v3504_v57  ;;  %v2931_v25 = vld [vmem:[#allocation8 + $0x8] sm:$0xf]  ;;  %v3077_v57 = vld [vmem:[#allocation8 + $0x140] sm:$0xf0] }
  0xbd   :  { %v532_v51 = vpop.f32.mrf.mxu0 }
  0xbe   :  { %v546_v54 = vpop.f32.mrf.mxu1  ;;  %v533_v59 = vadd.f32 %v532_v51, %v195_v61  ;;  %v4033_v51 = vld [vmem:[#allocation8 + $0x2bc] sm:$0xf0] }
  0xc0   :  { %v547_v4 = vadd.f32 %v546_v54, %v533_v59  ;;  %v3268_v54 = vor.u32 %v4033_v51, %v3267_v50  ;;  %v3003_v59 = vld [vmem:[#allocation8 + $0x98] sm:$0xf]  ;;  %v3123_v50 = vld [vmem:[#allocation8 + $0x188] sm:$0xf] }
  0xc1   :  { %v3004_v2 = vor.u32 %v3967_v60, %v3003_v59  ;;  %v4036_v59 = vld [vmem:[#allocation8 + $0x2dc] sm:$0xf]  ;;  %v3293_v60 = vld [vmem:[#allocation8 + $0x2f0] sm:$0xf0] }
  0xc2   :  { %v635_v17 = vmax.f32 %v547_v4, 0.0  ;;  %v4021_v4 = vld [vmem:[#allocation8 + $0x25c] sm:$0xf0] }
  0xc5   :  { %v560_v5 = vpop.f32.mrf.mxu2  ;;  %v534_v7 = vpop.f32.mrf.mxu0 }
  0xc6   :  { %v574_v8 = vpop.f32.mrf.mxu3  ;;  %v535_v11 = vadd.f32 %v534_v7, %v195_v61  ;;  %v548_v12 = vpop.f32.mrf.mxu1  ;;  %v561_v14 = vadd.f32 %v560_v5, %v196_v1  ;;  %v3052_v61 = vor.u32 %v3979_v46, %v3051_v44  ;;  %v2979_v5 = vld [vmem:[#allocation8 + $0x68] sm:$0xf]  ;;  %v3220_v7 = vor.u32 %v4021_v4, %v3219_v3  ;;  %v4081_v44 = vld [vmem:[#allocation8 + $0x43c] sm:$0xf0]  ;;  %v3982_v46 = vld [vmem:[#allocation8 + $0x12c] sm:$0xf] }
  0xc7   :  { %v2980_v9 = vor.u32 %v3961_v6, %v2979_v5  ;;  %v3080_v58 = vor.u32 %v3982_v46, %v3077_v57  ;;  %v3124_v4 = vor.u32 %v3997_v52, %v3123_v50  ;;  %v3296_v6 = vor.u32 %v4036_v59, %v3293_v60  ;;  %v3579_v46 = vld [vmem:[#allocation8 + $0x518] sm:$0xf]  ;;  %v2957_v52 = vld [vmem:[#allocation8 + $0x50] sm:$0xf0]  ;;  %v4105_v60 = vld [vmem:[#allocation8 + $0x4fc] sm:$0xf0] }
  0xc8   :  { %v549_v18 = vadd.f32 %v548_v12, %v535_v11  ;;  %v575_v26 = vadd.f32 %v574_v8, %v561_v14  ;;  %v4015_v11 = vld [vmem:[#allocation8 + $0x22c] sm:$0xf0]  ;;  %v2955_v12 = vld [vmem:[#allocation8 + $0x38] sm:$0xf] }
  0xc9   :  { %v2956_v21 = vor.u32 %v3955_v13, %v2955_v12  ;;  %v4030_v12 = vld [vmem:[#allocation8 + $0x2ac] sm:$0xf]  ;;  %v3269_v13 = vld [vmem:[#allocation8 + $0x2c0] sm:$0xf0] }
  0xca   :  { %v639_v24 = vmax.f32 %v549_v18, 0.0  ;;  %v636_v39 = vmax.f32 %v575_v26, 0.0  ;;  %v3196_v18 = vor.u32 %v4015_v11, %v3195_v10  ;;  %v3949_v26 = vld [vmem:[#allocation8 + $0x1c] sm:$0xf0] }
  0xcb   :  { %v2932_v36 = vor.u32 %v3949_v26, %v2931_v25  ;;  %v3245_v25 = vld [vmem:[#allocation8 + $0x290] sm:$0xf0]  ;;  %v3964_v26 = vld [vmem:[#allocation8 + $0x9c] sm:$0xf] }
  0xcc   :  { %v4476_v29 = vpack.c.bf16 %v639_v24, %v635_v17 }
  0xcd   :  { %v562_v30 = vpop.f32.mrf.mxu2 }
  0xce   :  { %v563_v34 = vadd.f32 %v562_v30, %v196_v1  ;;  %v576_v35 = vpop.f32.mrf.mxu3  ;;  %1821 = vmatmul.bf16.vlgmr.msra.gmra.mxu0 %v4476_v29  ;;  %v4087_v30 = vld [vmem:[#allocation8 + $0x46c] sm:$0xf0] }
  0xcf   :  { %1925 = vmatpush.bf16.msra.mxu0 %v3100_v27  ;;  %v3483_v27 = vld [vmem:[#allocation8 + $0x458] sm:$0xf] }
  0xd0   :  { %v577_v40 = vadd.f32 %v576_v35, %v563_v34 }
  0xd2   :  { %v640_v47 = vmax.f32 %v577_v40, 0.0  ;;  %v3104_v40 = vor.u32 %v3988_v31, %v3101_v45 }
  0xd3   :  { %1926 = vmatpush.bf16.msra.mxu0 %v3076_v41  ;;  %v3459_v41 = vld [vmem:[#allocation8 + $0x428] sm:$0xf] }
  0xd4   :  { %v4479_v49 = vpack.c.bf16 %v640_v47, %v636_v39  ;;  %v3484_v39 = vor.u32 %v4087_v30, %v3483_v27  ;;  %v3460_v56 = vor.u32 %v4081_v44, %v3459_v41  ;;  %v3005_v27 = vld [vmem:[#allocation8 + $0xb0] sm:$0xf0]  ;;  %v4063_v30 = vld [vmem:[#allocation8 + $0x3ac] sm:$0xf0]  ;;  %v4057_v41 = vld [vmem:[#allocation8 + $0x37c] sm:$0xf0] }
  0xd6   :  { %1835 = vmatmul.bf16.vlgmr.msra.gmra.mxu1 %v4479_v49 }
  0xd7   :  { %1939 = vmatpush.bf16.msra.mxu1 %v3292_v48  ;;  %1927 = vmatpush.bf16.msra.mxu0 %v3052_v61  ;;  %v3148_v61 = vor.u32 %v4003_v38, %v3147_v37  ;;  %v3958_v38 = vld [vmem:[#allocation8 + $0x6c] sm:$0xf] }
  0xdb   :  { %1940 = vmatpush.bf16.msra.mxu1 %v3268_v54  ;;  %1928 = vmatpush.bf16.msra.mxu0 %v3028_v55  ;;  %v4135_v54 = vld [vmem:[#allocation8 + $0x5ec] sm:$0xf0] }
  0xdc   :  { %v3676_v5 = vor.u32 %v4135_v54, %v3675_v53  ;;  %v3339_v53 = vld [vmem:[#allocation8 + $0x338] sm:$0xf]  ;;  %v4051_v54 = vld [vmem:[#allocation8 + $0x34c] sm:$0xf0] }
  0xdd   :  { %v588_v62 = vpop.f32.mrf.mxu0 }
  0xde   :  { %v602_v1 = vpop.f32.mrf.mxu1  ;;  %1877 = vmatmul.bf16.vlgmr.msrb.gmra.mxu0 %v4476_v29  ;;  %v589_v8 = vadd.f32 %v588_v62, %v197_v0  ;;  %v3435_v62 = vld [vmem:[#allocation8 + $0x3f8] sm:$0xf] }
  0xdf   :  { %1941 = vmatpush.bf16.msra.mxu1 %v3244_v63  ;;  %1929 = vmatpush.bf16.msra.mxu0 %v3004_v2  ;;  %v4075_v63 = vld [vmem:[#allocation8 + $0x40c] sm:$0xf0] }
  0xe0   :  { %v603_v19 = vadd.f32 %v602_v1, %v589_v8  ;;  %v3053_v1 = vld [vmem:[#allocation8 + $0x110] sm:$0xf0]  ;;  %v4129_v8 = vld [vmem:[#allocation8 + $0x5bc] sm:$0xf0]  ;;  %v3436_v10 = vor.u32 %v4075_v63, %v3435_v62  ;;  %v4006_v62 = vld [vmem:[#allocation8 + $0x1ec] sm:$0xf] }
  0xe1   :  { %v3173_v63 = vld [vmem:[#allocation8 + $0x200] sm:$0xf0] }
  0xe2   :  { %v637_v34 = vmax.f32 %v603_v19, 0.0  ;;  %v3272_v19 = vor.u32 %v4030_v12, %v3269_v13  ;;  %v3531_v12 = vld [vmem:[#allocation8 + $0x4b8] sm:$0xf] }
  0xe3   :  { %1942 = vmatpush.bf16.msra.mxu1 %v3220_v7  ;;  %1930 = vmatpush.bf16.msra.mxu0 %v2980_v9  ;;  %v3651_v7 = vld [vmem:[#allocation8 + $0x5a8] sm:$0xf] }
  0xe5   :  { %v616_v14 = vpop.f32.mrf.mxu2  ;;  %v590_v17 = vpop.f32.mrf.mxu0 }
  0xe6   :  { %v630_v16 = vpop.f32.mrf.mxu3  ;;  %v591_v20 = vadd.f32 %v590_v17, %v197_v0  ;;  %v604_v24 = vpop.f32.mrf.mxu1  ;;  %1891 = vmatmul.bf16.vlgmr.msrb.gmra.mxu1 %v4479_v49  ;;  %v617_v32 = vadd.f32 %v616_v14, %v198_v15  ;;  %v3976_v0 = vld [vmem:[#allocation8 + $0xfc] sm:$0xf]  ;;  %v3411_v14 = vld [vmem:[#allocation8 + $0x3c8] sm:$0xf]  ;;  %v3029_v17 = vld [vmem:[#allocation8 + $0xe0] sm:$0xf0] }
  0xe7   :  { %1943 = vmatpush.bf16.msra.mxu1 %v3196_v18  ;;  %1931 = vmatpush.bf16.msra.mxu0 %v2956_v21  ;;  %v3056_v11 = vor.u32 %v3976_v0, %v3053_v1  ;;  %v3652_v18 = vor.u32 %v4129_v8, %v3651_v7  ;;  %v3340_v0 = vor.u32 %v4051_v54, %v3339_v53  ;;  %v3315_v1 = vld [vmem:[#allocation8 + $0x308] sm:$0xf]  ;;  %v4066_v53 = vld [vmem:[#allocation8 + $0x3cc] sm:$0xf]  ;;  %v3413_v54 = vld [vmem:[#allocation8 + $0x3e0] sm:$0xf0] }
  0xe8   :  { %v605_v28 = vadd.f32 %v604_v24, %v591_v20  ;;  %v631_v47 = vadd.f32 %v630_v16, %v617_v32  ;;  %v3970_v16 = vld [vmem:[#allocation8 + $0xcc] sm:$0xf]  ;;  %v3627_v20 = vld [vmem:[#allocation8 + $0x578] sm:$0xf]  ;;  %v4024_v24 = vld [vmem:[#allocation8 + $0x27c] sm:$0xf]  ;;  %v3176_v8 = vor.u32 %v4006_v62, %v3173_v63 }
  0xe9   :  { %v3032_v22 = vor.u32 %v3970_v16, %v3029_v17  ;;  %v3628_v31 = vor.u32 %v4123_v23, %v3627_v20  ;;  %v3248_v45 = vor.u32 %v4024_v24, %v3245_v25  ;;  %v3603_v32 = vld [vmem:[#allocation8 + $0x548] sm:$0xf]  ;;  %v3149_v16 = vld [vmem:[#allocation8 + $0x1d0] sm:$0xf0]  ;;  %v4078_v20 = vld [vmem:[#allocation8 + $0x42c] sm:$0xf] }
  0xea   :  { %v641_v35 = vmax.f32 %v605_v28, 0.0  ;;  %v638_v2 = vmax.f32 %v631_v47, 0.0  ;;  %v3387_v28 = vld [vmem:[#allocation8 + $0x398] sm:$0xf]  ;;  %v4111_v47 = vld [vmem:[#allocation8 + $0x52c] sm:$0xf0] }
  0xeb   :  { %1944 = vmatpush.bf16.msra.mxu1 %v3172_v33  ;;  %1932 = vmatpush.bf16.msra.mxu0 %v2932_v36  ;;  %v3008_v33 = vor.u32 %v3964_v26, %v3005_v27  ;;  %v3221_v36 = vld [vmem:[#allocation8 + $0x260] sm:$0xf0]  ;;  %v3388_v37 = vor.u32 %v4063_v30, %v3387_v28  ;;  %v3507_v26 = vld [vmem:[#allocation8 + $0x488] sm:$0xf]  ;;  %v4093_v27 = vld [vmem:[#allocation8 + $0x49c] sm:$0xf0] }
  0xec   :  { %v4486_v42 = vpack.c.bf16 %v641_v35, %v637_v34  ;;  %v4117_v34 = vld [vmem:[#allocation8 + $0x55c] sm:$0xf0]  ;;  %v4018_v35 = vld [vmem:[#allocation8 + $0x24c] sm:$0xf]  ;;  %v3461_v25 = vld [vmem:[#allocation8 + $0x440] sm:$0xf0] }
  0xed   :  { %v618_v43 = vpop.f32.mrf.mxu2  ;;  %v3224_v44 = vor.u32 %v4018_v35, %v3221_v36  ;;  %v3994_v28 = vld [vmem:[#allocation8 + $0x18c] sm:$0xf]  ;;  %v3125_v30 = vld [vmem:[#allocation8 + $0x1a0] sm:$0xf0]  ;;  %v3464_v35 = vor.u32 %v4078_v20, %v3461_v25  ;;  %v3059_v36 = vld [vmem:[#allocation8 + $0x100] sm:$0xf] }
  0xee   :  { %v619_v48 = vadd.f32 %v618_v43, %v198_v15  ;;  %v632_v51 = vpop.f32.mrf.mxu3  ;;  %1849 = vmatmul.bf16.vlgmr.msra.gmra.mxu2 %v4486_v42  ;;  %1933 = vmatmul.bf16.vlgmr.msra.gmra.mxu0 %v4476_v29  ;;  %v4069_v15 = vld [vmem:[#allocation8 + $0x3dc] sm:$0xf0]  ;;  %v3604_v43 = vor.u32 %v4117_v34, %v3603_v32  ;;  %v3677_v32 = vld [vmem:[#allocation8 + $0x5f0] sm:$0xf0]  ;;  %v4040_v34 = vld [vmem:[#allocation8 + $0x2f4] sm:$0xf0] }
  0xef   :  { %1953 = vmatpush.bf16.msra.mxu2 %v3484_v39  ;;  %1981 = vmatpush.bf16.msrb.mxu0 %v3104_v40  ;;  %v3412_v21 = vor.u32 %v4069_v15, %v3411_v14  ;;  %v2981_v39 = vld [vmem:[#allocation8 + $0x80] sm:$0xf0]  ;;  %v3363_v40 = vld [vmem:[#allocation8 + $0x368] sm:$0xf]  ;;  %v4099_v14 = vld [vmem:[#allocation8 + $0x4cc] sm:$0xf0] }
  0xf0   :  { %v633_v55 = vadd.f32 %v632_v51, %v619_v48  ;;  %1945 = vmatpush.bf16.msra.mxu1 %v3148_v61  ;;  %v2984_v57 = vor.u32 %v3958_v38, %v2981_v39  ;;  %v4012_v48 = vld [vmem:[#allocation8 + $0x21c] sm:$0xf]  ;;  %v3197_v61 = vld [vmem:[#allocation8 + $0x230] sm:$0xf0]  ;;  %v3364_v50 = vor.u32 %v4057_v41, %v3363_v40  ;;  %v3532_v23 = vor.u32 %v4099_v14, %v3531_v12  ;;  %v3251_v62 = vld [vmem:[#allocation8 + $0x280] sm:$0xf] }
  0xf1   :  { %v3952_v51 = vld [vmem:[#allocation8 + $0x3c] sm:$0xf]  ;;  %v3508_v38 = vor.u32 %v4093_v27, %v3507_v26  ;;  %v3128_v39 = vor.u32 %v3994_v28, %v3125_v30  ;;  %v3437_v41 = vld [vmem:[#allocation8 + $0x410] sm:$0xf0]  ;;  %v4028_v63 = vld [vmem:[#allocation8 + $0x294] sm:$0xf0] }
  0xf2   :  { %v642_v3 = vmax.f32 %v633_v55, 0.0  ;;  %v3580_v55 = vor.u32 %v4111_v47, %v3579_v46  ;;  %v2960_v59 = vor.u32 %v3952_v51, %v2957_v52  ;;  %v4000_v15 = vld [vmem:[#allocation8 + $0x1bc] sm:$0xf]  ;;  %v4126_v46 = vld [vmem:[#allocation8 + $0x5ac] sm:$0xf] }
  0xf3   :  { %1954 = vmatpush.bf16.msra.mxu2 %v3460_v56  ;;  %1982 = vmatpush.bf16.msrb.mxu0 %v3080_v58  ;;  %v3200_v56 = vor.u32 %v4012_v48, %v3197_v61  ;;  %v3555_v58 = vld [vmem:[#allocation8 + $0x4e8] sm:$0xf]  ;;  %v3152_v24 = vor.u32 %v4000_v15, %v3149_v16  ;;  %v4072_v40 = vld [vmem:[#allocation8 + $0x3fc] sm:$0xf]  ;;  %v3653_v47 = vld [vmem:[#allocation8 + $0x5c0] sm:$0xf0] }
  0xf4   :  { %v4490_v9 = vpack.c.bf16 %v642_v3, %v638_v2  ;;  %1946 = vmatpush.bf16.msra.mxu1 %v3124_v4  ;;  %v3946_v2 = vld [vmem:[#allocation8 + $0xc] sm:$0xf]  ;;  %v2933_v3 = vld [vmem:[#allocation8 + $0x20] sm:$0xf0]  ;;  %v4045_v4 = vld [vmem:[#allocation8 + $0x31c] sm:$0xf0]  ;;  %v3556_v7 = vor.u32 %v4105_v60, %v3555_v58 }
  0xf5   :  { %v2936_v13 = vor.u32 %v3946_v2, %v2933_v3  ;;  %v3316_v17 = vor.u32 %v4045_v4, %v3315_v1  ;;  %v3275_v48 = vld [vmem:[#allocation8 + $0x2b0] sm:$0xf]  ;;  %v4034_v61 = vld [vmem:[#allocation8 + $0x2c4] sm:$0xf0]  ;;  %v4120_v58 = vld [vmem:[#allocation8 + $0x57c] sm:$0xf] }
  0xf6   :  { %1863 = vmatmul.bf16.vlgmr.msra.gmra.mxu3 %v4490_v9  ;;  %v3035_v51 = vld [vmem:[#allocation8 + $0xd0] sm:$0xf]  ;;  %v3974_v52 = vld [vmem:[#allocation8 + $0xe4] sm:$0xf0]  ;;  %v3629_v60 = vld [vmem:[#allocation8 + $0x590] sm:$0xf0] }
  0xf7   :  { %1967 = vmatpush.bf16.msra.mxu3 %v3676_v5  ;;  %1955 = vmatpush.bf16.msra.mxu2 %v3436_v10  ;;  %v3107_v5 = vld [vmem:[#allocation8 + $0x160] sm:$0xf]  ;;  %v4084_v10 = vld [vmem:[#allocation8 + $0x45c] sm:$0xf]  ;;  %v3968_v2 = vld [vmem:[#allocation8 + $0xb4] sm:$0xf0] }
  0xf8   :  { %1995 = vmatpush.bf16.msrb.mxu1 %v3296_v6  ;;  %1983 = vmatpush.bf16.msrb.mxu0 %v3056_v11  ;;  %v3992_v6 = vld [vmem:[#allocation8 + $0x174] sm:$0xf0]  ;;  %v3485_v11 = vld [vmem:[#allocation8 + $0x470] sm:$0xf0]  ;;  %v3011_v1 = vld [vmem:[#allocation8 + $0xa0] sm:$0xf] }
  0xf9   :  { %1947 = vmatmul.bf16.vlgmr.msra.gmra.mxu1 %v4479_v49  ;;  %v4060_v3 = vld [vmem:[#allocation8 + $0x39c] sm:$0xf]  ;;  %v3389_v4 = vld [vmem:[#allocation8 + $0x3b0] sm:$0xf0]  ;;  %v4022_v12 = vld [vmem:[#allocation8 + $0x264] sm:$0xf0] }
  0xfa   :  { %v2987_v14 = vld [vmem:[#allocation8 + $0x70] sm:$0xf]  ;;  %v3962_v15 = vld [vmem:[#allocation8 + $0x84] sm:$0xf0]  ;;  %v4054_v16 = vld [vmem:[#allocation8 + $0x36c] sm:$0xf] }
  0xfb   :  { %1968 = vmatpush.bf16.msra.mxu3 %v3652_v18  ;;  %1956 = vmatpush.bf16.msra.mxu2 %v3412_v21  ;;  %v3108_v18 = vor.u32 %v3992_v6, %v3107_v5  ;;  %v3083_v21 = vld [vmem:[#allocation8 + $0x130] sm:$0xf]  ;;  %v3632_v5 = vor.u32 %v4120_v58, %v3629_v60  ;;  %v3252_v6 = vor.u32 %v4028_v63, %v3251_v62  ;;  %v4108_v20 = vld [vmem:[#allocation8 + $0x51c] sm:$0xf]  ;;  %v2963_v26 = vld [vmem:[#allocation8 + $0x40] sm:$0xf] }
  0xfc   :  { %1996 = vmatpush.bf16.msrb.mxu1 %v3272_v19  ;;  %1984 = vmatpush.bf16.msrb.mxu0 %v3032_v22  ;;  %v3488_v19 = vor.u32 %v4084_v10, %v3485_v11  ;;  %v3986_v22 = vld [vmem:[#allocation8 + $0x144] sm:$0xf0]  ;;  %v3605_v10 = vld [vmem:[#allocation8 + $0x560] sm:$0xf0]  ;;  %v3227_v11 = vld [vmem:[#allocation8 + $0x250] sm:$0xf] }
  0xfd   :  { %v3956_v27 = vld [vmem:[#allocation8 + $0x54] sm:$0xf0]  ;;  %v4048_v28 = vld [vmem:[#allocation8 + $0x33c] sm:$0xf]  ;;  %v3341_v30 = vld [vmem:[#allocation8 + $0x350] sm:$0xf0] }
  0xfe   :  { %1905 = vmatmul.bf16.vlgmr.msrb.gmra.mxu2 %v4486_v42  ;;  %v3467_v58 = vld [vmem:[#allocation8 + $0x430] sm:$0xf]  ;;  %v3085_v60 = vld [vmem:[#allocation8 + $0x148] sm:$0xf0] }
  0xff   :  { %1969 = vmatpush.bf16.msra.mxu3 %v3628_v31  ;;  %1957 = vmatpush.bf16.msra.mxu2 %v3388_v37  ;;  %v4132_v31 = vld [vmem:[#allocation8 + $0x5dc] sm:$0xf]  ;;  %v3980_v37 = vld [vmem:[#allocation8 + $0x114] sm:$0xf0] }
 0x100   :  { %1997 = vmatpush.bf16.msrb.mxu1 %v3248_v45  ;;  %1985 = vmatpush.bf16.msrb.mxu0 %v3008_v33  ;;  %v3084_v45 = vor.u32 %v3986_v22, %v3083_v21  ;;  %v3299_v33 = vld [vmem:[#allocation8 + $0x2e0] sm:$0xf]  ;;  %v2988_v21 = vor.u32 %v3962_v15, %v2987_v14  ;;  %v3581_v22 = vld [vmem:[#allocation8 + $0x530] sm:$0xf0] }
 0x103   :  { %1970 = vmatpush.bf16.msra.mxu3 %v3604_v43  ;;  %1958 = vmatpush.bf16.msra.mxu2 %v3364_v50  ;;  %v3680_v43 = vor.u32 %v4132_v31, %v3677_v32  ;;  %v3440_v50 = vor.u32 %v4072_v40, %v3437_v41  ;;  %v3584_v31 = vor.u32 %v4108_v20, %v3581_v22  ;;  %v4102_v32 = vld [vmem:[#allocation8 + $0x4ec] sm:$0xf]  ;;  %v3950_v40 = vld [vmem:[#allocation8 + $0x24] sm:$0xf0]  ;;  %v3317_v41 = vld [vmem:[#allocation8 + $0x320] sm:$0xf0] }
 0x104   :  { %1998 = vmatpush.bf16.msrb.mxu1 %v3224_v44  ;;  %1986 = vmatpush.bf16.msrb.mxu0 %v2984_v57  ;;  %v3300_v44 = vor.u32 %v4040_v34, %v3299_v33  ;;  %v3060_v57 = vor.u32 %v3980_v37, %v3059_v36  ;;  %v2964_v33 = vor.u32 %v3956_v27, %v2963_v26  ;;  %v3557_v34 = vld [vmem:[#allocation8 + $0x500] sm:$0xf0]  ;;  %v4010_v36 = vld [vmem:[#allocation8 + $0x204] sm:$0xf0]  ;;  %v3659_v20 = vld [vmem:[#allocation8 + $0x5b0] sm:$0xf] }
 0x105   :  { %v3344_v37 = vor.u32 %v4048_v28, %v3341_v30  ;;  %v4130_v22 = vld [vmem:[#allocation8 + $0x5c4] sm:$0xf0]  ;;  %v3037_v26 = vld [vmem:[#allocation8 + $0xe8] sm:$0xf0] }
 0x106   :  { %1919 = vmatmul.bf16.vlgmr.msrb.gmra.mxu3 %v4490_v9  ;;  %v3660_v28 = vor.u32 %v4130_v22, %v3659_v20  ;;  %v4085_v20 = vld [vmem:[#allocation8 + $0x464] sm:$0xf]  ;;  %v3493_v22 = vld [vmem:[#allocation8 + $0x478] sm:$0xf0] }
 0x107   :  { %1971 = vmatpush.bf16.msra.mxu3 %v3580_v55  ;;  %1959 = vmatpush.bf16.msra.mxu2 %v3340_v0  ;;  %v3656_v55 = vor.u32 %v4126_v46, %v3653_v47  ;;  %v3416_v0 = vor.u32 %v4066_v53, %v3413_v54  ;;  %v3560_v46 = vor.u32 %v4102_v32, %v3557_v34  ;;  %v3491_v47 = vld [vmem:[#allocation8 + $0x460] sm:$0xf]  ;;  %v4004_v53 = vld [vmem:[#allocation8 + $0x1d4] sm:$0xf0] }
 0x108   :  { %1999 = vmatpush.bf16.msrb.mxu1 %v3200_v56  ;;  %1987 = vmatpush.bf16.msrb.mxu0 %v2960_v59  ;;  %v3276_v56 = vor.u32 %v4034_v61, %v3275_v48  ;;  %v3036_v59 = vor.u32 %v3974_v52, %v3035_v51  ;;  %v4088_v48 = vld [vmem:[#allocation8 + $0x474] sm:$0xf0]  ;;  %v4096_v61 = vld [vmem:[#allocation8 + $0x4bc] sm:$0xf]  ;;  %v3533_v51 = vld [vmem:[#allocation8 + $0x4d0] sm:$0xf0] }
 0x109   :  { %v3155_v52 = vld [vmem:[#allocation8 + $0x1c0] sm:$0xf]  ;;  %v3536_v62 = vor.u32 %v4096_v61, %v3533_v51  ;;  %v4124_v34 = vld [vmem:[#allocation8 + $0x594] sm:$0xf0]  ;;  %v3229_v61 = vld [vmem:[#allocation8 + $0x268] sm:$0xf0] }
 0x10a   :  { %v3156_v63 = vor.u32 %v4004_v53, %v3155_v52  ;;  %v3635_v32 = vld [vmem:[#allocation8 + $0x580] sm:$0xf]  ;;  %v2989_v51 = vld [vmem:[#allocation8 + $0x88] sm:$0xf0] }
 0x10b   :  { %1972 = vmatpush.bf16.msra.mxu3 %v3556_v7  ;;  %1960 = vmatpush.bf16.msra.mxu2 %v3316_v17  ;;  %v4114_v7 = vld [vmem:[#allocation8 + $0x54c] sm:$0xf]  ;;  %v3365_v17 = vld [vmem:[#allocation8 + $0x380] sm:$0xf0] }
 0x10c   :  { %2000 = vmatpush.bf16.msrb.mxu1 %v3176_v8  ;;  %1988 = vmatpush.bf16.msrb.mxu0 %v2936_v13  ;;  %v3012_v8 = vor.u32 %v3968_v2, %v3011_v1  ;;  %v3392_v13 = vor.u32 %v4060_v3, %v3389_v4  ;;  %v3368_v25 = vor.u32 %v4054_v16, %v3365_v17  ;;  %v4090_v1 = vld [vmem:[#allocation8 + $0x48c] sm:$0xf]  ;;  %v3509_v2 = vld [vmem:[#allocation8 + $0x4a0] sm:$0xf0]  ;;  %v3131_v3 = vld [vmem:[#allocation8 + $0x190] sm:$0xf] }
 0x10d   :  { %v3998_v4 = vld [vmem:[#allocation8 + $0x1a4] sm:$0xf0]  ;;  %v3512_v14 = vor.u32 %v4090_v1, %v3509_v2  ;;  %v2965_v1 = vld [vmem:[#allocation8 + $0x58] sm:$0xf0] }
 0x10e   :  { %1961 = vmatmul.bf16.vlgmr.msra.gmra.mxu2 %v4486_v42  ;;  %v3132_v15 = vor.u32 %v3998_v4, %v3131_v3 }
 0x10f   :  { %2009 = vmatpush.bf16.msrb.mxu2 %v3488_v19  ;;  %1973 = vmatpush.bf16.msra.mxu3 %v3532_v23  ;;  %v3228_v19 = vor.u32 %v4022_v12, %v3227_v11  ;;  %v3203_v23 = vld [vmem:[#allocation8 + $0x220] sm:$0xf]  ;;  %v3977_v12 = vld [vmem:[#allocation8 + $0x104] sm:$0xf] }
 0x110   :  { %2037 = vmatpush.bf16.msra.mxu0 %v3108_v18  ;;  %2001 = vmatpush.bf16.msrb.mxu1 %v3152_v24  ;;  %v3608_v18 = vor.u32 %v4114_v7, %v3605_v10  ;;  %v4016_v24 = vld [vmem:[#allocation8 + $0x234] sm:$0xf0]  ;;  %v3301_v10 = vld [vmem:[#allocation8 + $0x2f8] sm:$0xf0] }
 0x111   :  { %1989 = vmatmul.bf16.vlgmr.msrb.gmra.mxu0 %v4476_v29  ;;  %v4136_v7 = vld [vmem:[#allocation8 + $0x5f4] sm:$0xf0] }
 0x113   :  { %2010 = vmatpush.bf16.msrb.mxu2 %v3464_v35  ;;  %1974 = vmatpush.bf16.msra.mxu3 %v3508_v38  ;;  %v3179_v35 = vld [vmem:[#allocation8 + $0x1f0] sm:$0xf]  ;;  %v4042_v38 = vld [vmem:[#allocation8 + $0x30c] sm:$0xf] }
 0x114   :  { %2038 = vmatpush.bf16.msra.mxu0 %v3084_v45  ;;  %2002 = vmatpush.bf16.msrb.mxu1 %v3128_v39  ;;  %v3204_v45 = vor.u32 %v4016_v24, %v3203_v23  ;;  %v2939_v39 = vld [vmem:[#allocation8 + $0x10] sm:$0xf]  ;;  %v3320_v54 = vor.u32 %v4042_v38, %v3317_v41  ;;  %v4031_v23 = vld [vmem:[#allocation8 + $0x2b4] sm:$0xf]  ;;  %v3277_v24 = vld [vmem:[#allocation8 + $0x2c8] sm:$0xf0] }
 0x115   :  { %v3280_v30 = vor.u32 %v4031_v23, %v3277_v24  ;;  %v3013_v38 = vld [vmem:[#allocation8 + $0xb8] sm:$0xf0]  ;;  %v3539_v23 = vld [vmem:[#allocation8 + $0x4c0] sm:$0xf]  ;;  %v4100_v24 = vld [vmem:[#allocation8 + $0x4d4] sm:$0xf0] }
 0x116   :  { %1975 = vmatmul.bf16.vlgmr.msra.gmra.mxu3 %v4490_v9 }
 0x117   :  { %2023 = vmatpush.bf16.msrb.mxu3 %v3680_v43  ;;  %2003 = vmatmul.bf16.vlgmr.msrb.gmra.mxu1 %v4479_v49  ;;  %v3989_v43 = vld [vmem:[#allocation8 + $0x164] sm:$0xf] }
 0x118   :  { %2051 = vmatpush.bf16.msra.mxu1 %v3300_v44  ;;  %2039 = vmatpush.bf16.msra.mxu0 %v3060_v57  ;;  %v3109_v44 = vld [vmem:[#allocation8 + $0x178] sm:$0xf0]  ;;  %v3180_v57 = vor.u32 %v4010_v36, %v3179_v35  ;;  %v4025_v35 = vld [vmem:[#allocation8 + $0x284] sm:$0xf] }
 0x119   :  { %2011 = vmatpush.bf16.msrb.mxu2 %v3440_v50  ;;  %v2940_v50 = vor.u32 %v3950_v40, %v2939_v39  ;;  %v3253_v36 = vld [vmem:[#allocation8 + $0x298] sm:$0xf0]  ;;  %v3636_v40 = vor.u32 %v4124_v34, %v3635_v32  ;;  %v4094_v34 = vld [vmem:[#allocation8 + $0x4a4] sm:$0xf0] }
 0x11a   :  { %v3256_v41 = vor.u32 %v4025_v35, %v3253_v36  ;;  %v3995_v35 = vld [vmem:[#allocation8 + $0x194] sm:$0xf]  ;;  %v3133_v36 = vld [vmem:[#allocation8 + $0x1a8] sm:$0xf0] }
 0x11b   :  { %2024 = vmatpush.bf16.msrb.mxu3 %v3656_v55  ;;  %v3112_v55 = vor.u32 %v3989_v43, %v3109_v44  ;;  %v3395_v43 = vld [vmem:[#allocation8 + $0x3a0] sm:$0xf]  ;;  %v4064_v44 = vld [vmem:[#allocation8 + $0x3b4] sm:$0xf0] }
 0x11c   :  { %2052 = vmatpush.bf16.msra.mxu1 %v3276_v56  ;;  %2040 = vmatpush.bf16.msra.mxu0 %v3036_v59  ;;  %v3492_v56 = vor.u32 %v4088_v48, %v3491_v47  ;;  %v3983_v59 = vld [vmem:[#allocation8 + $0x134] sm:$0xf]  ;;  %v4118_v47 = vld [vmem:[#allocation8 + $0x564] sm:$0xf0]  ;;  %v3396_v52 = vor.u32 %v4064_v44, %v3395_v43  ;;  %v3136_v43 = vor.u32 %v3995_v35, %v3133_v36 }
 0x11d   :  { %2012 = vmatpush.bf16.msrb.mxu2 %v3416_v0  ;;  %v4082_v0 = vld [vmem:[#allocation8 + $0x444] sm:$0xf0]  ;;  %v4019_v48 = vld [vmem:[#allocation8 + $0x254] sm:$0xf] }
 0x11e   :  { %v3468_v11 = vor.u32 %v4082_v0, %v3467_v58  ;;  %v3587_v58 = vld [vmem:[#allocation8 + $0x520] sm:$0xf]  ;;  %v3953_v0 = vld [vmem:[#allocation8 + $0x44] sm:$0xf]  ;;  %v4147_v36 = vld [vmem:[#allocation11 + $0x50] sm:$0xff] }
 0x11f   :  { %2025 = vmatpush.bf16.msrb.mxu3 %v3632_v5  ;;  %v3683_v5 = vld [vmem:[#allocation8 + $0x5e0] sm:$0xf] }
 0x120   :  { %2053 = vmatpush.bf16.msra.mxu1 %v3252_v6  ;;  %2041 = vmatpush.bf16.msra.mxu0 %v3012_v8  ;;  %v3088_v6 = vor.u32 %v3983_v59, %v3085_v60  ;;  %v4037_v8 = vld [vmem:[#allocation8 + $0x2e4] sm:$0xf]  ;;  %v3684_v16 = vor.u32 %v4136_v7, %v3683_v5  ;;  %v4112_v60 = vld [vmem:[#allocation8 + $0x534] sm:$0xf0]  ;;  %v3347_v5 = vld [vmem:[#allocation8 + $0x340] sm:$0xf] }
 0x121   :  { %2013 = vmatpush.bf16.msrb.mxu2 %v3392_v13  ;;  %v3061_v13 = vld [vmem:[#allocation8 + $0x118] sm:$0xf0]  ;;  %v3304_v17 = vor.u32 %v4037_v8, %v3301_v10  ;;  %v3588_v3 = vor.u32 %v4112_v60, %v3587_v58  ;;  %v3563_v7 = vld [vmem:[#allocation8 + $0x4f0] sm:$0xf]  ;;  %v2968_v8 = vor.u32 %v3953_v0, %v2965_v1  ;;  %v4106_v10 = vld [vmem:[#allocation8 + $0x504] sm:$0xf0] }
 0x122   :  { %v3397_v60 = vld [vmem:[#allocation8 + $0x3b8] sm:$0xf0]  ;;  %v4141_v0 = vld [vmem:[#allocation11 + $0x20] sm:$0xff] }
 0x123   :  { %2026 = vmatpush.bf16.msrb.mxu3 %v3608_v18  ;;  %v3443_v18 = vld [vmem:[#allocation8 + $0x400] sm:$0xf] }
 0x124   :  { %2054 = vmatpush.bf16.msra.mxu1 %v3228_v19  ;;  %2042 = vmatpush.bf16.msra.mxu0 %v2988_v21  ;;  %v4076_v19 = vld [vmem:[#allocation8 + $0x414] sm:$0xf0]  ;;  %v3064_v21 = vor.u32 %v3977_v12, %v3061_v13  ;;  %v3181_v12 = vld [vmem:[#allocation8 + $0x208] sm:$0xf0]  ;;  %v3947_v13 = vld [vmem:[#allocation8 + $0x14] sm:$0xf] }
 0x125   :  { %2014 = vmatpush.bf16.msrb.mxu2 %v3368_v25  ;;  %v3971_v25 = vld [vmem:[#allocation8 + $0xd4] sm:$0xf]  ;;  %v3444_v27 = vor.u32 %v4076_v19, %v3443_v18  ;;  %v3323_v18 = vld [vmem:[#allocation8 + $0x310] sm:$0xf]  ;;  %v4046_v19 = vld [vmem:[#allocation8 + $0x324] sm:$0xf0] }
 0x127   :  { %2027 = vmatpush.bf16.msrb.mxu3 %v3584_v31  ;;  %v3419_v31 = vld [vmem:[#allocation8 + $0x3d0] sm:$0xf] }
 0x128   :  { %2055 = vmatpush.bf16.msra.mxu1 %v3204_v45  ;;  %2043 = vmatpush.bf16.msra.mxu0 %v2964_v33  ;;  %v4070_v45 = vld [vmem:[#allocation8 + $0x3e4] sm:$0xf0]  ;;  %v3040_v33 = vor.u32 %v3971_v25, %v3037_v26  ;;  %v4001_v25 = vld [vmem:[#allocation8 + $0x1c4] sm:$0xf]  ;;  %v3157_v26 = vld [vmem:[#allocation8 + $0x1d8] sm:$0xf0] }
 0x129   :  { %2015 = vmatpush.bf16.msrb.mxu2 %v3344_v37  ;;  %v3965_v37 = vld [vmem:[#allocation8 + $0xa4] sm:$0xf]  ;;  %v3420_v39 = vor.u32 %v4070_v45, %v3419_v31  ;;  %v4079_v31 = vld [vmem:[#allocation8 + $0x434] sm:$0xf]  ;;  %v3469_v45 = vld [vmem:[#allocation8 + $0x448] sm:$0xf0]  ;;  %v3160_v32 = vor.u32 %v4001_v25, %v3157_v26 }
 0x12a   :  { %v4150_v25 = vld [vmem:[#allocation11 + $0x68] sm:$0xff] }
 0x12b   :  { %2028 = vmatpush.bf16.msrb.mxu3 %v3560_v46  ;;  %v3611_v46 = vld [vmem:[#allocation8 + $0x550] sm:$0xf] }
 0x12c   :  { %2056 = vmatpush.bf16.msra.mxu1 %v3180_v57  ;;  %2044 = vmatpush.bf16.msra.mxu0 %v2940_v50  ;;  %v3016_v57 = vor.u32 %v3965_v37, %v3013_v38  ;;  %v3959_v50 = vld [vmem:[#allocation8 + $0x74] sm:$0xf]  ;;  %v3612_v53 = vor.u32 %v4118_v47, %v3611_v46  ;;  %v4133_v37 = vld [vmem:[#allocation8 + $0x5e4] sm:$0xf]  ;;  %v3685_v38 = vld [vmem:[#allocation8 + $0x5f8] sm:$0xf0] }
 0x12d   :  { %2016 = vmatpush.bf16.msrb.mxu2 %v3320_v54  ;;  %v3232_v54 = vor.u32 %v4019_v48, %v3229_v61  ;;  %v2992_v59 = vor.u32 %v3959_v50, %v2989_v51  ;;  %v3688_v44 = vor.u32 %v4133_v37, %v3685_v38  ;;  %v4073_v46 = vld [vmem:[#allocation8 + $0x404] sm:$0xf]  ;;  %v4127_v47 = vld [vmem:[#allocation8 + $0x5b4] sm:$0xf]  ;;  %v3661_v48 = vld [vmem:[#allocation8 + $0x5c8] sm:$0xf0] }
 0x12e   :  { %v4143_v50 = vld [vmem:[#allocation11 + $0x30] sm:$0xff]  ;;  %v3664_v51 = vor.u32 %v4127_v47, %v3661_v48  ;;  %v4510_v38 = vld [vmem:[#allocation10] sm:$0x3f] }
 0x12f   :  { %2029 = vmatpush.bf16.msrb.mxu3 %v3536_v62  ;;  %2045 = vmatmul.bf16.vlgmr.msra.gmra.mxu0 %v4476_v29  ;;  %v4013_v62 = vld [vmem:[#allocation8 + $0x224] sm:$0xf]  ;;  %v4159_v37 = vld [vmem:[#allocation11 + $0xb0] sm:$0xff] }
 0x130   :  { %2093 = vmatpush.bf16.msrb.mxu0 %v3112_v55  ;;  %2057 = vmatpush.bf16.msra.mxu1 %v3156_v63  ;;  %v3371_v55 = vld [vmem:[#allocation8 + $0x370] sm:$0xf]  ;;  %v3205_v63 = vld [vmem:[#allocation8 + $0x238] sm:$0xf0] }
 0x131   :  { %2065 = vmatpush.bf16.msra.mxu2 %v3492_v56  ;;  %v4058_v56 = vld [vmem:[#allocation8 + $0x384] sm:$0xf0]  ;;  %v3208_v4 = vor.u32 %v4013_v62, %v3205_v63  ;;  %v4115_v62 = vld [vmem:[#allocation8 + $0x554] sm:$0xf]  ;;  %v3613_v63 = vld [vmem:[#allocation8 + $0x568] sm:$0xf0] }
 0x132   :  { %2017 = vmatmul.bf16.vlgmr.msrb.gmra.mxu2 %v4486_v42  ;;  %v3372_v2 = vor.u32 %v4058_v56, %v3371_v55  ;;  %v4142_v55 = vld [vmem:[#allocation11 + $0x28] sm:$0xff]  ;;  %v4156_v48 = vld [vmem:[#allocation11 + $0x98] sm:$0xff] }
 0x133   :  { %2030 = vmatpush.bf16.msrb.mxu3 %v3512_v14  ;;  %v2941_v14 = vld [vmem:[#allocation8 + $0x28] sm:$0xf0] }
 0x134   :  { %2094 = vmatpush.bf16.msrb.mxu0 %v3088_v6  ;;  %2058 = vmatpush.bf16.msra.mxu1 %v3132_v15  ;;  %v4052_v6 = vld [vmem:[#allocation8 + $0x354] sm:$0xf0] }
 0x135   :  { %2066 = vmatpush.bf16.msra.mxu2 %v3468_v11  ;;  %v4007_v11 = vld [vmem:[#allocation8 + $0x1f4] sm:$0xf]  ;;  %v3348_v15 = vor.u32 %v4052_v6, %v3347_v5  ;;  %v4109_v5 = vld [vmem:[#allocation8 + $0x524] sm:$0xf]  ;;  %v3589_v6 = vld [vmem:[#allocation8 + $0x538] sm:$0xf0] }
 0x136   :  { %2031 = vmatmul.bf16.vlgmr.msrb.gmra.mxu3 %v4490_v9 }
 0x137   :  { %2079 = vmatpush.bf16.msra.mxu3 %v3684_v16  ;;  %2059 = vmatmul.bf16.vlgmr.msra.gmra.mxu1 %v4479_v49  ;;  %v3564_v16 = vor.u32 %v4106_v10, %v3563_v7  ;;  %v4140_v7 = vld [vmem:[#allocation11 + $0x18] sm:$0xff]  ;;  %v3592_v10 = vor.u32 %v4109_v5, %v3589_v6 }
 0x138   :  { %2107 = vmatpush.bf16.msrb.mxu1 %v3304_v17  ;;  %2095 = vmatpush.bf16.msrb.mxu0 %v3064_v21  ;;  %v3184_v17 = vor.u32 %v4007_v11, %v3181_v12  ;;  %v2944_v21 = vor.u32 %v3947_v13, %v2941_v14  ;;  %v4049_v11 = vld [vmem:[#allocation8 + $0x344] sm:$0xf]  ;;  %v3349_v12 = vld [vmem:[#allocation8 + $0x358] sm:$0xf0]  ;;  %v4103_v13 = vld [vmem:[#allocation8 + $0x4f4] sm:$0xf] }
 0x139   :  { %2067 = vmatpush.bf16.msra.mxu2 %v3444_v27  ;;  %v3324_v27 = vor.u32 %v4046_v19, %v3323_v18  ;;  %v3565_v14 = vld [vmem:[#allocation8 + $0x508] sm:$0xf0]  ;;  %v4043_v19 = vld [vmem:[#allocation8 + $0x314] sm:$0xf] }
 0x13a   :  { %v3568_v18 = vor.u32 %v4103_v13, %v3565_v14 }
 0x13b   :  { %2080 = vmatpush.bf16.msra.mxu3 %v3660_v28  ;;  %v3496_v28 = vor.u32 %v4085_v20, %v3493_v22  ;;  %v3325_v20 = vld [vmem:[#allocation8 + $0x328] sm:$0xf0]  ;;  %v3541_v22 = vld [vmem:[#allocation8 + $0x4d8] sm:$0xf0] }
 0x13c   :  { %2108 = vmatpush.bf16.msrb.mxu1 %v3280_v30  ;;  %2096 = vmatpush.bf16.msrb.mxu0 %v3040_v33  ;;  %v3540_v30 = vor.u32 %v4100_v24, %v3539_v23  ;;  %v3515_v33 = vld [vmem:[#allocation8 + $0x490] sm:$0xf]  ;;  %v3328_v23 = vor.u32 %v4043_v19, %v3325_v20 }
 0x13d   :  { %2068 = vmatpush.bf16.msra.mxu2 %v3420_v39  ;;  %v3472_v39 = vor.u32 %v4079_v31, %v3469_v45  ;;  %v4138_v24 = vld [vmem:[#allocation11 + $0x8] sm:$0xff]  ;;  %v4149_v31 = vld [vmem:[#allocation11 + $0x60] sm:$0xff] }
 0x13f   :  { %2081 = vmatpush.bf16.msra.mxu3 %v3636_v40  ;;  %v3516_v40 = vor.u32 %v4094_v34, %v3515_v33  ;;  %v4148_v33 = vld [vmem:[#allocation11 + $0x58] sm:$0xff] }
 0x140   :  { %2109 = vmatpush.bf16.msrb.mxu1 %v3256_v41  ;;  %2097 = vmatpush.bf16.msrb.mxu0 %v3016_v57  ;;  %v4144_v41 = vld [vmem:[#allocation11 + $0x38] sm:$0xff] }
 0x141   :  { %2069 = vmatpush.bf16.msra.mxu2 %v3396_v52  ;;  %v3445_v57 = vld [vmem:[#allocation8 + $0x418] sm:$0xf0]  ;;  %v4067_v52 = vld [vmem:[#allocation8 + $0x3d4] sm:$0xf] }
 0x142   :  { %v3448_v61 = vor.u32 %v4073_v46, %v3445_v57  ;;  %v4160_v34 = vld [vmem:[#allocation11 + $0xb8] sm:$0xff]  ;;  %v4145_v46 = vld [vmem:[#allocation11 + $0x40] sm:$0xff] }
 0x143   :  { %2082 = vmatpush.bf16.msra.mxu3 %v3612_v53  ;;  %v3421_v53 = vld [vmem:[#allocation8 + $0x3e8] sm:$0xf0] }
 0x144   :  { %2110 = vmatpush.bf16.msrb.mxu1 %v3232_v54  ;;  %2098 = vmatpush.bf16.msrb.mxu0 %v2992_v59  ;;  %v4121_v54 = vld [vmem:[#allocation8 + $0x584] sm:$0xf]  ;;  %v3424_v56 = vor.u32 %v4067_v52, %v3421_v53  ;;  %v4155_v53 = vld [vmem:[#allocation11 + $0x90] sm:$0xff] }
 0x145   :  { %2070 = vmatpush.bf16.msra.mxu2 %v3372_v2  ;;  %v4061_v59 = vld [vmem:[#allocation8 + $0x3a4] sm:$0xf]  ;;  %v3616_v2 = vor.u32 %v4115_v62, %v3613_v63 }
 0x146   :  { %v3400_v1 = vor.u32 %v4061_v59, %v3397_v60  ;;  %v4157_v57 = vld [vmem:[#allocation11 + $0xa0] sm:$0xff]  ;;  %v4154_v60 = vld [vmem:[#allocation11 + $0x88] sm:$0xff] }
 0x147   :  { %2083 = vmatpush.bf16.msra.mxu3 %v3588_v3  ;;  %v4055_v3 = vld [vmem:[#allocation8 + $0x374] sm:$0xf] }
 0x148   :  { %2111 = vmatpush.bf16.msrb.mxu1 %v3208_v4  ;;  %2099 = vmatpush.bf16.msrb.mxu0 %v2968_v8  ;;  %v3373_v4 = vld [vmem:[#allocation8 + $0x388] sm:$0xf0]  ;;  %v4152_v8 = vld [vmem:[#allocation11 + $0x78] sm:$0xff] }
 0x149   :  { %2071 = vmatpush.bf16.msra.mxu2 %v3348_v15  ;;  %v4139_v15 = vld [vmem:[#allocation11 + $0x10] sm:$0xff] }
 0x14b   :  { %2084 = vmatpush.bf16.msra.mxu3 %v3564_v16  ;;  %v4151_v16 = vld [vmem:[#allocation11 + $0x70] sm:$0xff] }
 0x14c   :  { %2112 = vmatpush.bf16.msrb.mxu1 %v3184_v17  ;;  %2100 = vmatpush.bf16.msrb.mxu0 %v2944_v21  ;;  %v3352_v17 = vor.u32 %v4049_v11, %v3349_v12  ;;  %v4097_v21 = vld [vmem:[#allocation8 + $0x4c4] sm:$0xf]  ;;  %v4166_v12 = vld [vmem:[#allocation11 + $0xe8] sm:$0xff] }
 0x14d   :  { %2072 = vmatpush.bf16.msra.mxu2 %v3324_v27  ;;  %v3544_v26 = vor.u32 %v4097_v21, %v3541_v22  ;;  %v4091_v27 = vld [vmem:[#allocation8 + $0x494] sm:$0xf]  ;;  %v4165_v21 = vld [vmem:[#allocation11 + $0xe0] sm:$0xff] }
 0x14f   :  { %2085 = vmatpush.bf16.msra.mxu3 %v3540_v30  ;;  %2101 = vmatmul.bf16.vlgmr.msrb.gmra.mxu0 %v4476_v29  ;;  %v3637_v29 = vld [vmem:[#allocation8 + $0x598] sm:$0xf0]  ;;  %v4137_v30 = vld [vmem:[#allocation11] sm:$0xff] }
 0x150   :  { %2113 = vmatpush.bf16.msrb.mxu1 %v3160_v32  ;;  %2073 = vmatmul.bf16.vlgmr.msra.gmra.mxu2 %v4486_v42  ;;  %v3640_v58 = vor.u32 %v4121_v54, %v3637_v29  ;;  %v1822_v32 = vpop.f32.mrf.mxu0 }
 0x151   :  { %2121 = vmatpush.bf16.msrb.mxu2 %v3496_v28  ;;  %2555 = vmatpush.bf16.msra.mxu0 %v4144_v41  ;;  %v3517_v28 = vld [vmem:[#allocation8 + $0x4a8] sm:$0xf0] }
 0x152   :  { %v3520_v45 = vor.u32 %v4091_v27, %v3517_v28  ;;  %v4164_v27 = vld [vmem:[#allocation11 + $0xd8] sm:$0xff] }
 0x153   :  { %2086 = vmatpush.bf16.msra.mxu3 %v3516_v40  ;;  %v1836_v35 = vpop.f32.mrf.mxu1  ;;  %v4158_v40 = vld [vmem:[#allocation11 + $0xa8] sm:$0xff] }
 0x154   :  { %2114 = vmatpush.bf16.msrb.mxu1 %v3136_v43 }
 0x155   :  { %2122 = vmatpush.bf16.msrb.mxu2 %v3472_v39  ;;  %2556 = vmatpush.bf16.msra.mxu0 %v4143_v50  ;;  %v4146_v39 = vld [vmem:[#allocation11 + $0x48] sm:$0xff] }
 0x156   :  { %2087 = vmatmul.bf16.vlgmr.msra.gmra.mxu3 %v4490_v9 }
 0x157   :  { %2135 = vmatpush.bf16.msrb.mxu3 %v3688_v44  ;;  %2115 = vmatmul.bf16.vlgmr.msrb.gmra.mxu1 %v4479_v49  ;;  %v3376_v49 = vor.u32 %v4055_v3, %v3373_v4  ;;  %v4168_v3 = vld [vmem:[#allocation11 + $0xf8] sm:$0xff]  ;;  %v842_v4 = vperm.slane %v4510_v38, 1 }
 0x158   :  { %2569 = vmatpush.bf16.msra.mxu1 %v4152_v8  ;;  %v1824_v41 = vpop.f32.mrf.mxu0  ;;  %v4167_v8 = vld [vmem:[#allocation11 + $0xf0] sm:$0xff] }
 0x159   :  { %2123 = vmatpush.bf16.msrb.mxu2 %v3448_v61  ;;  %2557 = vmatpush.bf16.msra.mxu0 %v4142_v55 }
 0x15b   :  { %2136 = vmatpush.bf16.msrb.mxu3 %v3664_v51  ;;  %v1838_v44 = vpop.f32.mrf.mxu1 }
 0x15c   :  { %2570 = vmatpush.bf16.msra.mxu1 %v4151_v16 }
 0x15d   :  { %2124 = vmatpush.bf16.msrb.mxu2 %v3424_v56  ;;  %2558 = vmatpush.bf16.msra.mxu0 %v4141_v0 }
 0x15f   :  { %2137 = vmatpush.bf16.msrb.mxu3 %v3640_v58 }
 0x160   :  { %2571 = vmatpush.bf16.msra.mxu1 %v4150_v25  ;;  %v1878_v52 = vpop.f32.mrf.mxu0 }
 0x161   :  { %2125 = vmatpush.bf16.msrb.mxu2 %v3400_v1  ;;  %2559 = vmatpush.bf16.msra.mxu0 %v4140_v7 }
 0x163   :  { %2138 = vmatpush.bf16.msrb.mxu3 %v3616_v2  ;;  %v1892_v29 = vpop.f32.mrf.mxu1  ;;  %v4153_v2 = vld [vmem:[#allocation11 + $0x80] sm:$0xff] }
 0x164   :  { %2572 = vmatpush.bf16.msra.mxu1 %v4149_v31  ;;  %v4163_v31 = vld [vmem:[#allocation11 + $0xd0] sm:$0xff] }
 0x165   :  { %2126 = vmatpush.bf16.msrb.mxu2 %v3376_v49  ;;  %2560 = vmatpush.bf16.msra.mxu0 %v4139_v15 }
 0x167   :  { %2139 = vmatpush.bf16.msrb.mxu3 %v3592_v10  ;;  %v1879_v10 = vadd.f32 %v1878_v52, %v842_v4 }
 0x168   :  { %2573 = vmatpush.bf16.msra.mxu1 %v4148_v33  ;;  %v1880_v5 = vpop.f32.mrf.mxu0 }
 0x169   :  { %2127 = vmatpush.bf16.msrb.mxu2 %v3352_v17  ;;  %2561 = vmatpush.bf16.msra.mxu0 %v4138_v24  ;;  %v1893_v13 = vadd.f32 %v1892_v29, %v1879_v10  ;;  %v1881_v14 = vadd.f32 %v1880_v5, %v842_v4 }
 0x16b   :  { %2140 = vmatpush.bf16.msrb.mxu3 %v3568_v18  ;;  %v1894_v49 = vpop.f32.mrf.mxu1 }
 0x16c   :  { %2574 = vmatpush.bf16.msra.mxu1 %v4147_v36  ;;  %v1895_v15 = vadd.f32 %v1894_v49, %v1881_v14  ;;  %v4183_v14 = vld [vmem:[#allocation11 + $0x170] sm:$0xff] }
 0x16d   :  { %2128 = vmatpush.bf16.msrb.mxu2 %v3328_v23  ;;  %2562 = vmatpush.bf16.msra.mxu0 %v4137_v30  ;;  %v843_v30 = vperm.slane %v4510_v38, 2 }
 0x16f   :  { %2141 = vmatpush.bf16.msrb.mxu3 %v3544_v26 }
 0x170   :  { %2129 = vmatmul.bf16.vlgmr.msrb.gmra.mxu2 %v4486_v42  ;;  %2575 = vmatpush.bf16.msra.mxu1 %v4146_v39  ;;  %v841_v42 = vperm.slane %v4510_v38, 0  ;;  %v1934_v17 = vpop.f32.mrf.mxu0 }
 0x171   :  { %2583 = vmatpush.bf16.msra.mxu2 %v4160_v34  ;;  %v1850_v43 = vpop.f32.mrf.mxu2  ;;  %v1935_v33 = vadd.f32 %v1934_v17, %v843_v30 }
 0x172   :  { %v1825_v51 = vadd.f32 %v1824_v41, %v841_v42 }
 0x173   :  { %2142 = vmatpush.bf16.msrb.mxu3 %v3520_v45 }
 0x174   :  { %2576 = vmatpush.bf16.msra.mxu1 %v4145_v46  ;;  %v1839_v54 = vadd.f32 %v1838_v44, %v1825_v51  ;;  %v4161_v44 = vld [vmem:[#allocation11 + $0xc0] sm:$0xff]  ;;  %v4174_v51 = vld [vmem:[#allocation11 + $0x128] sm:$0xff] }
 0x175   :  { %2584 = vmatpush.bf16.msra.mxu2 %v4159_v37  ;;  %v4162_v37 = vld [vmem:[#allocation11 + $0xc8] sm:$0xff] }
 0x176   :  { %2143 = vmatmul.bf16.vlgmr.msrb.gmra.mxu3 %v4490_v9  ;;  %v1823_v9 = vadd.f32 %v1822_v32, %v841_v42  ;;  %v1948_v22 = vpop.f32.mrf.mxu1 }
 0x177   :  { %2597 = vmatpush.bf16.msra.mxu3 %v4168_v3  ;;  %v4170_v3 = vld [vmem:[#allocation11 + $0x108] sm:$0xff] }
 0x178   :  { %v1837_v50 = vadd.f32 %v1836_v35, %v1823_v9  ;;  %v1936_v45 = vpop.f32.mrf.mxu0  ;;  %v1949_v35 = vadd.f32 %v1948_v22, %v1935_v33  ;;  %v845_v22 = vperm.slane %v4510_v38, 4 }
 0x179   :  { %2585 = vmatpush.bf16.msra.mxu2 %v4158_v40  ;;  %v1864_v47 = vpop.f32.mrf.mxu3  ;;  %v1852_v61 = vpop.f32.mrf.mxu2  ;;  %v1937_v36 = vadd.f32 %v1936_v45, %v843_v30  ;;  %v4178_v45 = vld [vmem:[#allocation11 + $0x148] sm:$0xff] }
 0x17a   :  { %v1851_v55 = vadd.f32 %v1850_v43, %v1837_v50  ;;  %v1853_v58 = vadd.f32 %v1852_v61, %v1839_v54  ;;  %v4175_v61 = vld [vmem:[#allocation11 + $0x130] sm:$0xff]  ;;  %v4173_v54 = vld [vmem:[#allocation11 + $0x120] sm:$0xff] }
 0x17b   :  { %2598 = vmatpush.bf16.msra.mxu3 %v4167_v8  ;;  %v4169_v8 = vld [vmem:[#allocation11 + $0x100] sm:$0xff] }
 0x17c   :  { %v1865_v56 = vadd.f32 %v1864_v47, %v1851_v55  ;;  %v4172_v55 = vld [vmem:[#allocation11 + $0x118] sm:$0xff] }
 0x17d   :  { %2586 = vmatpush.bf16.msra.mxu2 %v4157_v57  ;;  %v4176_v57 = vld [vmem:[#allocation11 + $0x138] sm:$0xff] }
 0x17e   :  { %v2149_v0 = vmax.f32 %v1865_v56, 0.0  ;;  %v1950_v34 = vpop.f32.mrf.mxu1  ;;  %2611 = vmatpush.bf16.msrb.mxu0 %v4176_v57  ;;  %v844_v56 = vperm.slane %v4510_v38, 3  ;;  %v846_v57 = vperm.slane %v4510_v38, 5 }
 0x17f   :  { %2599 = vmatpush.bf16.msra.mxu3 %v4166_v12  ;;  %v1951_v40 = vadd.f32 %v1950_v34, %v1937_v36 }
 0x181   :  { %2587 = vmatpush.bf16.msra.mxu2 %v4156_v48  ;;  %v1866_v59 = vpop.f32.mrf.mxu3  ;;  %v1906_v63 = vpop.f32.mrf.mxu2 }
 0x182   :  { %v1867_v62 = vadd.f32 %v1866_v59, %v1853_v58  ;;  %v1907_v16 = vadd.f32 %v1906_v63, %v1893_v13  ;;  %2612 = vmatpush.bf16.msrb.mxu0 %v4175_v61 }
 0x183   :  { %2600 = vmatpush.bf16.msra.mxu3 %v4165_v21  ;;  %v4180_v21 = vld [vmem:[#allocation11 + $0x158] sm:$0xff] }
 0x184   :  { %v2155_v1 = vmax.f32 %v1867_v62, 0.0 }
 0x185   :  { %2588 = vmatpush.bf16.msra.mxu2 %v4155_v53 }
 0x186   :  { %v2161_v6 = vpack.c.bf16 %v2155_v1, %v2149_v0  ;;  %2613 = vmatpush.bf16.msrb.mxu0 %v4174_v51 }
 0x187   :  { %2601 = vmatpush.bf16.msra.mxu3 %v4164_v27 }
 0x188   :  { %2563 = vmatmul.bf16.vlgmr.msra.gmra.mxu0 %v2161_v6 }
 0x189   :  { %2589 = vmatpush.bf16.msra.mxu2 %v4154_v60  ;;  %v1920_v7 = vpop.f32.mrf.mxu3  ;;  %v1908_v11 = vpop.f32.mrf.mxu2  ;;  %v4171_v60 = vld [vmem:[#allocation11 + $0x110] sm:$0xff] }
 0x18a   :  { %v1921_v18 = vadd.f32 %v1920_v7, %v1907_v16  ;;  %v1909_v19 = vadd.f32 %v1908_v11, %v1895_v15  ;;  %2614 = vmatpush.bf16.msrb.mxu0 %v4173_v54  ;;  %v4184_v11 = vld [vmem:[#allocation11 + $0x178] sm:$0xff]  ;;  %v4182_v16 = vld [vmem:[#allocation11 + $0x168] sm:$0xff] }
 0x18b   :  { %2602 = vmatpush.bf16.msra.mxu3 %v4163_v31  ;;  %2625 = vmatpush.bf16.msrb.mxu1 %v4184_v11 }
 0x18c   :  { %v2150_v24 = vmax.f32 %v1921_v18, 0.0 }
 0x18d   :  { %2590 = vmatpush.bf16.msra.mxu2 %v4153_v2 }
 0x18e   :  { %v1990_v52 = vpop.f32.mrf.mxu0  ;;  %2615 = vmatpush.bf16.msrb.mxu0 %v4172_v55 }
 0x18f   :  { %2603 = vmatpush.bf16.msra.mxu3 %v4162_v37  ;;  %v1991_v62 = vadd.f32 %v1990_v52, %v844_v56  ;;  %2626 = vmatpush.bf16.msrb.mxu1 %v4183_v14  ;;  %v4177_v37 = vld [vmem:[#allocation11 + $0x140] sm:$0xff] }
 0x191   :  { %v1922_v20 = vpop.f32.mrf.mxu3  ;;  %v1962_v26 = vpop.f32.mrf.mxu2 }
 0x192   :  { %v1923_v23 = vadd.f32 %v1922_v20, %v1909_v19  ;;  %v1963_v41 = vadd.f32 %v1962_v26, %v1949_v35  ;;  %2616 = vmatpush.bf16.msrb.mxu0 %v4171_v60  ;;  %v4181_v19 = vld [vmem:[#allocation11 + $0x160] sm:$0xff] }
 0x193   :  { %2604 = vmatpush.bf16.msra.mxu3 %v4161_v44  ;;  %2627 = vmatpush.bf16.msrb.mxu1 %v4182_v16 }
 0x194   :  { %v2156_v25 = vmax.f32 %v1923_v23, 0.0  ;;  %v2004_v53 = vpop.f32.mrf.mxu1 }
 0x195   :  { %v2005_v0 = vadd.f32 %v2004_v53, %v1991_v62 }
 0x196   :  { %v2162_v28 = vpack.c.bf16 %v2156_v25, %v2150_v24  ;;  %v1992_v58 = vpop.f32.mrf.mxu0  ;;  %2617 = vmatpush.bf16.msrb.mxu0 %v4170_v3  ;;  %v4179_v25 = vld [vmem:[#allocation11 + $0x150] sm:$0xff] }
 0x197   :  { %v1993_v1 = vadd.f32 %v1992_v58, %v844_v56  ;;  %2628 = vmatpush.bf16.msrb.mxu1 %v4181_v19 }
 0x198   :  { %2577 = vmatmul.bf16.vlgmr.msra.gmra.mxu1 %v2162_v28 }
 0x199   :  { %v1976_v32 = vpop.f32.mrf.mxu3  ;;  %v1964_v39 = vpop.f32.mrf.mxu2 }
 0x19a   :  { %v1977_v43 = vadd.f32 %v1976_v32, %v1963_v41  ;;  %v1965_v42 = vadd.f32 %v1964_v39, %v1951_v40  ;;  %2618 = vmatpush.bf16.msrb.mxu0 %v4169_v8 }
 0x19b   :  { %2629 = vmatpush.bf16.msrb.mxu1 %v4180_v21 }
 0x19c   :  { %v2151_v47 = vmax.f32 %v1977_v43, 0.0  ;;  %v2006_v63 = vpop.f32.mrf.mxu1 }
 0x19d   :  { %v2007_v4 = vadd.f32 %v2006_v63, %v1993_v1 }
 0x19f   :  { %2630 = vmatpush.bf16.msrb.mxu1 %v4179_v25 }
 0x1a1   :  { %v1978_v46 = vpop.f32.mrf.mxu3 }
 0x1a2   :  { %v1979_v9 = vadd.f32 %v1978_v46, %v1965_v42 }
 0x1a3   :  { %2631 = vmatpush.bf16.msrb.mxu1 %v4178_v45 }
 0x1a4   :  { %v2157_v48 = vmax.f32 %v1979_v9, 0.0 }
 0x1a6   :  { %v2163_v50 = vpack.c.bf16 %v2157_v48, %v2151_v47 }
 0x1a7   :  { %2632 = vmatpush.bf16.msrb.mxu1 %v4177_v37 }
 0x1a8   :  { %2591 = vmatmul.bf16.vlgmr.msra.gmra.mxu2 %v2163_v50 }
 0x1ac   :  { %v2046_v17 = vpop.f32.mrf.mxu0 }
 0x1ad   :  { %v2047_v26 = vadd.f32 %v2046_v17, %v845_v22 }
 0x1b4   :  { %v2060_v18 = vpop.f32.mrf.mxu1  ;;  %v2048_v23 = vpop.f32.mrf.mxu0 }
 0x1b5   :  { %v2018_v29 = vpop.f32.mrf.mxu2  ;;  %v2061_v28 = vadd.f32 %v2060_v18, %v2047_v26  ;;  %v2049_v30 = vadd.f32 %v2048_v23, %v845_v22 }
 0x1b6   :  { %v2019_v5 = vadd.f32 %v2018_v29, %v2005_v0 }
 0x1b9   :  { %v2032_v59 = vpop.f32.mrf.mxu3 }
 0x1ba   :  { %v2033_v6 = vadd.f32 %v2032_v59, %v2019_v5  ;;  %v4205_v5 = vld [vmem:[%s4533_s6] ss:$0 sm:$0xff]  ;;  %s2649_s6 = sshll.u32 %s4534_s7, 4  ;;  %s2650_s6 = int_to_ptr.hbm [resolvable:$true] %s2649_s6 }
 0x1bc   :  { %v2152_v12 = vmax.f32 %v2033_v6, 0.0  ;;  %v2062_v27 = vpop.f32.mrf.mxu1 }
 0x1bd   :  { %v2020_v2 = vpop.f32.mrf.mxu2  ;;  %v2063_v32 = vadd.f32 %v2062_v27, %v2049_v30 }
 0x1be   :  { %v2021_v49 = vadd.f32 %v2020_v2, %v2007_v4 }
 0x1c1   :  { %v2034_v7 = vpop.f32.mrf.mxu3 }
 0x1c2   :  { %v2035_v10 = vadd.f32 %v2034_v7, %v2021_v49 }
 0x1c4   :  { %v2158_v13 = vmax.f32 %v2035_v10, 0.0 }
 0x1c6   :  { %v2164_v15 = vpack.c.bf16 %v2158_v13, %v2152_v12 }
 0x1c8   :  { %2605 = vmatmul.bf16.vlgmr.msra.gmra.mxu3 %v2164_v15 }
 0x1cc   :  { %v2102_v42 = vpop.f32.mrf.mxu0 }
 0x1cd   :  { %v2103_v48 = vadd.f32 %v2102_v42, %v846_v57 }
 0x1d3   :  { %v2074_v20 = vpop.f32.mrf.mxu2 }
 0x1d4   :  { %v2075_v33 = vadd.f32 %v2074_v20, %v2061_v28  ;;  %v2116_v44 = vpop.f32.mrf.mxu1  ;;  %v2104_v9 = vpop.f32.mrf.mxu0 }
 0x1d5   :  { %v2117_v50 = vadd.f32 %v2116_v44, %v2103_v48  ;;  %v2105_v51 = vadd.f32 %v2104_v9, %v846_v57 }
 0x1d9   :  { %v2088_v24 = vpop.f32.mrf.mxu3 }
 0x1da   :  { %v2089_v34 = vadd.f32 %v2088_v24, %v2075_v33 }
 0x1db   :  { %v2076_v31 = vpop.f32.mrf.mxu2 }
 0x1dc   :  { %v2077_v35 = vadd.f32 %v2076_v31, %v2063_v32  ;;  %v2153_v40 = vmax.f32 %v2089_v34, 0.0  ;;  %v2118_v61 = vpop.f32.mrf.mxu1 }
 0x1dd   :  { %v2119_v53 = vadd.f32 %v2118_v61, %v2105_v51 }
 0x1e1   :  { %v2090_v36 = vpop.f32.mrf.mxu3 }
 0x1e2   :  { %v2091_v39 = vadd.f32 %v2090_v36, %v2077_v35 }
 0x1e4   :  { %v2159_v41 = vmax.f32 %v2091_v39, 0.0 }
 0x1e6   :  { %v2165_v43 = vpack.c.bf16 %v2159_v41, %v2153_v40 }
 0x1e8   :  { %2619 = vmatmul.bf16.vlgmr.msrb.gmra.mxu0 %v2165_v43 }
 0x1f3   :  { %v2130_v46 = vpop.f32.mrf.mxu2 }
 0x1f4   :  { %v2131_v54 = vadd.f32 %v2130_v46, %v2117_v50 }
 0x1f9   :  { %v2144_v47 = vpop.f32.mrf.mxu3 }
 0x1fa   :  { %v2145_v29 = vadd.f32 %v2144_v47, %v2131_v54 }
 0x1fb   :  { %v2132_v52 = vpop.f32.mrf.mxu2 }
 0x1fc   :  { %v2133_v55 = vadd.f32 %v2132_v52, %v2119_v53  ;;  %v2154_v59 = vmax.f32 %v2145_v29, 0.0 }
 0x201   :  { %v2146_v56 = vpop.f32.mrf.mxu3 }
 0x202   :  { %v2147_v58 = vadd.f32 %v2146_v56, %v2133_v55 }
 0x204   :  { %v2160_v60 = vmax.f32 %v2147_v58, 0.0 }
 0x205   :  { %v2564_v63 = vpop.f32.mrf.mxu0 }
 0x206   :  { %v2166_v62 = vpack.c.bf16 %v2160_v60, %v2154_v59  ;;  %v2565_v6 = vadd.f32 %v4205_v5, %v2564_v63 }
 0x208   :  { %2633 = vmatmul.bf16.vlgmr.msrb.gmra.mxu1 %v2166_v62 }
 0x20d   :  { %v2566_v38 = vpop.f32.mrf.mxu0 }
 0x20e   :  { %v2567_v49 = vadd.f32 %v4205_v5, %v2566_v38 }
 0x215   :  { %v2578_v0 = vpop.f32.mrf.mxu1 }
 0x216   :  { %v2579_v10 = vadd.f32 %v2578_v0, %v2565_v6 }
 0x21d   :  { %v2580_v2 = vpop.f32.mrf.mxu1 }
 0x21e   :  { %v2581_v11 = vadd.f32 %v2580_v2, %v2567_v49 }
 0x22b   :  { %v2592_v1 = vpop.f32.mrf.mxu2 }
 0x22c   :  { %v2593_v13 = vadd.f32 %v2592_v1, %v2579_v10 }
 0x233   :  { %v2594_v7 = vpop.f32.mrf.mxu2 }
 0x234   :  { %v2595_v14 = vadd.f32 %v2594_v7, %v2581_v11 }
 0x24b   :  { %v2606_v3 = vpop.f32.mrf.mxu3 }
 0x24c   :  { %v2607_v16 = vadd.f32 %v2606_v3, %v2593_v13 }
 0x253   :  { %v2608_v12 = vpop.f32.mrf.mxu3 }
 0x254   :  { %v2609_v17 = vadd.f32 %v2608_v12, %v2595_v14 }
 0x265   :  { %v2620_v4 = vpop.f32.mrf.mxu0 }
 0x266   :  { %v2621_v18 = vadd.f32 %v2620_v4, %v2607_v16 }
 0x26d   :  { %v2622_v15 = vpop.f32.mrf.mxu0 }
 0x26e   :  { %v2623_v19 = vadd.f32 %v2622_v15, %v2609_v17 }
 0x285   :  { %v2634_v8 = vpop.f32.mrf.mxu1 }
 0x286   :  { %v2635_v21 = vadd.f32 %v2634_v8, %v2621_v18 }
 0x28d   :  { %v2636_v20 = vpop.f32.mrf.mxu1 }
 0x28e   :  { %v2637_v22 = vadd.f32 %v2636_v20, %v2623_v19 }
 0x290   :  { %v4188_v23 = vpack.c.bf16 %v2637_v22, %v2635_v21 }
 0x292   :  { %4189 = vst [vmem:[#allocation13] sm:$0xff] %v4188_v23  }
 0x293   :  { %2655 = dma.vmem_to_hbm [thread:$0]  %s2648_s13, 128, %s2650_s6, [#allocation4], %s4396_s10, %s4396_s10, %s4397_s11  }
 0x294   :  { %4382 = dma.done.wait [#allocation4], 128  }
 0x295   :  { %4383 = vsyncadd [#allocation4], 4294967168 }
 0x296   :  { %2660 = vsyncpa [#allocation3], 1 }
 0x297   :  { %2661 = vsyncpa [#allocation6], 1 }
 0x298   :  { %2662 = vsyncpa [#allocation9], 1 }
 0x299   :  { %2663 = vsyncpa [#allocation12], 1 }
 0x29a   :  { %2664 = vsyncpa [#allocation4], 1 }

// kernel: tpu_custom_call.1
= control target key start
LH: loop header
LB: loop body
LE: loop exit
PB: predicated region body
PF: predicated region fallthrough
CT: control target
= control target key end

     0   :  { %12 = vsyncpa [#allocation3], 0  ;;  %s4527_s0 = inlined_call_operand.hbm [shape: bf16[16,256], index: 0, kind: input, shape index: {}]   ;;  %s4528_s1 = inlined_call_operand.hbm [shape: bf16[256,512], index: 1, kind: input, shape index: {}]   ;;  %s4529_s2 = inlined_call_operand.hbm [shape: f32[1,512], index: 2, kind: input, shape index: {}]   ;;  %s4530_s3 = inlined_call_operand.hbm [shape: bf16[512,768], index: 3, kind: input, shape index: {}]   ;;  %s4531_s4 = inlined_call_operand.hbm [shape: f32[1,768], index: 4, kind: input, shape index: {}]   ;;  %s4532_s5 = inlined_call_operand.hbm [shape: bf16[768,128], index: 5, kind: input, shape index: {}]   ;;  %s4533_s6 = inlined_call_operand.vmem [shape: f32[1,128], index: 6, kind: input, shape index: {}]   ;;  %s4534_s7 = inlined_call_operand.hbm [shape: bf16[16,128], index: 7, kind: output, shape index: {}]  }
   0x1   :  { %13 = vsyncpa [#allocation6], 0 }
   0x2   :  { %14 = vsyncpa [#allocation9], 0 }
   0x3   :  { %15 = vsyncpa [#allocation12], 0  ;;  %s34_s26 = sshll.u32 %s4528_s1, 4  ;;  %s35_s26 = int_to_ptr.hbm [resolvable:$true] %s34_s26 }
   0x4   :  { %16 = vsyncpa [#allocation4], 0  ;;  %s4384_s27 = smov [#allocation5]   ;;  %s58_s8 = sshll.u32 %s4530_s3, 4  ;;  %s59_s8 = int_to_ptr.hbm [resolvable:$true] %s58_s8 }
   0x5   :  { %s36_s28 = sshll.u32 %s4384_s27, 4  ;;  %s4385_s9 = smov 256   ;;  %s37_s28 = int_to_ptr.vmem [resolvable:$true] %s36_s28 }
   0x6   :  { %s4386_s10 = smov 16   ;;  %s4387_s11 = smov [#allocation8]  }
   0x7   :  { %42 = dma.hbm_to_vmem [thread:$0]  %s35_s26, 8192, %s37_s28, [#allocation6], %s4385_s9, %s4385_s9, %s4386_s10  }
   0x8   :  { %s60_s12 = sshll.u32 %s4387_s11, 4  ;;  %s4388_s13 = smov 384   ;;  %s61_s12 = int_to_ptr.vmem [resolvable:$true] %s60_s12 }
   0x9   :  { %s4389_s14 = smov 24   ;;  %s21_s16 = sshll.u32 %s4527_s0, 4  ;;  %s22_s16 = int_to_ptr.hbm [resolvable:$true] %s21_s16 }
   0xa   :  { %66 = dma.hbm_to_vmem [thread:$0]  %s59_s8, 24576, %s61_s12, [#allocation9], %s4388_s13, %s4388_s13, %s4389_s14  }
   0xb   :  { %s4390_s17 = smov [#allocation2]   ;;  %s48_s20 = sshll.u32 %s4529_s2, 4  ;;  %s49_s20 = int_to_ptr.hbm [resolvable:$true] %s48_s20 }
   0xc   :  { %s23_s18 = sshll.u32 %s4390_s17, 4  ;;  %s4391_s21 = smov 128   ;;  %s24_s18 = int_to_ptr.vmem [resolvable:$true] %s23_s18 }
   0xd   :  { %s4392_s22 = smov 8   ;;  %s4393_s23 = smov [#allocation7]  }
   0xe   :  { %29 = dma.hbm_to_vmem [thread:$0]  %s22_s16, 256, %s24_s18, [#allocation3], %s4391_s21, %s4391_s21, %s4392_s22  }
   0xf   :  { %s50_s24 = sshll.u32 %s4393_s23, 4  ;;  %s72_s27 = sshll.u32 %s4531_s4, 4  ;;  %s51_s24 = int_to_ptr.vmem [resolvable:$true] %s50_s24  ;;  %s73_s27 = int_to_ptr.hbm [resolvable:$true] %s72_s27 }
  0x10   :  { %53 = dma.hbm_to_vmem [thread:$0]  %s49_s20, 64, %s51_s24, [#allocation6]  }
  0x11   :  { %s82_s29 = sshll.u32 %s4532_s5, 4  ;;  %s4394_s30 = smov [#allocation10]   ;;  %s83_s29 = int_to_ptr.hbm [resolvable:$true] %s82_s29 }
  0x12   :  { %s74_s8 = sshll.u32 %s4394_s30, 4  ;;  %s4395_s2 = smov [#allocation11]   ;;  %s75_s8 = int_to_ptr.vmem [resolvable:$true] %s74_s8 }
  0x13   :  { %77 = dma.hbm_to_vmem [thread:$0]  %s73_s27, 96, %s75_s8, [#allocation9]  }
  0x14   :  { %s84_s9 = sshll.u32 %s4395_s2, 4  ;;  %s4396_s10 = smov 64   ;;  %s85_s9 = int_to_ptr.vmem [resolvable:$true] %s84_s9 }
  0x15   :  { %s4397_s11 = smov 4  }
  0x16   :  { %90 = dma.hbm_to_vmem [thread:$0]  %s83_s29, 6144, %s85_s9, [#allocation12], %s4396_s10, %s4396_s10, %s4397_s11  }
  0x17   :  { %4374 = dma.done.wait [#allocation3], 256  }
  0x18   :  { %4375 = vsyncadd [#allocation3], 4294967040 }
  0x19   :  { %4376 = dma.done.wait [#allocation6], 8256  }
  0x1a   :  { %4377 = vsyncadd [#allocation6], 4294959040 }
  0x1b   :  { %4378 = dma.done.wait [#allocation9], 24672  }
  0x1c   :  { %4379 = vsyncadd [#allocation9], 4294942624 }
  0x1d   :  { %4380 = dma.done.wait [#allocation12], 6144  }
  0x1e   :  { %4381 = vsyncadd [#allocation12], 4294961152  ;;  %v2779_v0 = vld [vmem:[#allocation5 + $0xe0] sm:$0xf]  ;;  %v3911_v1 = vld [vmem:[#allocation5 + $0xec] sm:$0xf0] }
  0x1f   :  { %v2907_v2 = vld [vmem:[#allocation5 + $0x1e0] sm:$0xf]  ;;  %v2780_v3 = vor.u32 %v3911_v1, %v2779_v0  ;;  %v3943_v4 = vld [vmem:[#allocation5 + $0x1ec] sm:$0xf0]  ;;  %v3909_v5 = vld [vmem:[#allocation5 + $0xe4] sm:$0xf] }
  0x20   :  { %v2781_v6 = vld [vmem:[#allocation5 + $0xf0] sm:$0xf0]  ;;  %v2908_v7 = vor.u32 %v3943_v4, %v2907_v2  ;;  %v3941_v9 = vld [vmem:[#allocation5 + $0x1e4] sm:$0xf]  ;;  %v2763_v11 = vld [vmem:[#allocation5 + $0xc0] sm:$0xf] }
  0x21   :  { %v2784_v8 = vor.u32 %v3909_v5, %v2781_v6  ;;  %v2909_v10 = vld [vmem:[#allocation5 + $0x1f0] sm:$0xf0]  ;;  %523 = vmatpush.bf16.msra.mxu0 %v2780_v3  ;;  %v3907_v13 = vld [vmem:[#allocation5 + $0xcc] sm:$0xf0]  ;;  %v2891_v14 = vld [vmem:[#allocation5 + $0x1c0] sm:$0xf] }
  0x22   :  { %v2912_v12 = vor.u32 %v3941_v9, %v2909_v10  ;;  %v3939_v15 = vld [vmem:[#allocation5 + $0x1cc] sm:$0xf0]  ;;  %537 = vmatpush.bf16.msra.mxu1 %v2908_v7  ;;  %v2764_v16 = vor.u32 %v3907_v13, %v2763_v11  ;;  %v3905_v18 = vld [vmem:[#allocation5 + $0xc4] sm:$0xf]  ;;  %v2765_v19 = vld [vmem:[#allocation5 + $0xd0] sm:$0xf0] }
  0x23   :  { %551 = vmatpush.bf16.msra.mxu2 %v2784_v8  ;;  %v2892_v17 = vor.u32 %v3939_v15, %v2891_v14  ;;  %v3937_v20 = vld [vmem:[#allocation5 + $0x1c4] sm:$0xf]  ;;  %v2768_v21 = vor.u32 %v3905_v18, %v2765_v19  ;;  %v2893_v22 = vld [vmem:[#allocation5 + $0x1d0] sm:$0xf0]  ;;  %v2747_v23 = vld [vmem:[#allocation5 + $0xa0] sm:$0xf] }
  0x24   :  { %565 = vmatpush.bf16.msra.mxu3 %v2912_v12  ;;  %v3903_v24 = vld [vmem:[#allocation5 + $0xac] sm:$0xf0]  ;;  %v2896_v25 = vor.u32 %v3937_v20, %v2893_v22  ;;  %v2875_v26 = vld [vmem:[#allocation5 + $0x1a0] sm:$0xf]  ;;  %v3901_v28 = vld [vmem:[#allocation5 + $0xa4] sm:$0xf] }
  0x25   :  { %v3935_v27 = vld [vmem:[#allocation5 + $0x1ac] sm:$0xf0]  ;;  %524 = vmatpush.bf16.msra.mxu0 %v2764_v16  ;;  %v2748_v29 = vor.u32 %v3903_v24, %v2747_v23  ;;  %v2749_v30 = vld [vmem:[#allocation5 + $0xb0] sm:$0xf0]  ;;  %v3933_v31 = vld [vmem:[#allocation5 + $0x1a4] sm:$0xf] }
  0x26   :  { %v2877_v32 = vld [vmem:[#allocation5 + $0x1b0] sm:$0xf0]  ;;  %538 = vmatpush.bf16.msra.mxu1 %v2892_v17  ;;  %v2876_v33 = vor.u32 %v3935_v27, %v2875_v26  ;;  %v2752_v34 = vor.u32 %v3901_v28, %v2749_v30  ;;  %v2731_v35 = vld [vmem:[#allocation5 + $0x80] sm:$0xf]  ;;  %v3899_v36 = vld [vmem:[#allocation5 + $0x8c] sm:$0xf0] }
  0x27   :  { %552 = vmatpush.bf16.msra.mxu2 %v2768_v21  ;;  %v2859_v37 = vld [vmem:[#allocation5 + $0x180] sm:$0xf]  ;;  %v2880_v38 = vor.u32 %v3933_v31, %v2877_v32  ;;  %v3931_v39 = vld [vmem:[#allocation5 + $0x18c] sm:$0xf0]  ;;  %v3897_v40 = vld [vmem:[#allocation5 + $0x84] sm:$0xf]  ;;  %v2732_v44 = vor.u32 %v3899_v36, %v2731_v35 }
  0x28   :  { %566 = vmatpush.bf16.msra.mxu3 %v2896_v25  ;;  %v2733_v41 = vld [vmem:[#allocation5 + $0x90] sm:$0xf0]  ;;  %v3929_v42 = vld [vmem:[#allocation5 + $0x184] sm:$0xf]  ;;  %v2860_v45 = vor.u32 %v3931_v39, %v2859_v37  ;;  %v2715_v47 = vld [vmem:[#allocation5 + $0x60] sm:$0xf] }
  0x29   :  { %v2861_v43 = vld [vmem:[#allocation5 + $0x190] sm:$0xf0]  ;;  %525 = vmatpush.bf16.msra.mxu0 %v2748_v29  ;;  %v2736_v46 = vor.u32 %v3897_v40, %v2733_v41  ;;  %v3895_v48 = vld [vmem:[#allocation5 + $0x6c] sm:$0xf0]  ;;  %v2843_v49 = vld [vmem:[#allocation5 + $0x160] sm:$0xf] }
  0x2a   :  { %539 = vmatpush.bf16.msra.mxu1 %v2876_v33  ;;  %v2864_v50 = vor.u32 %v3929_v42, %v2861_v43  ;;  %v3927_v51 = vld [vmem:[#allocation5 + $0x16c] sm:$0xf0]  ;;  %v3893_v52 = vld [vmem:[#allocation5 + $0x64] sm:$0xf]  ;;  %v2717_v53 = vld [vmem:[#allocation5 + $0x70] sm:$0xf0]  ;;  %v2716_v56 = vor.u32 %v3895_v48, %v2715_v47 }
  0x2b   :  { %553 = vmatpush.bf16.msra.mxu2 %v2752_v34  ;;  %v3925_v54 = vld [vmem:[#allocation5 + $0x164] sm:$0xf]  ;;  %v2845_v55 = vld [vmem:[#allocation5 + $0x170] sm:$0xf0]  ;;  %v2844_v57 = vor.u32 %v3927_v51, %v2843_v49  ;;  %v2720_v58 = vor.u32 %v3893_v52, %v2717_v53  ;;  %v2699_v59 = vld [vmem:[#allocation5 + $0x40] sm:$0xf] }
  0x2c   :  { %567 = vmatpush.bf16.msra.mxu3 %v2880_v38  ;;  %v3891_v60 = vld [vmem:[#allocation5 + $0x4c] sm:$0xf0]  ;;  %v2827_v61 = vld [vmem:[#allocation5 + $0x140] sm:$0xf]  ;;  %v2848_v62 = vor.u32 %v3925_v54, %v2845_v55  ;;  %v3889_v0 = vld [vmem:[#allocation5 + $0x44] sm:$0xf] }
  0x2d   :  { %526 = vmatpush.bf16.msra.mxu0 %v2732_v44  ;;  %v3923_v63 = vld [vmem:[#allocation5 + $0x14c] sm:$0xf0]  ;;  %v2701_v1 = vld [vmem:[#allocation5 + $0x50] sm:$0xf0]  ;;  %v3921_v2 = vld [vmem:[#allocation5 + $0x144] sm:$0xf]  ;;  %v2700_v4 = vor.u32 %v3891_v60, %v2699_v59 }
  0x2e   :  { %540 = vmatpush.bf16.msra.mxu1 %v2860_v45  ;;  %v2829_v3 = vld [vmem:[#allocation5 + $0x150] sm:$0xf0]  ;;  %v2683_v5 = vld [vmem:[#allocation5 + $0x20] sm:$0xf]  ;;  %v3887_v6 = vld [vmem:[#allocation5 + $0x2c] sm:$0xf0]  ;;  %v2828_v7 = vor.u32 %v3923_v63, %v2827_v61  ;;  %v2704_v8 = vor.u32 %v3889_v0, %v2701_v1 }
  0x2f   :  { %554 = vmatpush.bf16.msra.mxu2 %v2736_v46  ;;  %v2811_v9 = vld [vmem:[#allocation5 + $0x120] sm:$0xf]  ;;  %v3919_v10 = vld [vmem:[#allocation5 + $0x12c] sm:$0xf0]  ;;  %v3885_v11 = vld [vmem:[#allocation5 + $0x24] sm:$0xf]  ;;  %v2832_v12 = vor.u32 %v3921_v2, %v2829_v3  ;;  %v2684_v18 = vor.u32 %v3887_v6, %v2683_v5 }
  0x30   :  { %568 = vmatpush.bf16.msra.mxu3 %v2864_v50  ;;  %v2685_v13 = vld [vmem:[#allocation5 + $0x30] sm:$0xf0]  ;;  %v3917_v14 = vld [vmem:[#allocation5 + $0x124] sm:$0xf]  ;;  %v2667_v16 = vld [vmem:[#allocation5] sm:$0xf]  ;;  %v2812_v22 = vor.u32 %v3919_v10, %v2811_v9 }
  0x31   :  { %527 = vmatpush.bf16.msra.mxu0 %v2716_v56  ;;  %v2813_v15 = vld [vmem:[#allocation5 + $0x130] sm:$0xf0]  ;;  %v3883_v17 = vld [vmem:[#allocation5 + $0xc] sm:$0xf0]  ;;  %v2795_v19 = vld [vmem:[#allocation5 + $0x100] sm:$0xf]  ;;  %v2688_v23 = vor.u32 %v3885_v11, %v2685_v13 }
  0x32   :  { %541 = vmatpush.bf16.msra.mxu1 %v2844_v57  ;;  %v3915_v20 = vld [vmem:[#allocation5 + $0x10c] sm:$0xf0]  ;;  %v3881_v21 = vld [vmem:[#allocation5 + $0x4] sm:$0xf]  ;;  %v2816_v24 = vor.u32 %v3917_v14, %v2813_v15  ;;  %v2669_v25 = vld [vmem:[#allocation5 + $0x10] sm:$0xf0]  ;;  %v2668_v38 = vor.u32 %v3883_v17, %v2667_v16 }
  0x33   :  { %555 = vmatpush.bf16.msra.mxu2 %v2720_v58  ;;  %v117_v26 = vld [vmem:[#allocation2] sm:$0xff]  ;;  %v118_v27 = vld [vmem:[#allocation2 + $0x8] sm:$0xff]  ;;  %v3913_v28 = vld [vmem:[#allocation5 + $0x104] sm:$0xf]  ;;  %v2796_v43 = vor.u32 %v3915_v20, %v2795_v19  ;;  %v2672_v44 = vor.u32 %v3881_v21, %v2669_v25  ;;  %s4398_s12 = smov [#allocation13]  }
  0x34   :  { %569 = vmatpush.bf16.msra.mxu3 %v2848_v62  ;;  %v2797_v29 = vld [vmem:[#allocation5 + $0x110] sm:$0xf0]  ;;  %v2787_v30 = vld [vmem:[#allocation5 + $0xe8] sm:$0xf]  ;;  %v119_v31 = vunpack.c.l.bf16 %v117_v26  ;;  %v121_v32 = vunpack.c.l.bf16 %v118_v27  ;;  %v120_v33 = vunpack.c.h.bf16 %v117_v26  ;;  %v122_v34 = vunpack.c.h.bf16 %v118_v27  ;;  %v3912_v35 = vld [vmem:[#allocation5 + $0xf4] sm:$0xf0] }
  0x35   :  { %528 = vmatpush.bf16.msra.mxu0 %v2700_v4  ;;  %v2915_v36 = vld [vmem:[#allocation5 + $0x1e8] sm:$0xf]  ;;  %v3944_v37 = vld [vmem:[#allocation5 + $0x1f4] sm:$0xf0]  ;;  %v3910_v39 = vld [vmem:[#allocation5 + $0xec] sm:$0xf]  ;;  %v2800_v49 = vor.u32 %v3913_v28, %v2797_v29  ;;  %v2788_v50 = vor.u32 %v3912_v35, %v2787_v30 }
  0x36   :  { %542 = vmatpush.bf16.msra.mxu1 %v2828_v7  ;;  %v2789_v40 = vld [vmem:[#allocation5 + $0xf8] sm:$0xf0]  ;;  %v123_v41 = vmax.f32 %v119_v31, 0.0  ;;  %v125_v42 = vmax.f32 %v121_v32, 0.0  ;;  %v3942_v45 = vld [vmem:[#allocation5 + $0x1ec] sm:$0xf]  ;;  %v2916_v51 = vor.u32 %v3944_v37, %v2915_v36 }
  0x37   :  { %556 = vmatpush.bf16.msra.mxu2 %v2704_v8  ;;  %v2917_v46 = vld [vmem:[#allocation5 + $0x1f8] sm:$0xf0]  ;;  %v124_v47 = vmax.f32 %v120_v33, 0.0  ;;  %v126_v48 = vmax.f32 %v122_v34, 0.0  ;;  %v2792_v52 = vor.u32 %v3910_v39, %v2789_v40  ;;  %v2771_v53 = vld [vmem:[#allocation5 + $0xc8] sm:$0xf] }
  0x38   :  { %570 = vmatpush.bf16.msra.mxu3 %v2832_v12  ;;  %v3908_v54 = vld [vmem:[#allocation5 + $0xd4] sm:$0xf0]  ;;  %v2899_v55 = vld [vmem:[#allocation5 + $0x1c8] sm:$0xf]  ;;  %v2920_v56 = vor.u32 %v3942_v45, %v2917_v46  ;;  %v4460_v57 = vpack.c.bf16 %v125_v42, %v123_v41  ;;  %v3906_v59 = vld [vmem:[#allocation5 + $0xcc] sm:$0xf] }
  0x39   :  { %529 = vmatpush.bf16.msra.mxu0 %v2684_v18  ;;  %v3940_v58 = vld [vmem:[#allocation5 + $0x1d4] sm:$0xf0]  ;;  %v2773_v60 = vld [vmem:[#allocation5 + $0xd8] sm:$0xf0]  ;;  %v4462_v61 = vpack.c.bf16 %v126_v48, %v124_v47  ;;  %v3938_v62 = vld [vmem:[#allocation5 + $0x1cc] sm:$0xf]  ;;  %v2772_v0 = vor.u32 %v3908_v54, %v2771_v53 }
  0x3a   :  { %543 = vmatpush.bf16.msra.mxu1 %v2812_v22  ;;  %v2901_v63 = vld [vmem:[#allocation5 + $0x1d8] sm:$0xf0]  ;;  %v2900_v1 = vor.u32 %v3940_v58, %v2899_v55  ;;  %v2776_v2 = vor.u32 %v3906_v59, %v2773_v60  ;;  %v2755_v3 = vld [vmem:[#allocation5 + $0xa8] sm:$0xf]  ;;  %v3904_v4 = vld [vmem:[#allocation5 + $0xb4] sm:$0xf0] }
  0x3b   :  { %557 = vmatpush.bf16.msra.mxu2 %v2688_v23  ;;  %v2883_v5 = vld [vmem:[#allocation5 + $0x1a8] sm:$0xf]  ;;  %v2904_v6 = vor.u32 %v3938_v62, %v2901_v63  ;;  %v3936_v7 = vld [vmem:[#allocation5 + $0x1b4] sm:$0xf0]  ;;  %v3902_v8 = vld [vmem:[#allocation5 + $0xac] sm:$0xf]  ;;  %v2756_v12 = vor.u32 %v3904_v4, %v2755_v3 }
  0x3c   :  { %571 = vmatpush.bf16.msra.mxu3 %v2816_v24  ;;  %v2757_v9 = vld [vmem:[#allocation5 + $0xb8] sm:$0xf0]  ;;  %v3934_v10 = vld [vmem:[#allocation5 + $0x1ac] sm:$0xf]  ;;  %v2884_v13 = vor.u32 %v3936_v7, %v2883_v5  ;;  %v2739_v15 = vld [vmem:[#allocation5 + $0x88] sm:$0xf] }
  0x3d   :  { %530 = vmatpush.bf16.msra.mxu0 %v2668_v38  ;;  %v2885_v11 = vld [vmem:[#allocation5 + $0x1b8] sm:$0xf0]  ;;  %v2760_v14 = vor.u32 %v3902_v8, %v2757_v9  ;;  %v3900_v16 = vld [vmem:[#allocation5 + $0x94] sm:$0xf0]  ;;  %v2867_v17 = vld [vmem:[#allocation5 + $0x188] sm:$0xf] }
  0x3e   :  { %544 = vmatpush.bf16.msra.mxu1 %v2796_v43  ;;  %v2888_v18 = vor.u32 %v3934_v10, %v2885_v11  ;;  %v3932_v19 = vld [vmem:[#allocation5 + $0x194] sm:$0xf0]  ;;  %v3898_v20 = vld [vmem:[#allocation5 + $0x8c] sm:$0xf]  ;;  %v2741_v21 = vld [vmem:[#allocation5 + $0x98] sm:$0xf0]  ;;  %v2740_v24 = vor.u32 %v3900_v16, %v2739_v15 }
  0x3f   :  { %558 = vmatpush.bf16.msra.mxu2 %v2672_v44  ;;  %v3930_v22 = vld [vmem:[#allocation5 + $0x18c] sm:$0xf]  ;;  %v2869_v23 = vld [vmem:[#allocation5 + $0x198] sm:$0xf0]  ;;  %v2868_v25 = vor.u32 %v3932_v19, %v2867_v17  ;;  %v2744_v26 = vor.u32 %v3898_v20, %v2741_v21  ;;  %v2723_v27 = vld [vmem:[#allocation5 + $0x68] sm:$0xf] }
  0x40   :  { %572 = vmatpush.bf16.msra.mxu3 %v2800_v49  ;;  %531 = vmatmul.bf16.vlgmr.msra.gmra.mxu0 %v4460_v57  ;;  %v3896_v28 = vld [vmem:[#allocation5 + $0x74] sm:$0xf0]  ;;  %v2851_v29 = vld [vmem:[#allocation5 + $0x168] sm:$0xf]  ;;  %v2872_v30 = vor.u32 %v3930_v22, %v2869_v23  ;;  %v3894_v32 = vld [vmem:[#allocation5 + $0x6c] sm:$0xf] }
  0x41   :  { %579 = vmatpush.bf16.msrb.mxu0 %v2788_v50  ;;  %545 = vmatmul.bf16.vlgmr.msra.gmra.mxu1 %v4462_v61  ;;  %v3928_v31 = vld [vmem:[#allocation5 + $0x174] sm:$0xf0]  ;;  %v2725_v33 = vld [vmem:[#allocation5 + $0x78] sm:$0xf0]  ;;  %v3926_v34 = vld [vmem:[#allocation5 + $0x16c] sm:$0xf]  ;;  %v2724_v36 = vor.u32 %v3896_v28, %v2723_v27 }
  0x42   :  { %593 = vmatpush.bf16.msrb.mxu1 %v2916_v51  ;;  %559 = vmatmul.bf16.vlgmr.msra.gmra.mxu2 %v4460_v57  ;;  %v2853_v35 = vld [vmem:[#allocation5 + $0x178] sm:$0xf0]  ;;  %v2852_v37 = vor.u32 %v3928_v31, %v2851_v29  ;;  %v2728_v38 = vor.u32 %v3894_v32, %v2725_v33  ;;  %v2707_v39 = vld [vmem:[#allocation5 + $0x48] sm:$0xf]  ;;  %v3892_v40 = vld [vmem:[#allocation5 + $0x54] sm:$0xf0] }
  0x43   :  { %607 = vmatpush.bf16.msrb.mxu2 %v2792_v52  ;;  %573 = vmatmul.bf16.vlgmr.msra.gmra.mxu3 %v4462_v61  ;;  %v2835_v41 = vld [vmem:[#allocation5 + $0x148] sm:$0xf]  ;;  %v2856_v42 = vor.u32 %v3926_v34, %v2853_v35  ;;  %v3924_v43 = vld [vmem:[#allocation5 + $0x154] sm:$0xf0]  ;;  %v3890_v44 = vld [vmem:[#allocation5 + $0x4c] sm:$0xf]  ;;  %v2708_v48 = vor.u32 %v3892_v40, %v2707_v39 }
  0x44   :  { %621 = vmatpush.bf16.msrb.mxu3 %v2920_v56  ;;  %v2709_v45 = vld [vmem:[#allocation5 + $0x58] sm:$0xf0]  ;;  %v3922_v46 = vld [vmem:[#allocation5 + $0x14c] sm:$0xf]  ;;  %v2691_v49 = vld [vmem:[#allocation5 + $0x28] sm:$0xf]  ;;  %v2836_v50 = vor.u32 %v3924_v43, %v2835_v41 }
  0x45   :  { %580 = vmatpush.bf16.msrb.mxu0 %v2772_v0  ;;  %v2837_v47 = vld [vmem:[#allocation5 + $0x158] sm:$0xf0]  ;;  %v2712_v51 = vor.u32 %v3890_v44, %v2709_v45  ;;  %v3888_v52 = vld [vmem:[#allocation5 + $0x34] sm:$0xf0]  ;;  %v2819_v53 = vld [vmem:[#allocation5 + $0x128] sm:$0xf] }
  0x46   :  { %594 = vmatpush.bf16.msrb.mxu1 %v2900_v1  ;;  %v2840_v54 = vor.u32 %v3922_v46, %v2837_v47  ;;  %v3920_v55 = vld [vmem:[#allocation5 + $0x134] sm:$0xf0]  ;;  %v3886_v56 = vld [vmem:[#allocation5 + $0x2c] sm:$0xf]  ;;  %v2693_v58 = vld [vmem:[#allocation5 + $0x38] sm:$0xf0]  ;;  %v2692_v62 = vor.u32 %v3888_v52, %v2691_v49 }
  0x47   :  { %608 = vmatpush.bf16.msrb.mxu2 %v2776_v2  ;;  %v3918_v59 = vld [vmem:[#allocation5 + $0x12c] sm:$0xf]  ;;  %v2821_v60 = vld [vmem:[#allocation5 + $0x138] sm:$0xf0]  ;;  %v2675_v63 = vld [vmem:[#allocation5 + $0x8] sm:$0xf]  ;;  %v2820_v0 = vor.u32 %v3920_v55, %v2819_v53  ;;  %v2696_v1 = vor.u32 %v3886_v56, %v2693_v58 }
  0x48   :  { %622 = vmatpush.bf16.msrb.mxu3 %v2904_v6  ;;  %v3884_v2 = vld [vmem:[#allocation5 + $0x14] sm:$0xf0]  ;;  %v2803_v3 = vld [vmem:[#allocation5 + $0x108] sm:$0xf]  ;;  %v2824_v5 = vor.u32 %v3918_v59, %v2821_v60  ;;  %v3882_v6 = vld [vmem:[#allocation5 + $0xc] sm:$0xf] }
  0x49   :  { %581 = vmatpush.bf16.msrb.mxu0 %v2756_v12  ;;  %v3916_v4 = vld [vmem:[#allocation5 + $0x114] sm:$0xf0]  ;;  %v2677_v7 = vld [vmem:[#allocation5 + $0x18] sm:$0xf0]  ;;  %v3914_v8 = vld [vmem:[#allocation5 + $0x10c] sm:$0xf]  ;;  %v2676_v12 = vor.u32 %v3884_v2, %v2675_v63 }
  0x4a   :  { %595 = vmatpush.bf16.msrb.mxu1 %v2884_v13  ;;  %v2805_v9 = vld [vmem:[#allocation5 + $0x118] sm:$0xf0]  ;;  %v3091_v10 = vld [vmem:[#allocation8 + $0x150] sm:$0xf]  ;;  %v3990_v11 = vld [vmem:[#allocation8 + $0x164] sm:$0xf0]  ;;  %v2804_v15 = vor.u32 %v3916_v4, %v2803_v3  ;;  %v2680_v16 = vor.u32 %v3882_v6, %v2677_v7 }
  0x4b   :  { %609 = vmatpush.bf16.msrb.mxu2 %v2760_v14  ;;  %v3283_v13 = vld [vmem:[#allocation8 + $0x2d0] sm:$0xf]  ;;  %v4038_v14 = vld [vmem:[#allocation8 + $0x2e4] sm:$0xf0]  ;;  %v2808_v17 = vor.u32 %v3914_v8, %v2805_v9  ;;  %v3067_v21 = vld [vmem:[#allocation8 + $0x120] sm:$0xf] }
  0x4c   :  { %623 = vmatpush.bf16.msrb.mxu3 %v2888_v18  ;;  %v3092_v18 = vor.u32 %v3990_v11, %v3091_v10  ;;  %v3475_v19 = vld [vmem:[#allocation8 + $0x450] sm:$0xf]  ;;  %v4086_v20 = vld [vmem:[#allocation8 + $0x464] sm:$0xf0]  ;;  %v3984_v22 = vld [vmem:[#allocation8 + $0x134] sm:$0xf0]  ;;  %v3284_v23 = vor.u32 %v4038_v14, %v3283_v13 }
  0x4d   :  { %582 = vmatpush.bf16.msrb.mxu0 %v2740_v24  ;;  %v3259_v24 = vld [vmem:[#allocation8 + $0x2a0] sm:$0xf]  ;;  %v3068_v27 = vor.u32 %v3984_v22, %v3067_v21  ;;  %v4080_v29 = vld [vmem:[#allocation8 + $0x434] sm:$0xf0]  ;;  %v3978_v31 = vld [vmem:[#allocation8 + $0x104] sm:$0xf0] }
  0x4e   :  { %596 = vmatpush.bf16.msrb.mxu1 %v2868_v25  ;;  %v4032_v25 = vld [vmem:[#allocation8 + $0x2b4] sm:$0xf0]  ;;  %v3451_v28 = vld [vmem:[#allocation8 + $0x420] sm:$0xf]  ;;  %v3667_v33 = vld [vmem:[#allocation8 + $0x5d0] sm:$0xf] }
  0x4f   :  { %610 = vmatpush.bf16.msrb.mxu2 %v2744_v26  ;;  %v3476_v26 = vor.u32 %v4086_v20, %v3475_v19  ;;  %v3260_v32 = vor.u32 %v4032_v25, %v3259_v24  ;;  %v3235_v34 = vld [vmem:[#allocation8 + $0x270] sm:$0xf]  ;;  %v4026_v35 = vld [vmem:[#allocation8 + $0x284] sm:$0xf0]  ;;  %v3019_v40 = vld [vmem:[#allocation8 + $0xc0] sm:$0xf] }
  0x50   :  { %624 = vmatpush.bf16.msrb.mxu3 %v2872_v30  ;;  %v3043_v30 = vld [vmem:[#allocation8 + $0xf0] sm:$0xf]  ;;  %v3972_v43 = vld [vmem:[#allocation8 + $0xd4] sm:$0xf0]  ;;  %v3236_v44 = vor.u32 %v4026_v35, %v3235_v34  ;;  %v3643_v45 = vld [vmem:[#allocation8 + $0x5a0] sm:$0xf] }
  0x51   :  { %583 = vmatpush.bf16.msrb.mxu0 %v2724_v36  ;;  %v4134_v36 = vld [vmem:[#allocation8 + $0x5e4] sm:$0xf0]  ;;  %v3044_v39 = vor.u32 %v3978_v31, %v3043_v30  ;;  %v3427_v41 = vld [vmem:[#allocation8 + $0x3f0] sm:$0xf]  ;;  %v4128_v46 = vld [vmem:[#allocation8 + $0x5b4] sm:$0xf0] }
  0x52   :  { %597 = vmatpush.bf16.msrb.mxu1 %v2852_v37  ;;  %v3452_v37 = vor.u32 %v4080_v29, %v3451_v28  ;;  %v4020_v47 = vld [vmem:[#allocation8 + $0x254] sm:$0xf0]  ;;  %v3187_v53 = vld [vmem:[#allocation8 + $0x210] sm:$0xf]  ;;  %v2971_v56 = vld [vmem:[#allocation8 + $0x60] sm:$0xf] }
  0x53   :  { %611 = vmatpush.bf16.msrb.mxu2 %v2728_v38  ;;  %v3668_v38 = vor.u32 %v4134_v36, %v3667_v33  ;;  %v3960_v58 = vld [vmem:[#allocation8 + $0x74] sm:$0xf0]  ;;  %v3163_v60 = vld [vmem:[#allocation8 + $0x1e0] sm:$0xf]  ;;  %v3139_v3 = vld [vmem:[#allocation8 + $0x1b0] sm:$0xf] }
  0x54   :  { %625 = vmatpush.bf16.msrb.mxu3 %v2856_v42  ;;  %v4074_v42 = vld [vmem:[#allocation8 + $0x404] sm:$0xf0]  ;;  %v2972_v63 = vor.u32 %v3960_v58, %v2971_v56  ;;  %v2923_v6 = vld [vmem:[#allocation8] sm:$0xf]  ;;  %v3948_v7 = vld [vmem:[#allocation8 + $0x14] sm:$0xf0] }
  0x55   :  { %584 = vmatpush.bf16.msrb.mxu0 %v2708_v48  ;;  %v3644_v48 = vor.u32 %v4128_v46, %v3643_v45  ;;  %v3428_v49 = vor.u32 %v4074_v42, %v3427_v41  ;;  %v4002_v4 = vld [vmem:[#allocation8 + $0x1c4] sm:$0xf0]  ;;  %v3987_v8 = vld [vmem:[#allocation8 + $0x154] sm:$0xf]  ;;  %v3093_v10 = vld [vmem:[#allocation8 + $0x168] sm:$0xf0] }
  0x56   :  { %598 = vmatpush.bf16.msrb.mxu1 %v2836_v50  ;;  %v2995_v50 = vld [vmem:[#allocation8 + $0x90] sm:$0xf]  ;;  %v3140_v9 = vor.u32 %v4002_v4, %v3139_v3  ;;  %v3115_v11 = vld [vmem:[#allocation8 + $0x180] sm:$0xf]  ;;  %v4035_v13 = vld [vmem:[#allocation8 + $0x2d4] sm:$0xf] }
  0x57   :  { %612 = vmatpush.bf16.msrb.mxu2 %v2712_v51  ;;  %v3966_v51 = vld [vmem:[#allocation8 + $0xa4] sm:$0xf0]  ;;  %v3285_v14 = vld [vmem:[#allocation8 + $0x2e8] sm:$0xf0]  ;;  %v3069_v19 = vld [vmem:[#allocation8 + $0x138] sm:$0xf0] }
  0x58   :  { %626 = vmatpush.bf16.msrb.mxu3 %v2840_v54  ;;  %v4014_v54 = vld [vmem:[#allocation8 + $0x224] sm:$0xf0]  ;;  %v2996_v55 = vor.u32 %v3966_v51, %v2995_v50  ;;  %v3288_v20 = vor.u32 %v4035_v13, %v3285_v14  ;;  %v4029_v21 = vld [vmem:[#allocation8 + $0x2a4] sm:$0xf]  ;;  %v3261_v22 = vld [vmem:[#allocation8 + $0x2b8] sm:$0xf0] }
  0x59   :  { %585 = vmatpush.bf16.msrb.mxu0 %v2692_v62  ;;  %v3188_v59 = vor.u32 %v4014_v54, %v3187_v53  ;;  %v4008_v62 = vld [vmem:[#allocation8 + $0x1f4] sm:$0xf0]  ;;  %v3975_v24 = vld [vmem:[#allocation8 + $0xf4] sm:$0xf]  ;;  %v3045_v25 = vld [vmem:[#allocation8 + $0x108] sm:$0xf0] }
  0x5a   :  { %599 = vmatpush.bf16.msrb.mxu1 %v2820_v0  ;;  %v2947_v0 = vld [vmem:[#allocation8 + $0x30] sm:$0xf]  ;;  %v3164_v2 = vor.u32 %v4008_v62, %v3163_v60  ;;  %v3403_v28 = vld [vmem:[#allocation8 + $0x3c0] sm:$0xf]  ;;  %v4068_v29 = vld [vmem:[#allocation8 + $0x3d4] sm:$0xf0] }
  0x5b   :  { %613 = vmatpush.bf16.msrb.mxu2 %v2696_v1  ;;  %v3954_v1 = vld [vmem:[#allocation8 + $0x44] sm:$0xf0]  ;;  %v3969_v30 = vld [vmem:[#allocation8 + $0xc4] sm:$0xf]  ;;  %v3404_v31 = vor.u32 %v4068_v29, %v3403_v28  ;;  %v3619_v34 = vld [vmem:[#allocation8 + $0x570] sm:$0xf] }
  0x5c   :  { %627 = vmatpush.bf16.msrb.mxu3 %v2824_v5  ;;  %v2948_v5 = vor.u32 %v3954_v1, %v2947_v0  ;;  %v4122_v35 = vld [vmem:[#allocation8 + $0x584] sm:$0xf0]  ;;  %v4023_v36 = vld [vmem:[#allocation8 + $0x274] sm:$0xf]  ;;  %v3595_v46 = vld [vmem:[#allocation8 + $0x540] sm:$0xf] }
  0x5d   :  { %586 = vmatpush.bf16.msrb.mxu0 %v2676_v12  ;;  %v3996_v12 = vld [vmem:[#allocation8 + $0x194] sm:$0xf0]  ;;  %v4062_v41 = vld [vmem:[#allocation8 + $0x3a4] sm:$0xf0]  ;;  %v3963_v42 = vld [vmem:[#allocation8 + $0x94] sm:$0xf] }
  0x5e   :  { %600 = vmatpush.bf16.msrb.mxu1 %v2804_v15  ;;  %v2924_v15 = vor.u32 %v3948_v7, %v2923_v6  ;;  %v3355_v50 = vld [vmem:[#allocation8 + $0x360] sm:$0xf]  ;;  %v4056_v51 = vld [vmem:[#allocation8 + $0x374] sm:$0xf0]  ;;  %v2973_v54 = vld [vmem:[#allocation8 + $0x78] sm:$0xf0] }
  0x5f   :  { %614 = vmatpush.bf16.msrb.mxu2 %v2680_v16  ;;  %v3096_v16 = vor.u32 %v3987_v8, %v3093_v10  ;;  %v3356_v53 = vor.u32 %v4056_v51, %v3355_v50  ;;  %v3571_v56 = vld [vmem:[#allocation8 + $0x510] sm:$0xf]  ;;  %v4110_v58 = vld [vmem:[#allocation8 + $0x524] sm:$0xf0]  ;;  %v3189_v62 = vld [vmem:[#allocation8 + $0x228] sm:$0xf0] }
  0x60   :  { %628 = vmatpush.bf16.msrb.mxu3 %v2808_v17  ;;  %587 = vmatmul.bf16.vlgmr.msrb.gmra.mxu0 %v4460_v57  ;;  %v3116_v17 = vor.u32 %v3996_v12, %v3115_v11  ;;  %v3572_v60 = vor.u32 %v4110_v58, %v3571_v56  ;;  %v3331_v0 = vld [vmem:[#allocation8 + $0x330] sm:$0xf]  ;;  %v4050_v1 = vld [vmem:[#allocation8 + $0x344] sm:$0xf0]  ;;  %v2949_v4 = vld [vmem:[#allocation8 + $0x48] sm:$0xf0] }
  0x61   :  { %1813 = vmatpush.bf16.msra.mxu0 %v3092_v18  ;;  %601 = vmatmul.bf16.vlgmr.msrb.gmra.mxu1 %v4462_v61  ;;  %v3981_v18 = vld [vmem:[#allocation8 + $0x124] sm:$0xf]  ;;  %v3332_v3 = vor.u32 %v4050_v1, %v3331_v0  ;;  %v3547_v6 = vld [vmem:[#allocation8 + $0x4e0] sm:$0xf]  ;;  %v4104_v7 = vld [vmem:[#allocation8 + $0x4f4] sm:$0xf0] }
  0x62   :  { %1827 = vmatpush.bf16.msra.mxu1 %v3284_v23  ;;  %615 = vmatmul.bf16.vlgmr.msrb.gmra.mxu2 %v4460_v57  ;;  %v3211_v57 = vld [vmem:[#allocation8 + $0x240] sm:$0xf]  ;;  %v3072_v23 = vor.u32 %v3981_v18, %v3069_v19  ;;  %v4005_v8 = vld [vmem:[#allocation8 + $0x1e4] sm:$0xf]  ;;  %v3165_v10 = vld [vmem:[#allocation8 + $0x1f8] sm:$0xf0] }
  0x63   :  { %629 = vmatmul.bf16.vlgmr.msrb.gmra.mxu3 %v4462_v61  ;;  %1841 = vmatpush.bf16.msra.mxu2 %v3476_v26  ;;  %v3020_v61 = vor.u32 %v3972_v43, %v3019_v40  ;;  %v3212_v52 = vor.u32 %v4020_v47, %v3211_v57  ;;  %v3264_v26 = vor.u32 %v4029_v21, %v3261_v22  ;;  %v3379_v40 = vld [vmem:[#allocation8 + $0x390] sm:$0xf]  ;;  %v4116_v57 = vld [vmem:[#allocation8 + $0x554] sm:$0xf0]  ;;  %v3307_v12 = vld [vmem:[#allocation8 + $0x300] sm:$0xf] }
  0x64   :  { %1855 = vmatpush.bf16.msra.mxu3 %v3668_v38  ;;  %v3237_v38 = vld [vmem:[#allocation8 + $0x288] sm:$0xf0]  ;;  %v3380_v43 = vor.u32 %v4062_v41, %v3379_v40  ;;  %v3596_v47 = vor.u32 %v4116_v57, %v3595_v46  ;;  %v3168_v11 = vor.u32 %v4005_v8, %v3165_v10  ;;  %v4044_v13 = vld [vmem:[#allocation8 + $0x314] sm:$0xf0]  ;;  %v3945_v14 = vld [vmem:[#allocation8 + $0x4] sm:$0xf] }
  0x65   :  { %1814 = vmatpush.bf16.msra.mxu0 %v3068_v27  ;;  %v3048_v27 = vor.u32 %v3975_v24, %v3045_v25  ;;  %v3477_v18 = vld [vmem:[#allocation8 + $0x468] sm:$0xf0]  ;;  %v3523_v21 = vld [vmem:[#allocation8 + $0x4b0] sm:$0xf]  ;;  %v4098_v22 = vld [vmem:[#allocation8 + $0x4c4] sm:$0xf0] }
  0x66   :  { %1828 = vmatpush.bf16.msra.mxu1 %v3260_v32  ;;  %v3021_v32 = vld [vmem:[#allocation8 + $0xd8] sm:$0xf0]  ;;  %v3141_v24 = vld [vmem:[#allocation8 + $0x1c8] sm:$0xf0]  ;;  %v3524_v25 = vor.u32 %v4098_v22, %v3523_v21  ;;  %v4065_v46 = vld [vmem:[#allocation8 + $0x3c4] sm:$0xf] }
  0x67   :  { %1842 = vmatpush.bf16.msra.mxu2 %v3452_v37  ;;  %v3024_v33 = vor.u32 %v3969_v30, %v3021_v32  ;;  %v3620_v37 = vor.u32 %v4122_v35, %v3619_v34  ;;  %v3453_v28 = vld [vmem:[#allocation8 + $0x438] sm:$0xf0]  ;;  %v3499_v30 = vld [vmem:[#allocation8 + $0x480] sm:$0xf]  ;;  %v4131_v35 = vld [vmem:[#allocation8 + $0x5d4] sm:$0xf] }
  0x68   :  { %1856 = vmatpush.bf16.msra.mxu3 %v3644_v48  ;;  %v4017_v48 = vld [vmem:[#allocation8 + $0x244] sm:$0xf]  ;;  %v3117_v34 = vld [vmem:[#allocation8 + $0x198] sm:$0xf0]  ;;  %v3429_v40 = vld [vmem:[#allocation8 + $0x408] sm:$0xf0] }
  0x69   :  { %1815 = vmatpush.bf16.msra.mxu0 %v3044_v39  ;;  %v3240_v39 = vor.u32 %v4023_v36, %v3237_v38  ;;  %v3405_v57 = vld [vmem:[#allocation8 + $0x3d8] sm:$0xf0]  ;;  %v4113_v56 = vld [vmem:[#allocation8 + $0x544] sm:$0xf]  ;;  %v3333_v10 = vld [vmem:[#allocation8 + $0x348] sm:$0xf0] }
  0x6a   :  { %1829 = vmatpush.bf16.msra.mxu1 %v3236_v44  ;;  %v2997_v44 = vld [vmem:[#allocation8 + $0xa8] sm:$0xf0]  ;;  %v3597_v58 = vld [vmem:[#allocation8 + $0x558] sm:$0xf0]  ;;  %v4041_v22 = vld [vmem:[#allocation8 + $0x304] sm:$0xf] }
  0x6b   :  { %1843 = vmatpush.bf16.msra.mxu2 %v3428_v49  ;;  %v3000_v45 = vor.u32 %v3963_v42, %v2997_v44  ;;  %v3213_v49 = vld [vmem:[#allocation8 + $0x258] sm:$0xf0]  ;;  %v4125_v42 = vld [vmem:[#allocation8 + $0x5a4] sm:$0xf]  ;;  %s2647_s13 = sshll.u32 %s4398_s12, 4  ;;  %s2648_s13 = int_to_ptr.vmem [resolvable:$true] %s2647_s13 }
  0x6c   :  { %1857 = vmatpush.bf16.msra.mxu3 %v3620_v37  ;;  %v3669_v37 = vld [vmem:[#allocation8 + $0x5e8] sm:$0xf0] }
  0x6d   :  { %1816 = vmatpush.bf16.msra.mxu0 %v3020_v61  ;;  %v3216_v61 = vor.u32 %v4017_v48, %v3213_v49  ;;  %v3672_v38 = vor.u32 %v4131_v35, %v3669_v37  ;;  %v4119_v48 = vld [vmem:[#allocation8 + $0x574] sm:$0xf]  ;;  %v3621_v49 = vld [vmem:[#allocation8 + $0x588] sm:$0xf0]  ;;  %v3291_v37 = vld [vmem:[#allocation8 + $0x2d8] sm:$0xf] }
  0x6e   :  { %1830 = vmatpush.bf16.msra.mxu1 %v3212_v52  ;;  %v3957_v52 = vld [vmem:[#allocation8 + $0x64] sm:$0xf]  ;;  %v3624_v50 = vor.u32 %v4119_v48, %v3621_v49 }
  0x6f   :  { %1844 = vmatpush.bf16.msra.mxu2 %v3404_v31  ;;  %v4092_v31 = vld [vmem:[#allocation8 + $0x494] sm:$0xf0] }
  0x70   :  { %1858 = vmatpush.bf16.msra.mxu3 %v3596_v47  ;;  %v3500_v32 = vor.u32 %v4092_v31, %v3499_v30  ;;  %v3408_v47 = vor.u32 %v4065_v46, %v3405_v57  ;;  %v3985_v31 = vld [vmem:[#allocation8 + $0x13c] sm:$0xf0]  ;;  %v3979_v46 = vld [vmem:[#allocation8 + $0x10c] sm:$0xf0] }
  0x71   :  { %1817 = vmatpush.bf16.msra.mxu0 %v2996_v55  ;;  %v2976_v55 = vor.u32 %v3957_v52, %v2973_v54  ;;  %v4059_v52 = vld [vmem:[#allocation8 + $0x394] sm:$0xf] }
  0x72   :  { %1831 = vmatpush.bf16.msra.mxu1 %v3188_v59  ;;  %v4011_v59 = vld [vmem:[#allocation8 + $0x214] sm:$0xf] }
  0x73   :  { %1845 = vmatpush.bf16.msra.mxu2 %v3380_v43  ;;  %v3645_v43 = vld [vmem:[#allocation8 + $0x5b8] sm:$0xf0] }
  0x74   :  { %1859 = vmatpush.bf16.msra.mxu3 %v3572_v60  ;;  %v3648_v44 = vor.u32 %v4125_v42, %v3645_v43  ;;  %v3600_v60 = vor.u32 %v4113_v56, %v3597_v58  ;;  %v4089_v42 = vld [vmem:[#allocation8 + $0x484] sm:$0xf]  ;;  %v3501_v43 = vld [vmem:[#allocation8 + $0x498] sm:$0xf0]  ;;  %v3243_v56 = vld [vmem:[#allocation8 + $0x278] sm:$0xf] }
  0x75   :  { %1818 = vmatpush.bf16.msra.mxu0 %v2972_v63  ;;  %v3192_v63 = vor.u32 %v4011_v59, %v3189_v62  ;;  %v4053_v62 = vld [vmem:[#allocation8 + $0x364] sm:$0xf]  ;;  %v3504_v57 = vor.u32 %v4089_v42, %v3501_v43  ;;  %v4027_v58 = vld [vmem:[#allocation8 + $0x28c] sm:$0xf0] }
  0x76   :  { %1832 = vmatpush.bf16.msra.mxu1 %v3164_v2  ;;  %v3951_v2 = vld [vmem:[#allocation8 + $0x34] sm:$0xf] }
  0x77   :  { %1846 = vmatpush.bf16.msra.mxu2 %v3356_v53  ;;  %v3381_v53 = vld [vmem:[#allocation8 + $0x3a8] sm:$0xf0] }
  0x79   :  { %1819 = vmatpush.bf16.msra.mxu0 %v2948_v5  ;;  %v2952_v5 = vor.u32 %v3951_v2, %v2949_v4  ;;  %v4107_v2 = vld [vmem:[#allocation8 + $0x514] sm:$0xf] }
  0x7a   :  { %1833 = vmatpush.bf16.msra.mxu1 %v3140_v9  ;;  %v3548_v9 = vor.u32 %v4104_v7, %v3547_v6 }
  0x7b   :  { %1847 = vmatpush.bf16.msra.mxu2 %v3332_v3  ;;  %v3573_v3 = vld [vmem:[#allocation8 + $0x528] sm:$0xf0] }
  0x7c   :  { %1860 = vmatpush.bf16.msra.mxu3 %v3548_v9  ;;  %v3576_v6 = vor.u32 %v4107_v2, %v3573_v3  ;;  %v4047_v9 = vld [vmem:[#allocation8 + $0x334] sm:$0xf]  ;;  %v3219_v3 = vld [vmem:[#allocation8 + $0x248] sm:$0xf] }
  0x7d   :  { %1820 = vmatpush.bf16.msra.mxu0 %v2924_v15  ;;  %v3308_v15 = vor.u32 %v4044_v13, %v3307_v12  ;;  %v3336_v13 = vor.u32 %v4047_v9, %v3333_v10  ;;  %v3195_v10 = vld [vmem:[#allocation8 + $0x218] sm:$0xf] }
  0x7e   :  { %1834 = vmatpush.bf16.msra.mxu1 %v3116_v17  ;;  %v4083_v17 = vld [vmem:[#allocation8 + $0x454] sm:$0xf] }
  0x7f   :  { %1848 = vmatpush.bf16.msra.mxu2 %v3308_v15  ;;  %v4101_v15 = vld [vmem:[#allocation8 + $0x4e4] sm:$0xf] }
  0x80   :  { %1861 = vmatpush.bf16.msra.mxu3 %v3524_v25 }
  0x81   :  { %1869 = vmatpush.bf16.msrb.mxu0 %v3096_v16  ;;  %v2925_v16 = vld [vmem:[#allocation8 + $0x18] sm:$0xf0] }
  0x82   :  { %1883 = vmatpush.bf16.msrb.mxu1 %v3288_v20  ;;  %v2928_v19 = vor.u32 %v3945_v14, %v2925_v16  ;;  %v3480_v20 = vor.u32 %v4083_v17, %v3477_v18  ;;  %v3549_v16 = vld [vmem:[#allocation8 + $0x4f8] sm:$0xf0] }
  0x83   :  { %v3552_v21 = vor.u32 %v4101_v15, %v3549_v16 }
  0x84   :  { %1897 = vmatpush.bf16.msrb.mxu2 %v3480_v20  ;;  %1862 = vmatpush.bf16.msra.mxu3 %v3500_v32  ;;  %v3991_v20 = vld [vmem:[#allocation8 + $0x16c] sm:$0xf0]  ;;  %v4095_v32 = vld [vmem:[#allocation8 + $0x4b4] sm:$0xf] }
  0x85   :  { %1870 = vmatpush.bf16.msrb.mxu0 %v3072_v23  ;;  %v3999_v23 = vld [vmem:[#allocation8 + $0x1b4] sm:$0xf] }
  0x86   :  { %1884 = vmatpush.bf16.msrb.mxu1 %v3264_v26  ;;  %v3144_v26 = vor.u32 %v3999_v23, %v3141_v24  ;;  %v3309_v23 = vld [vmem:[#allocation8 + $0x318] sm:$0xf0] }
  0x87   :  { %v3312_v25 = vor.u32 %v4041_v22, %v3309_v23  ;;  %v3171_v22 = vld [vmem:[#allocation8 + $0x1e8] sm:$0xf]  ;;  %v4009_v23 = vld [vmem:[#allocation8 + $0x1fc] sm:$0xf0] }
  0x88   :  { %1911 = vmatpush.bf16.msrb.mxu3 %v3672_v38  ;;  %v4039_v38 = vld [vmem:[#allocation8 + $0x2ec] sm:$0xf0] }
  0x89   :  { %1871 = vmatpush.bf16.msrb.mxu0 %v3048_v27  ;;  %v4077_v27 = vld [vmem:[#allocation8 + $0x424] sm:$0xf]  ;;  %v3292_v48 = vor.u32 %v4039_v38, %v3291_v37  ;;  %v3147_v37 = vld [vmem:[#allocation8 + $0x1b8] sm:$0xf]  ;;  %v4003_v38 = vld [vmem:[#allocation8 + $0x1cc] sm:$0xf0] }
  0x8a   :  { %1885 = vmatpush.bf16.msrb.mxu1 %v3240_v39  ;;  %v3456_v29 = vor.u32 %v4077_v27, %v3453_v28  ;;  %v4071_v39 = vld [vmem:[#allocation8 + $0x3f4] sm:$0xf]  ;;  %v3075_v28 = vld [vmem:[#allocation8 + $0x128] sm:$0xf] }
  0x8b   :  { %v3432_v41 = vor.u32 %v4071_v39, %v3429_v40 }
  0x8c   :  { %1898 = vmatpush.bf16.msrb.mxu2 %v3456_v29  ;;  %1912 = vmatpush.bf16.msrb.mxu3 %v3648_v44  ;;  %v3051_v44 = vld [vmem:[#allocation8 + $0xf8] sm:$0xf] }
  0x8d   :  { %1872 = vmatpush.bf16.msrb.mxu0 %v3024_v33  ;;  %v3993_v33 = vld [vmem:[#allocation8 + $0x184] sm:$0xf] }
  0x8e   :  { %1886 = vmatpush.bf16.msrb.mxu1 %v3216_v61  ;;  %v3120_v36 = vor.u32 %v3993_v33, %v3117_v34  ;;  %v3525_v33 = vld [vmem:[#allocation8 + $0x4c8] sm:$0xf0] }
  0x90   :  { %1899 = vmatpush.bf16.msrb.mxu2 %v3432_v41  ;;  %1913 = vmatpush.bf16.msrb.mxu3 %v3624_v50  ;;  %v3076_v41 = vor.u32 %v3985_v31, %v3075_v28  ;;  %v3267_v50 = vld [vmem:[#allocation8 + $0x2a8] sm:$0xf]  ;;  %v3988_v31 = vld [vmem:[#allocation8 + $0x15c] sm:$0xf] }
  0x91   :  { %1873 = vmatpush.bf16.msrb.mxu0 %v3000_v45  ;;  %v4472_v45 = vld [vmem:[#allocation7] sm:$0xf] }
  0x92   :  { %1887 = vmatpush.bf16.msrb.mxu1 %v3192_v63  ;;  %v195_v61 = vperm.slane %v4472_v45, 0  ;;  %v3357_v63 = vld [vmem:[#allocation8 + $0x378] sm:$0xf0]  ;;  %v196_v1 = vperm.slane %v4472_v45, 1  ;;  %v198_v15 = vperm.slane %v4472_v45, 3 }
  0x93   :  { %v3360_v0 = vor.u32 %v4053_v62, %v3357_v63  ;;  %v3244_v63 = vor.u32 %v4027_v58, %v3243_v56 }
  0x94   :  { %1900 = vmatpush.bf16.msrb.mxu2 %v3408_v47  ;;  %1914 = vmatpush.bf16.msrb.mxu3 %v3600_v60  ;;  %v3967_v60 = vld [vmem:[#allocation8 + $0xac] sm:$0xf0] }
  0x95   :  { %1874 = vmatpush.bf16.msrb.mxu0 %v2976_v55  ;;  %v3384_v55 = vor.u32 %v4059_v52, %v3381_v53  ;;  %v3027_v52 = vld [vmem:[#allocation8 + $0xc8] sm:$0xf]  ;;  %v3973_v53 = vld [vmem:[#allocation8 + $0xdc] sm:$0xf0] }
  0x96   :  { %1888 = vmatpush.bf16.msrb.mxu1 %v3168_v11 }
  0x98   :  { %1901 = vmatpush.bf16.msrb.mxu2 %v3384_v55  ;;  %1915 = vmatpush.bf16.msrb.mxu3 %v3576_v6  ;;  %v3028_v55 = vor.u32 %v3973_v53, %v3027_v52  ;;  %v3961_v6 = vld [vmem:[#allocation8 + $0x7c] sm:$0xf0]  ;;  %v3675_v53 = vld [vmem:[#allocation8 + $0x5d8] sm:$0xf] }
  0x99   :  { %1875 = vmatpush.bf16.msrb.mxu0 %v2952_v5  ;;  %v3997_v52 = vld [vmem:[#allocation8 + $0x19c] sm:$0xf0] }
  0x9a   :  { %1889 = vmatpush.bf16.msrb.mxu1 %v3144_v26 }
  0x9c   :  { %1902 = vmatpush.bf16.msrb.mxu2 %v3360_v0  ;;  %1916 = vmatpush.bf16.msrb.mxu3 %v3552_v21  ;;  %v197_v0 = vperm.slane %v4472_v45, 2  ;;  %v3101_v45 = vld [vmem:[#allocation8 + $0x170] sm:$0xf0] }
  0x9d   :  { %1876 = vmatpush.bf16.msrb.mxu0 %v2928_v19  ;;  %v3099_v19 = vld [vmem:[#allocation8 + $0x158] sm:$0xf] }
  0x9e   :  { %1890 = vmatpush.bf16.msrb.mxu1 %v3120_v36  ;;  %v3100_v27 = vor.u32 %v3991_v20, %v3099_v19  ;;  %v3528_v36 = vor.u32 %v4095_v32, %v3525_v33  ;;  %v3172_v33 = vor.u32 %v4009_v23, %v3171_v22  ;;  %v4123_v23 = vld [vmem:[#allocation8 + $0x58c] sm:$0xf0] }
  0xa0   :  { %1903 = vmatpush.bf16.msrb.mxu2 %v3336_v13  ;;  %1917 = vmatpush.bf16.msrb.mxu3 %v3528_v36  ;;  %v3955_v13 = vld [vmem:[#allocation8 + $0x4c] sm:$0xf0] }
  0xa4   :  { %1904 = vmatpush.bf16.msrb.mxu2 %v3312_v25  ;;  %1918 = vmatpush.bf16.msrb.mxu3 %v3504_v57  ;;  %v2931_v25 = vld [vmem:[#allocation8 + $0x8] sm:$0xf]  ;;  %v3077_v57 = vld [vmem:[#allocation8 + $0x140] sm:$0xf0] }
  0xbd   :  { %v532_v51 = vpop.f32.mrf.mxu0 }
  0xbe   :  { %v546_v54 = vpop.f32.mrf.mxu1  ;;  %v533_v59 = vadd.f32 %v532_v51, %v195_v61  ;;  %v4033_v51 = vld [vmem:[#allocation8 + $0x2bc] sm:$0xf0] }
  0xc0   :  { %v547_v4 = vadd.f32 %v546_v54, %v533_v59  ;;  %v3268_v54 = vor.u32 %v4033_v51, %v3267_v50  ;;  %v3003_v59 = vld [vmem:[#allocation8 + $0x98] sm:$0xf]  ;;  %v3123_v50 = vld [vmem:[#allocation8 + $0x188] sm:$0xf] }
  0xc1   :  { %v3004_v2 = vor.u32 %v3967_v60, %v3003_v59  ;;  %v4036_v59 = vld [vmem:[#allocation8 + $0x2dc] sm:$0xf]  ;;  %v3293_v60 = vld [vmem:[#allocation8 + $0x2f0] sm:$0xf0] }
  0xc2   :  { %v635_v17 = vmax.f32 %v547_v4, 0.0  ;;  %v4021_v4 = vld [vmem:[#allocation8 + $0x25c] sm:$0xf0] }
  0xc5   :  { %v560_v5 = vpop.f32.mrf.mxu2  ;;  %v534_v7 = vpop.f32.mrf.mxu0 }
  0xc6   :  { %v574_v8 = vpop.f32.mrf.mxu3  ;;  %v535_v11 = vadd.f32 %v534_v7, %v195_v61  ;;  %v548_v12 = vpop.f32.mrf.mxu1  ;;  %v561_v14 = vadd.f32 %v560_v5, %v196_v1  ;;  %v3052_v61 = vor.u32 %v3979_v46, %v3051_v44  ;;  %v2979_v5 = vld [vmem:[#allocation8 + $0x68] sm:$0xf]  ;;  %v3220_v7 = vor.u32 %v4021_v4, %v3219_v3  ;;  %v4081_v44 = vld [vmem:[#allocation8 + $0x43c] sm:$0xf0]  ;;  %v3982_v46 = vld [vmem:[#allocation8 + $0x12c] sm:$0xf] }
  0xc7   :  { %v2980_v9 = vor.u32 %v3961_v6, %v2979_v5  ;;  %v3080_v58 = vor.u32 %v3982_v46, %v3077_v57  ;;  %v3124_v4 = vor.u32 %v3997_v52, %v3123_v50  ;;  %v3296_v6 = vor.u32 %v4036_v59, %v3293_v60  ;;  %v3579_v46 = vld [vmem:[#allocation8 + $0x518] sm:$0xf]  ;;  %v2957_v52 = vld [vmem:[#allocation8 + $0x50] sm:$0xf0]  ;;  %v4105_v60 = vld [vmem:[#allocation8 + $0x4fc] sm:$0xf0] }
  0xc8   :  { %v549_v18 = vadd.f32 %v548_v12, %v535_v11  ;;  %v575_v26 = vadd.f32 %v574_v8, %v561_v14  ;;  %v4015_v11 = vld [vmem:[#allocation8 + $0x22c] sm:$0xf0]  ;;  %v2955_v12 = vld [vmem:[#allocation8 + $0x38] sm:$0xf] }
  0xc9   :  { %v2956_v21 = vor.u32 %v3955_v13, %v2955_v12  ;;  %v4030_v12 = vld [vmem:[#allocation8 + $0x2ac] sm:$0xf]  ;;  %v3269_v13 = vld [vmem:[#allocation8 + $0x2c0] sm:$0xf0] }
  0xca   :  { %v639_v24 = vmax.f32 %v549_v18, 0.0  ;;  %v636_v39 = vmax.f32 %v575_v26, 0.0  ;;  %v3196_v18 = vor.u32 %v4015_v11, %v3195_v10  ;;  %v3949_v26 = vld [vmem:[#allocation8 + $0x1c] sm:$0xf0] }
  0xcb   :  { %v2932_v36 = vor.u32 %v3949_v26, %v2931_v25  ;;  %v3245_v25 = vld [vmem:[#allocation8 + $0x290] sm:$0xf0]  ;;  %v3964_v26 = vld [vmem:[#allocation8 + $0x9c] sm:$0xf] }
  0xcc   :  { %v4476_v29 = vpack.c.bf16 %v639_v24, %v635_v17 }
  0xcd   :  { %v562_v30 = vpop.f32.mrf.mxu2 }
  0xce   :  { %v563_v34 = vadd.f32 %v562_v30, %v196_v1  ;;  %v576_v35 = vpop.f32.mrf.mxu3  ;;  %1821 = vmatmul.bf16.vlgmr.msra.gmra.mxu0 %v4476_v29  ;;  %v4087_v30 = vld [vmem:[#allocation8 + $0x46c] sm:$0xf0] }
  0xcf   :  { %1925 = vmatpush.bf16.msra.mxu0 %v3100_v27  ;;  %v3483_v27 = vld [vmem:[#allocation8 + $0x458] sm:$0xf] }
  0xd0   :  { %v577_v40 = vadd.f32 %v576_v35, %v563_v34 }
  0xd2   :  { %v640_v47 = vmax.f32 %v577_v40, 0.0  ;;  %v3104_v40 = vor.u32 %v3988_v31, %v3101_v45 }
  0xd3   :  { %1926 = vmatpush.bf16.msra.mxu0 %v3076_v41  ;;  %v3459_v41 = vld [vmem:[#allocation8 + $0x428] sm:$0xf] }
  0xd4   :  { %v4479_v49 = vpack.c.bf16 %v640_v47, %v636_v39  ;;  %v3484_v39 = vor.u32 %v4087_v30, %v3483_v27  ;;  %v3460_v56 = vor.u32 %v4081_v44, %v3459_v41  ;;  %v3005_v27 = vld [vmem:[#allocation8 + $0xb0] sm:$0xf0]  ;;  %v4063_v30 = vld [vmem:[#allocation8 + $0x3ac] sm:$0xf0]  ;;  %v4057_v41 = vld [vmem:[#allocation8 + $0x37c] sm:$0xf0] }
  0xd6   :  { %1835 = vmatmul.bf16.vlgmr.msra.gmra.mxu1 %v4479_v49 }
  0xd7   :  { %1939 = vmatpush.bf16.msra.mxu1 %v3292_v48  ;;  %1927 = vmatpush.bf16.msra.mxu0 %v3052_v61  ;;  %v3148_v61 = vor.u32 %v4003_v38, %v3147_v37  ;;  %v3958_v38 = vld [vmem:[#allocation8 + $0x6c] sm:$0xf] }
  0xdb   :  { %1940 = vmatpush.bf16.msra.mxu1 %v3268_v54  ;;  %1928 = vmatpush.bf16.msra.mxu0 %v3028_v55  ;;  %v4135_v54 = vld [vmem:[#allocation8 + $0x5ec] sm:$0xf0] }
  0xdc   :  { %v3676_v5 = vor.u32 %v4135_v54, %v3675_v53  ;;  %v3339_v53 = vld [vmem:[#allocation8 + $0x338] sm:$0xf]  ;;  %v4051_v54 = vld [vmem:[#allocation8 + $0x34c] sm:$0xf0] }
  0xdd   :  { %v588_v62 = vpop.f32.mrf.mxu0 }
  0xde   :  { %v602_v1 = vpop.f32.mrf.mxu1  ;;  %1877 = vmatmul.bf16.vlgmr.msrb.gmra.mxu0 %v4476_v29  ;;  %v589_v8 = vadd.f32 %v588_v62, %v197_v0  ;;  %v3435_v62 = vld [vmem:[#allocation8 + $0x3f8] sm:$0xf] }
  0xdf   :  { %1941 = vmatpush.bf16.msra.mxu1 %v3244_v63  ;;  %1929 = vmatpush.bf16.msra.mxu0 %v3004_v2  ;;  %v4075_v63 = vld [vmem:[#allocation8 + $0x40c] sm:$0xf0] }
  0xe0   :  { %v603_v19 = vadd.f32 %v602_v1, %v589_v8  ;;  %v3053_v1 = vld [vmem:[#allocation8 + $0x110] sm:$0xf0]  ;;  %v4129_v8 = vld [vmem:[#allocation8 + $0x5bc] sm:$0xf0]  ;;  %v3436_v10 = vor.u32 %v4075_v63, %v3435_v62  ;;  %v4006_v62 = vld [vmem:[#allocation8 + $0x1ec] sm:$0xf] }
  0xe1   :  { %v3173_v63 = vld [vmem:[#allocation8 + $0x200] sm:$0xf0] }
  0xe2   :  { %v637_v34 = vmax.f32 %v603_v19, 0.0  ;;  %v3272_v19 = vor.u32 %v4030_v12, %v3269_v13  ;;  %v3531_v12 = vld [vmem:[#allocation8 + $0x4b8] sm:$0xf] }
  0xe3   :  { %1942 = vmatpush.bf16.msra.mxu1 %v3220_v7  ;;  %1930 = vmatpush.bf16.msra.mxu0 %v2980_v9  ;;  %v3651_v7 = vld [vmem:[#allocation8 + $0x5a8] sm:$0xf] }
  0xe5   :  { %v616_v14 = vpop.f32.mrf.mxu2  ;;  %v590_v17 = vpop.f32.mrf.mxu0 }
  0xe6   :  { %v630_v16 = vpop.f32.mrf.mxu3  ;;  %v591_v20 = vadd.f32 %v590_v17, %v197_v0  ;;  %v604_v24 = vpop.f32.mrf.mxu1  ;;  %1891 = vmatmul.bf16.vlgmr.msrb.gmra.mxu1 %v4479_v49  ;;  %v617_v32 = vadd.f32 %v616_v14, %v198_v15  ;;  %v3976_v0 = vld [vmem:[#allocation8 + $0xfc] sm:$0xf]  ;;  %v3411_v14 = vld [vmem:[#allocation8 + $0x3c8] sm:$0xf]  ;;  %v3029_v17 = vld [vmem:[#allocation8 + $0xe0] sm:$0xf0] }
  0xe7   :  { %1943 = vmatpush.bf16.msra.mxu1 %v3196_v18  ;;  %1931 = vmatpush.bf16.msra.mxu0 %v2956_v21  ;;  %v3056_v11 = vor.u32 %v3976_v0, %v3053_v1  ;;  %v3652_v18 = vor.u32 %v4129_v8, %v3651_v7  ;;  %v3340_v0 = vor.u32 %v4051_v54, %v3339_v53  ;;  %v3315_v1 = vld [vmem:[#allocation8 + $0x308] sm:$0xf]  ;;  %v4066_v53 = vld [vmem:[#allocation8 + $0x3cc] sm:$0xf]  ;;  %v3413_v54 = vld [vmem:[#allocation8 + $0x3e0] sm:$0xf0] }
  0xe8   :  { %v605_v28 = vadd.f32 %v604_v24, %v591_v20  ;;  %v631_v47 = vadd.f32 %v630_v16, %v617_v32  ;;  %v3970_v16 = vld [vmem:[#allocation8 + $0xcc] sm:$0xf]  ;;  %v3627_v20 = vld [vmem:[#allocation8 + $0x578] sm:$0xf]  ;;  %v4024_v24 = vld [vmem:[#allocation8 + $0x27c] sm:$0xf]  ;;  %v3176_v8 = vor.u32 %v4006_v62, %v3173_v63 }
  0xe9   :  { %v3032_v22 = vor.u32 %v3970_v16, %v3029_v17  ;;  %v3628_v31 = vor.u32 %v4123_v23, %v3627_v20  ;;  %v3248_v45 = vor.u32 %v4024_v24, %v3245_v25  ;;  %v3603_v32 = vld [vmem:[#allocation8 + $0x548] sm:$0xf]  ;;  %v3149_v16 = vld [vmem:[#allocation8 + $0x1d0] sm:$0xf0]  ;;  %v4078_v20 = vld [vmem:[#allocation8 + $0x42c] sm:$0xf] }
  0xea   :  { %v641_v35 = vmax.f32 %v605_v28, 0.0  ;;  %v638_v2 = vmax.f32 %v631_v47, 0.0  ;;  %v3387_v28 = vld [vmem:[#allocation8 + $0x398] sm:$0xf]  ;;  %v4111_v47 = vld [vmem:[#allocation8 + $0x52c] sm:$0xf0] }
  0xeb   :  { %1944 = vmatpush.bf16.msra.mxu1 %v3172_v33  ;;  %1932 = vmatpush.bf16.msra.mxu0 %v2932_v36  ;;  %v3008_v33 = vor.u32 %v3964_v26, %v3005_v27  ;;  %v3221_v36 = vld [vmem:[#allocation8 + $0x260] sm:$0xf0]  ;;  %v3388_v37 = vor.u32 %v4063_v30, %v3387_v28  ;;  %v3507_v26 = vld [vmem:[#allocation8 + $0x488] sm:$0xf]  ;;  %v4093_v27 = vld [vmem:[#allocation8 + $0x49c] sm:$0xf0] }
  0xec   :  { %v4486_v42 = vpack.c.bf16 %v641_v35, %v637_v34  ;;  %v4117_v34 = vld [vmem:[#allocation8 + $0x55c] sm:$0xf0]  ;;  %v4018_v35 = vld [vmem:[#allocation8 + $0x24c] sm:$0xf]  ;;  %v3461_v25 = vld [vmem:[#allocation8 + $0x440] sm:$0xf0] }
  0xed   :  { %v618_v43 = vpop.f32.mrf.mxu2  ;;  %v3224_v44 = vor.u32 %v4018_v35, %v3221_v36  ;;  %v3994_v28 = vld [vmem:[#allocation8 + $0x18c] sm:$0xf]  ;;  %v3125_v30 = vld [vmem:[#allocation8 + $0x1a0] sm:$0xf0]  ;;  %v3464_v35 = vor.u32 %v4078_v20, %v3461_v25  ;;  %v3059_v36 = vld [vmem:[#allocation8 + $0x100] sm:$0xf] }
  0xee   :  { %v619_v48 = vadd.f32 %v618_v43, %v198_v15  ;;  %v632_v51 = vpop.f32.mrf.mxu3  ;;  %1849 = vmatmul.bf16.vlgmr.msra.gmra.mxu2 %v4486_v42  ;;  %1933 = vmatmul.bf16.vlgmr.msra.gmra.mxu0 %v4476_v29  ;;  %v4069_v15 = vld [vmem:[#allocation8 + $0x3dc] sm:$0xf0]  ;;  %v3604_v43 = vor.u32 %v4117_v34, %v3603_v32  ;;  %v3677_v32 = vld [vmem:[#allocation8 + $0x5f0] sm:$0xf0]  ;;  %v4040_v34 = vld [vmem:[#allocation8 + $0x2f4] sm:$0xf0] }
  0xef   :  { %1953 = vmatpush.bf16.msra.mxu2 %v3484_v39  ;;  %1981 = vmatpush.bf16.msrb.mxu0 %v3104_v40  ;;  %v3412_v21 = vor.u32 %v4069_v15, %v3411_v14  ;;  %v2981_v39 = vld [vmem:[#allocation8 + $0x80] sm:$0xf0]  ;;  %v3363_v40 = vld [vmem:[#allocation8 + $0x368] sm:$0xf]  ;;  %v4099_v14 = vld [vmem:[#allocation8 + $0x4cc] sm:$0xf0] }
  0xf0   :  { %v633_v55 = vadd.f32 %v632_v51, %v619_v48  ;;  %1945 = vmatpush.bf16.msra.mxu1 %v3148_v61  ;;  %v2984_v57 = vor.u32 %v3958_v38, %v2981_v39  ;;  %v4012_v48 = vld [vmem:[#allocation8 + $0x21c] sm:$0xf]  ;;  %v3197_v61 = vld [vmem:[#allocation8 + $0x230] sm:$0xf0]  ;;  %v3364_v50 = vor.u32 %v4057_v41, %v3363_v40  ;;  %v3532_v23 = vor.u32 %v4099_v14, %v3531_v12  ;;  %v3251_v62 = vld [vmem:[#allocation8 + $0x280] sm:$0xf] }
  0xf1   :  { %v3952_v51 = vld [vmem:[#allocation8 + $0x3c] sm:$0xf]  ;;  %v3508_v38 = vor.u32 %v4093_v27, %v3507_v26  ;;  %v3128_v39 = vor.u32 %v3994_v28, %v3125_v30  ;;  %v3437_v41 = vld [vmem:[#allocation8 + $0x410] sm:$0xf0]  ;;  %v4028_v63 = vld [vmem:[#allocation8 + $0x294] sm:$0xf0] }
  0xf2   :  { %v642_v3 = vmax.f32 %v633_v55, 0.0  ;;  %v3580_v55 = vor.u32 %v4111_v47, %v3579_v46  ;;  %v2960_v59 = vor.u32 %v3952_v51, %v2957_v52  ;;  %v4000_v15 = vld [vmem:[#allocation8 + $0x1bc] sm:$0xf]  ;;  %v4126_v46 = vld [vmem:[#allocation8 + $0x5ac] sm:$0xf] }
  0xf3   :  { %1954 = vmatpush.bf16.msra.mxu2 %v3460_v56  ;;  %1982 = vmatpush.bf16.msrb.mxu0 %v3080_v58  ;;  %v3200_v56 = vor.u32 %v4012_v48, %v3197_v61  ;;  %v3555_v58 = vld [vmem:[#allocation8 + $0x4e8] sm:$0xf]  ;;  %v3152_v24 = vor.u32 %v4000_v15, %v3149_v16  ;;  %v4072_v40 = vld [vmem:[#allocation8 + $0x3fc] sm:$0xf]  ;;  %v3653_v47 = vld [vmem:[#allocation8 + $0x5c0] sm:$0xf0] }
  0xf4   :  { %v4490_v9 = vpack.c.bf16 %v642_v3, %v638_v2  ;;  %1946 = vmatpush.bf16.msra.mxu1 %v3124_v4  ;;  %v3946_v2 = vld [vmem:[#allocation8 + $0xc] sm:$0xf]  ;;  %v2933_v3 = vld [vmem:[#allocation8 + $0x20] sm:$0xf0]  ;;  %v4045_v4 = vld [vmem:[#allocation8 + $0x31c] sm:$0xf0]  ;;  %v3556_v7 = vor.u32 %v4105_v60, %v3555_v58 }
  0xf5   :  { %v2936_v13 = vor.u32 %v3946_v2, %v2933_v3  ;;  %v3316_v17 = vor.u32 %v4045_v4, %v3315_v1  ;;  %v3275_v48 = vld [vmem:[#allocation8 + $0x2b0] sm:$0xf]  ;;  %v4034_v61 = vld [vmem:[#allocation8 + $0x2c4] sm:$0xf0]  ;;  %v4120_v58 = vld [vmem:[#allocation8 + $0x57c] sm:$0xf] }
  0xf6   :  { %1863 = vmatmul.bf16.vlgmr.msra.gmra.mxu3 %v4490_v9  ;;  %v3035_v51 = vld [vmem:[#allocation8 + $0xd0] sm:$0xf]  ;;  %v3974_v52 = vld [vmem:[#allocation8 + $0xe4] sm:$0xf0]  ;;  %v3629_v60 = vld [vmem:[#allocation8 + $0x590] sm:$0xf0] }
  0xf7   :  { %1967 = vmatpush.bf16.msra.mxu3 %v3676_v5  ;;  %1955 = vmatpush.bf16.msra.mxu2 %v3436_v10  ;;  %v3107_v5 = vld [vmem:[#allocation8 + $0x160] sm:$0xf]  ;;  %v4084_v10 = vld [vmem:[#allocation8 + $0x45c] sm:$0xf]  ;;  %v3968_v2 = vld [vmem:[#allocation8 + $0xb4] sm:$0xf0] }
  0xf8   :  { %1995 = vmatpush.bf16.msrb.mxu1 %v3296_v6  ;;  %1983 = vmatpush.bf16.msrb.mxu0 %v3056_v11  ;;  %v3992_v6 = vld [vmem:[#allocation8 + $0x174] sm:$0xf0]  ;;  %v3485_v11 = vld [vmem:[#allocation8 + $0x470] sm:$0xf0]  ;;  %v3011_v1 = vld [vmem:[#allocation8 + $0xa0] sm:$0xf] }
  0xf9   :  { %1947 = vmatmul.bf16.vlgmr.msra.gmra.mxu1 %v4479_v49  ;;  %v4060_v3 = vld [vmem:[#allocation8 + $0x39c] sm:$0xf]  ;;  %v3389_v4 = vld [vmem:[#allocation8 + $0x3b0] sm:$0xf0]  ;;  %v4022_v12 = vld [vmem:[#allocation8 + $0x264] sm:$0xf0] }
  0xfa   :  { %v2987_v14 = vld [vmem:[#allocation8 + $0x70] sm:$0xf]  ;;  %v3962_v15 = vld [vmem:[#allocation8 + $0x84] sm:$0xf0]  ;;  %v4054_v16 = vld [vmem:[#allocation8 + $0x36c] sm:$0xf] }
  0xfb   :  { %1968 = vmatpush.bf16.msra.mxu3 %v3652_v18  ;;  %1956 = vmatpush.bf16.msra.mxu2 %v3412_v21  ;;  %v3108_v18 = vor.u32 %v3992_v6, %v3107_v5  ;;  %v3083_v21 = vld [vmem:[#allocation8 + $0x130] sm:$0xf]  ;;  %v3632_v5 = vor.u32 %v4120_v58, %v3629_v60  ;;  %v3252_v6 = vor.u32 %v4028_v63, %v3251_v62  ;;  %v4108_v20 = vld [vmem:[#allocation8 + $0x51c] sm:$0xf]  ;;  %v2963_v26 = vld [vmem:[#allocation8 + $0x40] sm:$0xf] }
  0xfc   :  { %1996 = vmatpush.bf16.msrb.mxu1 %v3272_v19  ;;  %1984 = vmatpush.bf16.msrb.mxu0 %v3032_v22  ;;  %v3488_v19 = vor.u32 %v4084_v10, %v3485_v11  ;;  %v3986_v22 = vld [vmem:[#allocation8 + $0x144] sm:$0xf0]  ;;  %v3605_v10 = vld [vmem:[#allocation8 + $0x560] sm:$0xf0]  ;;  %v3227_v11 = vld [vmem:[#allocation8 + $0x250] sm:$0xf] }
  0xfd   :  { %v3956_v27 = vld [vmem:[#allocation8 + $0x54] sm:$0xf0]  ;;  %v4048_v28 = vld [vmem:[#allocation8 + $0x33c] sm:$0xf]  ;;  %v3341_v30 = vld [vmem:[#allocation8 + $0x350] sm:$0xf0] }
  0xfe   :  { %1905 = vmatmul.bf16.vlgmr.msrb.gmra.mxu2 %v4486_v42  ;;  %v3467_v58 = vld [vmem:[#allocation8 + $0x430] sm:$0xf]  ;;  %v3085_v60 = vld [vmem:[#allocation8 + $0x148] sm:$0xf0] }
  0xff   :  { %1969 = vmatpush.bf16.msra.mxu3 %v3628_v31  ;;  %1957 = vmatpush.bf16.msra.mxu2 %v3388_v37  ;;  %v4132_v31 = vld [vmem:[#allocation8 + $0x5dc] sm:$0xf]  ;;  %v3980_v37 = vld [vmem:[#allocation8 + $0x114] sm:$0xf0] }
 0x100   :  { %1997 = vmatpush.bf16.msrb.mxu1 %v3248_v45  ;;  %1985 = vmatpush.bf16.msrb.mxu0 %v3008_v33  ;;  %v3084_v45 = vor.u32 %v3986_v22, %v3083_v21  ;;  %v3299_v33 = vld [vmem:[#allocation8 + $0x2e0] sm:$0xf]  ;;  %v2988_v21 = vor.u32 %v3962_v15, %v2987_v14  ;;  %v3581_v22 = vld [vmem:[#allocation8 + $0x530] sm:$0xf0] }
 0x103   :  { %1970 = vmatpush.bf16.msra.mxu3 %v3604_v43  ;;  %1958 = vmatpush.bf16.msra.mxu2 %v3364_v50  ;;  %v3680_v43 = vor.u32 %v4132_v31, %v3677_v32  ;;  %v3440_v50 = vor.u32 %v4072_v40, %v3437_v41  ;;  %v3584_v31 = vor.u32 %v4108_v20, %v3581_v22  ;;  %v4102_v32 = vld [vmem:[#allocation8 + $0x4ec] sm:$0xf]  ;;  %v3950_v40 = vld [vmem:[#allocation8 + $0x24] sm:$0xf0]  ;;  %v3317_v41 = vld [vmem:[#allocation8 + $0x320] sm:$0xf0] }
 0x104   :  { %1998 = vmatpush.bf16.msrb.mxu1 %v3224_v44  ;;  %1986 = vmatpush.bf16.msrb.mxu0 %v2984_v57  ;;  %v3300_v44 = vor.u32 %v4040_v34, %v3299_v33  ;;  %v3060_v57 = vor.u32 %v3980_v37, %v3059_v36  ;;  %v2964_v33 = vor.u32 %v3956_v27, %v2963_v26  ;;  %v3557_v34 = vld [vmem:[#allocation8 + $0x500] sm:$0xf0]  ;;  %v4010_v36 = vld [vmem:[#allocation8 + $0x204] sm:$0xf0]  ;;  %v3659_v20 = vld [vmem:[#allocation8 + $0x5b0] sm:$0xf] }
 0x105   :  { %v3344_v37 = vor.u32 %v4048_v28, %v3341_v30  ;;  %v4130_v22 = vld [vmem:[#allocation8 + $0x5c4] sm:$0xf0]  ;;  %v3037_v26 = vld [vmem:[#allocation8 + $0xe8] sm:$0xf0] }
 0x106   :  { %1919 = vmatmul.bf16.vlgmr.msrb.gmra.mxu3 %v4490_v9  ;;  %v3660_v28 = vor.u32 %v4130_v22, %v3659_v20  ;;  %v4085_v20 = vld [vmem:[#allocation8 + $0x464] sm:$0xf]  ;;  %v3493_v22 = vld [vmem:[#allocation8 + $0x478] sm:$0xf0] }
 0x107   :  { %1971 = vmatpush.bf16.msra.mxu3 %v3580_v55  ;;  %1959 = vmatpush.bf16.msra.mxu2 %v3340_v0  ;;  %v3656_v55 = vor.u32 %v4126_v46, %v3653_v47  ;;  %v3416_v0 = vor.u32 %v4066_v53, %v3413_v54  ;;  %v3560_v46 = vor.u32 %v4102_v32, %v3557_v34  ;;  %v3491_v47 = vld [vmem:[#allocation8 + $0x460] sm:$0xf]  ;;  %v4004_v53 = vld [vmem:[#allocation8 + $0x1d4] sm:$0xf0] }
 0x108   :  { %1999 = vmatpush.bf16.msrb.mxu1 %v3200_v56  ;;  %1987 = vmatpush.bf16.msrb.mxu0 %v2960_v59  ;;  %v3276_v56 = vor.u32 %v4034_v61, %v3275_v48  ;;  %v3036_v59 = vor.u32 %v3974_v52, %v3035_v51  ;;  %v4088_v48 = vld [vmem:[#allocation8 + $0x474] sm:$0xf0]  ;;  %v4096_v61 = vld [vmem:[#allocation8 + $0x4bc] sm:$0xf]  ;;  %v3533_v51 = vld [vmem:[#allocation8 + $0x4d0] sm:$0xf0] }
 0x109   :  { %v3155_v52 = vld [vmem:[#allocation8 + $0x1c0] sm:$0xf]  ;;  %v3536_v62 = vor.u32 %v4096_v61, %v3533_v51  ;;  %v4124_v34 = vld [vmem:[#allocation8 + $0x594] sm:$0xf0]  ;;  %v3229_v61 = vld [vmem:[#allocation8 + $0x268] sm:$0xf0] }
 0x10a   :  { %v3156_v63 = vor.u32 %v4004_v53, %v3155_v52  ;;  %v3635_v32 = vld [vmem:[#allocation8 + $0x580] sm:$0xf]  ;;  %v2989_v51 = vld [vmem:[#allocation8 + $0x88] sm:$0xf0] }
 0x10b   :  { %1972 = vmatpush.bf16.msra.mxu3 %v3556_v7  ;;  %1960 = vmatpush.bf16.msra.mxu2 %v3316_v17  ;;  %v4114_v7 = vld [vmem:[#allocation8 + $0x54c] sm:$0xf]  ;;  %v3365_v17 = vld [vmem:[#allocation8 + $0x380] sm:$0xf0] }
 0x10c   :  { %2000 = vmatpush.bf16.msrb.mxu1 %v3176_v8  ;;  %1988 = vmatpush.bf16.msrb.mxu0 %v2936_v13  ;;  %v3012_v8 = vor.u32 %v3968_v2, %v3011_v1  ;;  %v3392_v13 = vor.u32 %v4060_v3, %v3389_v4  ;;  %v3368_v25 = vor.u32 %v4054_v16, %v3365_v17  ;;  %v4090_v1 = vld [vmem:[#allocation8 + $0x48c] sm:$0xf]  ;;  %v3509_v2 = vld [vmem:[#allocation8 + $0x4a0] sm:$0xf0]  ;;  %v3131_v3 = vld [vmem:[#allocation8 + $0x190] sm:$0xf] }
 0x10d   :  { %v3998_v4 = vld [vmem:[#allocation8 + $0x1a4] sm:$0xf0]  ;;  %v3512_v14 = vor.u32 %v4090_v1, %v3509_v2  ;;  %v2965_v1 = vld [vmem:[#allocation8 + $0x58] sm:$0xf0] }
 0x10e   :  { %1961 = vmatmul.bf16.vlgmr.msra.gmra.mxu2 %v4486_v42  ;;  %v3132_v15 = vor.u32 %v3998_v4, %v3131_v3 }
 0x10f   :  { %2009 = vmatpush.bf16.msrb.mxu2 %v3488_v19  ;;  %1973 = vmatpush.bf16.msra.mxu3 %v3532_v23  ;;  %v3228_v19 = vor.u32 %v4022_v12, %v3227_v11  ;;  %v3203_v23 = vld [vmem:[#allocation8 + $0x220] sm:$0xf]  ;;  %v3977_v12 = vld [vmem:[#allocation8 + $0x104] sm:$0xf] }
 0x110   :  { %2037 = vmatpush.bf16.msra.mxu0 %v3108_v18  ;;  %2001 = vmatpush.bf16.msrb.mxu1 %v3152_v24  ;;  %v3608_v18 = vor.u32 %v4114_v7, %v3605_v10  ;;  %v4016_v24 = vld [vmem:[#allocation8 + $0x234] sm:$0xf0]  ;;  %v3301_v10 = vld [vmem:[#allocation8 + $0x2f8] sm:$0xf0] }
 0x111   :  { %1989 = vmatmul.bf16.vlgmr.msrb.gmra.mxu0 %v4476_v29  ;;  %v4136_v7 = vld [vmem:[#allocation8 + $0x5f4] sm:$0xf0] }
 0x113   :  { %2010 = vmatpush.bf16.msrb.mxu2 %v3464_v35  ;;  %1974 = vmatpush.bf16.msra.mxu3 %v3508_v38  ;;  %v3179_v35 = vld [vmem:[#allocation8 + $0x1f0] sm:$0xf]  ;;  %v4042_v38 = vld [vmem:[#allocation8 + $0x30c] sm:$0xf] }
 0x114   :  { %2038 = vmatpush.bf16.msra.mxu0 %v3084_v45  ;;  %2002 = vmatpush.bf16.msrb.mxu1 %v3128_v39  ;;  %v3204_v45 = vor.u32 %v4016_v24, %v3203_v23  ;;  %v2939_v39 = vld [vmem:[#allocation8 + $0x10] sm:$0xf]  ;;  %v3320_v54 = vor.u32 %v4042_v38, %v3317_v41  ;;  %v4031_v23 = vld [vmem:[#allocation8 + $0x2b4] sm:$0xf]  ;;  %v3277_v24 = vld [vmem:[#allocation8 + $0x2c8] sm:$0xf0] }
 0x115   :  { %v3280_v30 = vor.u32 %v4031_v23, %v3277_v24  ;;  %v3013_v38 = vld [vmem:[#allocation8 + $0xb8] sm:$0xf0]  ;;  %v3539_v23 = vld [vmem:[#allocation8 + $0x4c0] sm:$0xf]  ;;  %v4100_v24 = vld [vmem:[#allocation8 + $0x4d4] sm:$0xf0] }
 0x116   :  { %1975 = vmatmul.bf16.vlgmr.msra.gmra.mxu3 %v4490_v9 }
 0x117   :  { %2023 = vmatpush.bf16.msrb.mxu3 %v3680_v43  ;;  %2003 = vmatmul.bf16.vlgmr.msrb.gmra.mxu1 %v4479_v49  ;;  %v3989_v43 = vld [vmem:[#allocation8 + $0x164] sm:$0xf] }
 0x118   :  { %2051 = vmatpush.bf16.msra.mxu1 %v3300_v44  ;;  %2039 = vmatpush.bf16.msra.mxu0 %v3060_v57  ;;  %v3109_v44 = vld [vmem:[#allocation8 + $0x178] sm:$0xf0]  ;;  %v3180_v57 = vor.u32 %v4010_v36, %v3179_v35  ;;  %v4025_v35 = vld [vmem:[#allocation8 + $0x284] sm:$0xf] }
 0x119   :  { %2011 = vmatpush.bf16.msrb.mxu2 %v3440_v50  ;;  %v2940_v50 = vor.u32 %v3950_v40, %v2939_v39  ;;  %v3253_v36 = vld [vmem:[#allocation8 + $0x298] sm:$0xf0]  ;;  %v3636_v40 = vor.u32 %v4124_v34, %v3635_v32  ;;  %v4094_v34 = vld [vmem:[#allocation8 + $0x4a4] sm:$0xf0] }
 0x11a   :  { %v3256_v41 = vor.u32 %v4025_v35, %v3253_v36  ;;  %v3995_v35 = vld [vmem:[#allocation8 + $0x194] sm:$0xf]  ;;  %v3133_v36 = vld [vmem:[#allocation8 + $0x1a8] sm:$0xf0] }
 0x11b   :  { %2024 = vmatpush.bf16.msrb.mxu3 %v3656_v55  ;;  %v3112_v55 = vor.u32 %v3989_v43, %v3109_v44  ;;  %v3395_v43 = vld [vmem:[#allocation8 + $0x3a0] sm:$0xf]  ;;  %v4064_v44 = vld [vmem:[#allocation8 + $0x3b4] sm:$0xf0] }
 0x11c   :  { %2052 = vmatpush.bf16.msra.mxu1 %v3276_v56  ;;  %2040 = vmatpush.bf16.msra.mxu0 %v3036_v59  ;;  %v3492_v56 = vor.u32 %v4088_v48, %v3491_v47  ;;  %v3983_v59 = vld [vmem:[#allocation8 + $0x134] sm:$0xf]  ;;  %v4118_v47 = vld [vmem:[#allocation8 + $0x564] sm:$0xf0]  ;;  %v3396_v52 = vor.u32 %v4064_v44, %v3395_v43  ;;  %v3136_v43 = vor.u32 %v3995_v35, %v3133_v36 }
 0x11d   :  { %2012 = vmatpush.bf16.msrb.mxu2 %v3416_v0  ;;  %v4082_v0 = vld [vmem:[#allocation8 + $0x444] sm:$0xf0]  ;;  %v4019_v48 = vld [vmem:[#allocation8 + $0x254] sm:$0xf] }
 0x11e   :  { %v3468_v11 = vor.u32 %v4082_v0, %v3467_v58  ;;  %v3587_v58 = vld [vmem:[#allocation8 + $0x520] sm:$0xf]  ;;  %v3953_v0 = vld [vmem:[#allocation8 + $0x44] sm:$0xf]  ;;  %v4147_v36 = vld [vmem:[#allocation11 + $0x50] sm:$0xff] }
 0x11f   :  { %2025 = vmatpush.bf16.msrb.mxu3 %v3632_v5  ;;  %v3683_v5 = vld [vmem:[#allocation8 + $0x5e0] sm:$0xf] }
 0x120   :  { %2053 = vmatpush.bf16.msra.mxu1 %v3252_v6  ;;  %2041 = vmatpush.bf16.msra.mxu0 %v3012_v8  ;;  %v3088_v6 = vor.u32 %v3983_v59, %v3085_v60  ;;  %v4037_v8 = vld [vmem:[#allocation8 + $0x2e4] sm:$0xf]  ;;  %v3684_v16 = vor.u32 %v4136_v7, %v3683_v5  ;;  %v4112_v60 = vld [vmem:[#allocation8 + $0x534] sm:$0xf0]  ;;  %v3347_v5 = vld [vmem:[#allocation8 + $0x340] sm:$0xf] }
 0x121   :  { %2013 = vmatpush.bf16.msrb.mxu2 %v3392_v13  ;;  %v3061_v13 = vld [vmem:[#allocation8 + $0x118] sm:$0xf0]  ;;  %v3304_v17 = vor.u32 %v4037_v8, %v3301_v10  ;;  %v3588_v3 = vor.u32 %v4112_v60, %v3587_v58  ;;  %v3563_v7 = vld [vmem:[#allocation8 + $0x4f0] sm:$0xf]  ;;  %v2968_v8 = vor.u32 %v3953_v0, %v2965_v1  ;;  %v4106_v10 = vld [vmem:[#allocation8 + $0x504] sm:$0xf0] }
 0x122   :  { %v3397_v60 = vld [vmem:[#allocation8 + $0x3b8] sm:$0xf0]  ;;  %v4141_v0 = vld [vmem:[#allocation11 + $0x20] sm:$0xff] }
 0x123   :  { %2026 = vmatpush.bf16.msrb.mxu3 %v3608_v18  ;;  %v3443_v18 = vld [vmem:[#allocation8 + $0x400] sm:$0xf] }
 0x124   :  { %2054 = vmatpush.bf16.msra.mxu1 %v3228_v19  ;;  %2042 = vmatpush.bf16.msra.mxu0 %v2988_v21  ;;  %v4076_v19 = vld [vmem:[#allocation8 + $0x414] sm:$0xf0]  ;;  %v3064_v21 = vor.u32 %v3977_v12, %v3061_v13  ;;  %v3181_v12 = vld [vmem:[#allocation8 + $0x208] sm:$0xf0]  ;;  %v3947_v13 = vld [vmem:[#allocation8 + $0x14] sm:$0xf] }
 0x125   :  { %2014 = vmatpush.bf16.msrb.mxu2 %v3368_v25  ;;  %v3971_v25 = vld [vmem:[#allocation8 + $0xd4] sm:$0xf]  ;;  %v3444_v27 = vor.u32 %v4076_v19, %v3443_v18  ;;  %v3323_v18 = vld [vmem:[#allocation8 + $0x310] sm:$0xf]  ;;  %v4046_v19 = vld [vmem:[#allocation8 + $0x324] sm:$0xf0] }
 0x127   :  { %2027 = vmatpush.bf16.msrb.mxu3 %v3584_v31  ;;  %v3419_v31 = vld [vmem:[#allocation8 + $0x3d0] sm:$0xf] }
 0x128   :  { %2055 = vmatpush.bf16.msra.mxu1 %v3204_v45  ;;  %2043 = vmatpush.bf16.msra.mxu0 %v2964_v33  ;;  %v4070_v45 = vld [vmem:[#allocation8 + $0x3e4] sm:$0xf0]  ;;  %v3040_v33 = vor.u32 %v3971_v25, %v3037_v26  ;;  %v4001_v25 = vld [vmem:[#allocation8 + $0x1c4] sm:$0xf]  ;;  %v3157_v26 = vld [vmem:[#allocation8 + $0x1d8] sm:$0xf0] }
 0x129   :  { %2015 = vmatpush.bf16.msrb.mxu2 %v3344_v37  ;;  %v3965_v37 = vld [vmem:[#allocation8 + $0xa4] sm:$0xf]  ;;  %v3420_v39 = vor.u32 %v4070_v45, %v3419_v31  ;;  %v4079_v31 = vld [vmem:[#allocation8 + $0x434] sm:$0xf]  ;;  %v3469_v45 = vld [vmem:[#allocation8 + $0x448] sm:$0xf0]  ;;  %v3160_v32 = vor.u32 %v4001_v25, %v3157_v26 }
 0x12a   :  { %v4150_v25 = vld [vmem:[#allocation11 + $0x68] sm:$0xff] }
 0x12b   :  { %2028 = vmatpush.bf16.msrb.mxu3 %v3560_v46  ;;  %v3611_v46 = vld [vmem:[#allocation8 + $0x550] sm:$0xf] }
 0x12c   :  { %2056 = vmatpush.bf16.msra.mxu1 %v3180_v57  ;;  %2044 = vmatpush.bf16.msra.mxu0 %v2940_v50  ;;  %v3016_v57 = vor.u32 %v3965_v37, %v3013_v38  ;;  %v3959_v50 = vld [vmem:[#allocation8 + $0x74] sm:$0xf]  ;;  %v3612_v53 = vor.u32 %v4118_v47, %v3611_v46  ;;  %v4133_v37 = vld [vmem:[#allocation8 + $0x5e4] sm:$0xf]  ;;  %v3685_v38 = vld [vmem:[#allocation8 + $0x5f8] sm:$0xf0] }
 0x12d   :  { %2016 = vmatpush.bf16.msrb.mxu2 %v3320_v54  ;;  %v3232_v54 = vor.u32 %v4019_v48, %v3229_v61  ;;  %v2992_v59 = vor.u32 %v3959_v50, %v2989_v51  ;;  %v3688_v44 = vor.u32 %v4133_v37, %v3685_v38  ;;  %v4073_v46 = vld [vmem:[#allocation8 + $0x404] sm:$0xf]  ;;  %v4127_v47 = vld [vmem:[#allocation8 + $0x5b4] sm:$0xf]  ;;  %v3661_v48 = vld [vmem:[#allocation8 + $0x5c8] sm:$0xf0] }
 0x12e   :  { %v4143_v50 = vld [vmem:[#allocation11 + $0x30] sm:$0xff]  ;;  %v3664_v51 = vor.u32 %v4127_v47, %v3661_v48  ;;  %v4510_v38 = vld [vmem:[#allocation10] sm:$0x3f] }
 0x12f   :  { %2029 = vmatpush.bf16.msrb.mxu3 %v3536_v62  ;;  %2045 = vmatmul.bf16.vlgmr.msra.gmra.mxu0 %v4476_v29  ;;  %v4013_v62 = vld [vmem:[#allocation8 + $0x224] sm:$0xf]  ;;  %v4159_v37 = vld [vmem:[#allocation11 + $0xb0] sm:$0xff] }
 0x130   :  { %2093 = vmatpush.bf16.msrb.mxu0 %v3112_v55  ;;  %2057 = vmatpush.bf16.msra.mxu1 %v3156_v63  ;;  %v3371_v55 = vld [vmem:[#allocation8 + $0x370] sm:$0xf]  ;;  %v3205_v63 = vld [vmem:[#allocation8 + $0x238] sm:$0xf0] }
 0x131   :  { %2065 = vmatpush.bf16.msra.mxu2 %v3492_v56  ;;  %v4058_v56 = vld [vmem:[#allocation8 + $0x384] sm:$0xf0]  ;;  %v3208_v4 = vor.u32 %v4013_v62, %v3205_v63  ;;  %v4115_v62 = vld [vmem:[#allocation8 + $0x554] sm:$0xf]  ;;  %v3613_v63 = vld [vmem:[#allocation8 + $0x568] sm:$0xf0] }
 0x132   :  { %2017 = vmatmul.bf16.vlgmr.msrb.gmra.mxu2 %v4486_v42  ;;  %v3372_v2 = vor.u32 %v4058_v56, %v3371_v55  ;;  %v4142_v55 = vld [vmem:[#allocation11 + $0x28] sm:$0xff]  ;;  %v4156_v48 = vld [vmem:[#allocation11 + $0x98] sm:$0xff] }
 0x133   :  { %2030 = vmatpush.bf16.msrb.mxu3 %v3512_v14  ;;  %v2941_v14 = vld [vmem:[#allocation8 + $0x28] sm:$0xf0] }
 0x134   :  { %2094 = vmatpush.bf16.msrb.mxu0 %v3088_v6  ;;  %2058 = vmatpush.bf16.msra.mxu1 %v3132_v15  ;;  %v4052_v6 = vld [vmem:[#allocation8 + $0x354] sm:$0xf0] }
 0x135   :  { %2066 = vmatpush.bf16.msra.mxu2 %v3468_v11  ;;  %v4007_v11 = vld [vmem:[#allocation8 + $0x1f4] sm:$0xf]  ;;  %v3348_v15 = vor.u32 %v4052_v6, %v3347_v5  ;;  %v4109_v5 = vld [vmem:[#allocation8 + $0x524] sm:$0xf]  ;;  %v3589_v6 = vld [vmem:[#allocation8 + $0x538] sm:$0xf0] }
 0x136   :  { %2031 = vmatmul.bf16.vlgmr.msrb.gmra.mxu3 %v4490_v9 }
 0x137   :  { %2079 = vmatpush.bf16.msra.mxu3 %v3684_v16  ;;  %2059 = vmatmul.bf16.vlgmr.msra.gmra.mxu1 %v4479_v49  ;;  %v3564_v16 = vor.u32 %v4106_v10, %v3563_v7  ;;  %v4140_v7 = vld [vmem:[#allocation11 + $0x18] sm:$0xff]  ;;  %v3592_v10 = vor.u32 %v4109_v5, %v3589_v6 }
 0x138   :  { %2107 = vmatpush.bf16.msrb.mxu1 %v3304_v17  ;;  %2095 = vmatpush.bf16.msrb.mxu0 %v3064_v21  ;;  %v3184_v17 = vor.u32 %v4007_v11, %v3181_v12  ;;  %v2944_v21 = vor.u32 %v3947_v13, %v2941_v14  ;;  %v4049_v11 = vld [vmem:[#allocation8 + $0x344] sm:$0xf]  ;;  %v3349_v12 = vld [vmem:[#allocation8 + $0x358] sm:$0xf0]  ;;  %v4103_v13 = vld [vmem:[#allocation8 + $0x4f4] sm:$0xf] }
 0x139   :  { %2067 = vmatpush.bf16.msra.mxu2 %v3444_v27  ;;  %v3324_v27 = vor.u32 %v4046_v19, %v3323_v18  ;;  %v3565_v14 = vld [vmem:[#allocation8 + $0x508] sm:$0xf0]  ;;  %v4043_v19 = vld [vmem:[#allocation8 + $0x314] sm:$0xf] }
 0x13a   :  { %v3568_v18 = vor.u32 %v4103_v13, %v3565_v14 }
 0x13b   :  { %2080 = vmatpush.bf16.msra.mxu3 %v3660_v28  ;;  %v3496_v28 = vor.u32 %v4085_v20, %v3493_v22  ;;  %v3325_v20 = vld [vmem:[#allocation8 + $0x328] sm:$0xf0]  ;;  %v3541_v22 = vld [vmem:[#allocation8 + $0x4d8] sm:$0xf0] }
 0x13c   :  { %2108 = vmatpush.bf16.msrb.mxu1 %v3280_v30  ;;  %2096 = vmatpush.bf16.msrb.mxu0 %v3040_v33  ;;  %v3540_v30 = vor.u32 %v4100_v24, %v3539_v23  ;;  %v3515_v33 = vld [vmem:[#allocation8 + $0x490] sm:$0xf]  ;;  %v3328_v23 = vor.u32 %v4043_v19, %v3325_v20 }
 0x13d   :  { %2068 = vmatpush.bf16.msra.mxu2 %v3420_v39  ;;  %v3472_v39 = vor.u32 %v4079_v31, %v3469_v45  ;;  %v4138_v24 = vld [vmem:[#allocation11 + $0x8] sm:$0xff]  ;;  %v4149_v31 = vld [vmem:[#allocation11 + $0x60] sm:$0xff] }
 0x13f   :  { %2081 = vmatpush.bf16.msra.mxu3 %v3636_v40  ;;  %v3516_v40 = vor.u32 %v4094_v34, %v3515_v33  ;;  %v4148_v33 = vld [vmem:[#allocation11 + $0x58] sm:$0xff] }
 0x140   :  { %2109 = vmatpush.bf16.msrb.mxu1 %v3256_v41  ;;  %2097 = vmatpush.bf16.msrb.mxu0 %v3016_v57  ;;  %v4144_v41 = vld [vmem:[#allocation11 + $0x38] sm:$0xff] }
 0x141   :  { %2069 = vmatpush.bf16.msra.mxu2 %v3396_v52  ;;  %v3445_v57 = vld [vmem:[#allocation8 + $0x418] sm:$0xf0]  ;;  %v4067_v52 = vld [vmem:[#allocation8 + $0x3d4] sm:$0xf] }
 0x142   :  { %v3448_v61 = vor.u32 %v4073_v46, %v3445_v57  ;;  %v4160_v34 = vld [vmem:[#allocation11 + $0xb8] sm:$0xff]  ;;  %v4145_v46 = vld [vmem:[#allocation11 + $0x40] sm:$0xff] }
 0x143   :  { %2082 = vmatpush.bf16.msra.mxu3 %v3612_v53  ;;  %v3421_v53 = vld [vmem:[#allocation8 + $0x3e8] sm:$0xf0] }
 0x144   :  { %2110 = vmatpush.bf16.msrb.mxu1 %v3232_v54  ;;  %2098 = vmatpush.bf16.msrb.mxu0 %v2992_v59  ;;  %v4121_v54 = vld [vmem:[#allocation8 + $0x584] sm:$0xf]  ;;  %v3424_v56 = vor.u32 %v4067_v52, %v3421_v53  ;;  %v4155_v53 = vld [vmem:[#allocation11 + $0x90] sm:$0xff] }
 0x145   :  { %2070 = vmatpush.bf16.msra.mxu2 %v3372_v2  ;;  %v4061_v59 = vld [vmem:[#allocation8 + $0x3a4] sm:$0xf]  ;;  %v3616_v2 = vor.u32 %v4115_v62, %v3613_v63 }
 0x146   :  { %v3400_v1 = vor.u32 %v4061_v59, %v3397_v60  ;;  %v4157_v57 = vld [vmem:[#allocation11 + $0xa0] sm:$0xff]  ;;  %v4154_v60 = vld [vmem:[#allocation11 + $0x88] sm:$0xff] }
 0x147   :  { %2083 = vmatpush.bf16.msra.mxu3 %v3588_v3  ;;  %v4055_v3 = vld [vmem:[#allocation8 + $0x374] sm:$0xf] }
 0x148   :  { %2111 = vmatpush.bf16.msrb.mxu1 %v3208_v4  ;;  %2099 = vmatpush.bf16.msrb.mxu0 %v2968_v8  ;;  %v3373_v4 = vld [vmem:[#allocation8 + $0x388] sm:$0xf0]  ;;  %v4152_v8 = vld [vmem:[#allocation11 + $0x78] sm:$0xff] }
 0x149   :  { %2071 = vmatpush.bf16.msra.mxu2 %v3348_v15  ;;  %v4139_v15 = vld [vmem:[#allocation11 + $0x10] sm:$0xff] }
 0x14b   :  { %2084 = vmatpush.bf16.msra.mxu3 %v3564_v16  ;;  %v4151_v16 = vld [vmem:[#allocation11 + $0x70] sm:$0xff] }
 0x14c   :  { %2112 = vmatpush.bf16.msrb.mxu1 %v3184_v17  ;;  %2100 = vmatpush.bf16.msrb.mxu0 %v2944_v21  ;;  %v3352_v17 = vor.u32 %v4049_v11, %v3349_v12  ;;  %v4097_v21 = vld [vmem:[#allocation8 + $0x4c4] sm:$0xf]  ;;  %v4166_v12 = vld [vmem:[#allocation11 + $0xe8] sm:$0xff] }
 0x14d   :  { %2072 = vmatpush.bf16.msra.mxu2 %v3324_v27  ;;  %v3544_v26 = vor.u32 %v4097_v21, %v3541_v22  ;;  %v4091_v27 = vld [vmem:[#allocation8 + $0x494] sm:$0xf]  ;;  %v4165_v21 = vld [vmem:[#allocation11 + $0xe0] sm:$0xff] }
 0x14f   :  { %2085 = vmatpush.bf16.msra.mxu3 %v3540_v30  ;;  %2101 = vmatmul.bf16.vlgmr.msrb.gmra.mxu0 %v4476_v29  ;;  %v3637_v29 = vld [vmem:[#allocation8 + $0x598] sm:$0xf0]  ;;  %v4137_v30 = vld [vmem:[#allocation11] sm:$0xff] }
 0x150   :  { %2113 = vmatpush.bf16.msrb.mxu1 %v3160_v32  ;;  %2073 = vmatmul.bf16.vlgmr.msra.gmra.mxu2 %v4486_v42  ;;  %v3640_v58 = vor.u32 %v4121_v54, %v3637_v29  ;;  %v1822_v32 = vpop.f32.mrf.mxu0 }
 0x151   :  { %2121 = vmatpush.bf16.msrb.mxu2 %v3496_v28  ;;  %2555 = vmatpush.bf16.msra.mxu0 %v4144_v41  ;;  %v3517_v28 = vld [vmem:[#allocation8 + $0x4a8] sm:$0xf0] }
 0x152   :  { %v3520_v45 = vor.u32 %v4091_v27, %v3517_v28  ;;  %v4164_v27 = vld [vmem:[#allocation11 + $0xd8] sm:$0xff] }
 0x153   :  { %2086 = vmatpush.bf16.msra.mxu3 %v3516_v40  ;;  %v1836_v35 = vpop.f32.mrf.mxu1  ;;  %v4158_v40 = vld [vmem:[#allocation11 + $0xa8] sm:$0xff] }
 0x154   :  { %2114 = vmatpush.bf16.msrb.mxu1 %v3136_v43 }
 0x155   :  { %2122 = vmatpush.bf16.msrb.mxu2 %v3472_v39  ;;  %2556 = vmatpush.bf16.msra.mxu0 %v4143_v50  ;;  %v4146_v39 = vld [vmem:[#allocation11 + $0x48] sm:$0xff] }
 0x156   :  { %2087 = vmatmul.bf16.vlgmr.msra.gmra.mxu3 %v4490_v9 }
 0x157   :  { %2135 = vmatpush.bf16.msrb.mxu3 %v3688_v44  ;;  %2115 = vmatmul.bf16.vlgmr.msrb.gmra.mxu1 %v4479_v49  ;;  %v3376_v49 = vor.u32 %v4055_v3, %v3373_v4  ;;  %v4168_v3 = vld [vmem:[#allocation11 + $0xf8] sm:$0xff]  ;;  %v842_v4 = vperm.slane %v4510_v38, 1 }
 0x158   :  { %2569 = vmatpush.bf16.msra.mxu1 %v4152_v8  ;;  %v1824_v41 = vpop.f32.mrf.mxu0  ;;  %v4167_v8 = vld [vmem:[#allocation11 + $0xf0] sm:$0xff] }
 0x159   :  { %2123 = vmatpush.bf16.msrb.mxu2 %v3448_v61  ;;  %2557 = vmatpush.bf16.msra.mxu0 %v4142_v55 }
 0x15b   :  { %2136 = vmatpush.bf16.msrb.mxu3 %v3664_v51  ;;  %v1838_v44 = vpop.f32.mrf.mxu1 }
 0x15c   :  { %2570 = vmatpush.bf16.msra.mxu1 %v4151_v16 }
 0x15d   :  { %2124 = vmatpush.bf16.msrb.mxu2 %v3424_v56  ;;  %2558 = vmatpush.bf16.msra.mxu0 %v4141_v0 }
 0x15f   :  { %2137 = vmatpush.bf16.msrb.mxu3 %v3640_v58 }
 0x160   :  { %2571 = vmatpush.bf16.msra.mxu1 %v4150_v25  ;;  %v1878_v52 = vpop.f32.mrf.mxu0 }
 0x161   :  { %2125 = vmatpush.bf16.msrb.mxu2 %v3400_v1  ;;  %2559 = vmatpush.bf16.msra.mxu0 %v4140_v7 }
 0x163   :  { %2138 = vmatpush.bf16.msrb.mxu3 %v3616_v2  ;;  %v1892_v29 = vpop.f32.mrf.mxu1  ;;  %v4153_v2 = vld [vmem:[#allocation11 + $0x80] sm:$0xff] }
 0x164   :  { %2572 = vmatpush.bf16.msra.mxu1 %v4149_v31  ;;  %v4163_v31 = vld [vmem:[#allocation11 + $0xd0] sm:$0xff] }
 0x165   :  { %2126 = vmatpush.bf16.msrb.mxu2 %v3376_v49  ;;  %2560 = vmatpush.bf16.msra.mxu0 %v4139_v15 }
 0x167   :  { %2139 = vmatpush.bf16.msrb.mxu3 %v3592_v10  ;;  %v1879_v10 = vadd.f32 %v1878_v52, %v842_v4 }
 0x168   :  { %2573 = vmatpush.bf16.msra.mxu1 %v4148_v33  ;;  %v1880_v5 = vpop.f32.mrf.mxu0 }
 0x169   :  { %2127 = vmatpush.bf16.msrb.mxu2 %v3352_v17  ;;  %2561 = vmatpush.bf16.msra.mxu0 %v4138_v24  ;;  %v1893_v13 = vadd.f32 %v1892_v29, %v1879_v10  ;;  %v1881_v14 = vadd.f32 %v1880_v5, %v842_v4 }
 0x16b   :  { %2140 = vmatpush.bf16.msrb.mxu3 %v3568_v18  ;;  %v1894_v49 = vpop.f32.mrf.mxu1 }
 0x16c   :  { %2574 = vmatpush.bf16.msra.mxu1 %v4147_v36  ;;  %v1895_v15 = vadd.f32 %v1894_v49, %v1881_v14  ;;  %v4183_v14 = vld [vmem:[#allocation11 + $0x170] sm:$0xff] }
 0x16d   :  { %2128 = vmatpush.bf16.msrb.mxu2 %v3328_v23  ;;  %2562 = vmatpush.bf16.msra.mxu0 %v4137_v30  ;;  %v843_v30 = vperm.slane %v4510_v38, 2 }
 0x16f   :  { %2141 = vmatpush.bf16.msrb.mxu3 %v3544_v26 }
 0x170   :  { %2129 = vmatmul.bf16.vlgmr.msrb.gmra.mxu2 %v4486_v42  ;;  %2575 = vmatpush.bf16.msra.mxu1 %v4146_v39  ;;  %v841_v42 = vperm.slane %v4510_v38, 0  ;;  %v1934_v17 = vpop.f32.mrf.mxu0 }
 0x171   :  { %2583 = vmatpush.bf16.msra.mxu2 %v4160_v34  ;;  %v1850_v43 = vpop.f32.mrf.mxu2  ;;  %v1935_v33 = vadd.f32 %v1934_v17, %v843_v30 }
 0x172   :  { %v1825_v51 = vadd.f32 %v1824_v41, %v841_v42 }
 0x173   :  { %2142 = vmatpush.bf16.msrb.mxu3 %v3520_v45 }
 0x174   :  { %2576 = vmatpush.bf16.msra.mxu1 %v4145_v46  ;;  %v1839_v54 = vadd.f32 %v1838_v44, %v1825_v51  ;;  %v4161_v44 = vld [vmem:[#allocation11 + $0xc0] sm:$0xff]  ;;  %v4174_v51 = vld [vmem:[#allocation11 + $0x128] sm:$0xff] }
 0x175   :  { %2584 = vmatpush.bf16.msra.mxu2 %v4159_v37  ;;  %v4162_v37 = vld [vmem:[#allocation11 + $0xc8] sm:$0xff] }
 0x176   :  { %2143 = vmatmul.bf16.vlgmr.msrb.gmra.mxu3 %v4490_v9  ;;  %v1823_v9 = vadd.f32 %v1822_v32, %v841_v42  ;;  %v1948_v22 = vpop.f32.mrf.mxu1 }
 0x177   :  { %2597 = vmatpush.bf16.msra.mxu3 %v4168_v3  ;;  %v4170_v3 = vld [vmem:[#allocation11 + $0x108] sm:$0xff] }
 0x178   :  { %v1837_v50 = vadd.f32 %v1836_v35, %v1823_v9  ;;  %v1936_v45 = vpop.f32.mrf.mxu0  ;;  %v1949_v35 = vadd.f32 %v1948_v22, %v1935_v33  ;;  %v845_v22 = vperm.slane %v4510_v38, 4 }
 0x179   :  { %2585 = vmatpush.bf16.msra.mxu2 %v4158_v40  ;;  %v1864_v47 = vpop.f32.mrf.mxu3  ;;  %v1852_v61 = vpop.f32.mrf.mxu2  ;;  %v1937_v36 = vadd.f32 %v1936_v45, %v843_v30  ;;  %v4178_v45 = vld [vmem:[#allocation11 + $0x148] sm:$0xff] }
 0x17a   :  { %v1851_v55 = vadd.f32 %v1850_v43, %v1837_v50  ;;  %v1853_v58 = vadd.f32 %v1852_v61, %v1839_v54  ;;  %v4175_v61 = vld [vmem:[#allocation11 + $0x130] sm:$0xff]  ;;  %v4173_v54 = vld [vmem:[#allocation11 + $0x120] sm:$0xff] }
 0x17b   :  { %2598 = vmatpush.bf16.msra.mxu3 %v4167_v8  ;;  %v4169_v8 = vld [vmem:[#allocation11 + $0x100] sm:$0xff] }
 0x17c   :  { %v1865_v56 = vadd.f32 %v1864_v47, %v1851_v55  ;;  %v4172_v55 = vld [vmem:[#allocation11 + $0x118] sm:$0xff] }
 0x17d   :  { %2586 = vmatpush.bf16.msra.mxu2 %v4157_v57  ;;  %v4176_v57 = vld [vmem:[#allocation11 + $0x138] sm:$0xff] }
 0x17e   :  { %v2149_v0 = vmax.f32 %v1865_v56, 0.0  ;;  %v1950_v34 = vpop.f32.mrf.mxu1  ;;  %2611 = vmatpush.bf16.msrb.mxu0 %v4176_v57  ;;  %v844_v56 = vperm.slane %v4510_v38, 3  ;;  %v846_v57 = vperm.slane %v4510_v38, 5 }
 0x17f   :  { %2599 = vmatpush.bf16.msra.mxu3 %v4166_v12  ;;  %v1951_v40 = vadd.f32 %v1950_v34, %v1937_v36 }
 0x181   :  { %2587 = vmatpush.bf16.msra.mxu2 %v4156_v48  ;;  %v1866_v59 = vpop.f32.mrf.mxu3  ;;  %v1906_v63 = vpop.f32.mrf.mxu2 }
 0x182   :  { %v1867_v62 = vadd.f32 %v1866_v59, %v1853_v58  ;;  %v1907_v16 = vadd.f32 %v1906_v63, %v1893_v13  ;;  %2612 = vmatpush.bf16.msrb.mxu0 %v4175_v61 }
 0x183   :  { %2600 = vmatpush.bf16.msra.mxu3 %v4165_v21  ;;  %v4180_v21 = vld [vmem:[#allocation11 + $0x158] sm:$0xff] }
 0x184   :  { %v2155_v1 = vmax.f32 %v1867_v62, 0.0 }
 0x185   :  { %2588 = vmatpush.bf16.msra.mxu2 %v4155_v53 }
 0x186   :  { %v2161_v6 = vpack.c.bf16 %v2155_v1, %v2149_v0  ;;  %2613 = vmatpush.bf16.msrb.mxu0 %v4174_v51 }
 0x187   :  { %2601 = vmatpush.bf16.msra.mxu3 %v4164_v27 }
 0x188   :  { %2563 = vmatmul.bf16.vlgmr.msra.gmra.mxu0 %v2161_v6 }
 0x189   :  { %2589 = vmatpush.bf16.msra.mxu2 %v4154_v60  ;;  %v1920_v7 = vpop.f32.mrf.mxu3  ;;  %v1908_v11 = vpop.f32.mrf.mxu2  ;;  %v4171_v60 = vld [vmem:[#allocation11 + $0x110] sm:$0xff] }
 0x18a   :  { %v1921_v18 = vadd.f32 %v1920_v7, %v1907_v16  ;;  %v1909_v19 = vadd.f32 %v1908_v11, %v1895_v15  ;;  %2614 = vmatpush.bf16.msrb.mxu0 %v4173_v54  ;;  %v4184_v11 = vld [vmem:[#allocation11 + $0x178] sm:$0xff]  ;;  %v4182_v16 = vld [vmem:[#allocation11 + $0x168] sm:$0xff] }
 0x18b   :  { %2602 = vmatpush.bf16.msra.mxu3 %v4163_v31  ;;  %2625 = vmatpush.bf16.msrb.mxu1 %v4184_v11 }
 0x18c   :  { %v2150_v24 = vmax.f32 %v1921_v18, 0.0 }
 0x18d   :  { %2590 = vmatpush.bf16.msra.mxu2 %v4153_v2 }
 0x18e   :  { %v1990_v52 = vpop.f32.mrf.mxu0  ;;  %2615 = vmatpush.bf16.msrb.mxu0 %v4172_v55 }
 0x18f   :  { %2603 = vmatpush.bf16.msra.mxu3 %v4162_v37  ;;  %v1991_v62 = vadd.f32 %v1990_v52, %v844_v56  ;;  %2626 = vmatpush.bf16.msrb.mxu1 %v4183_v14  ;;  %v4177_v37 = vld [vmem:[#allocation11 + $0x140] sm:$0xff] }
 0x191   :  { %v1922_v20 = vpop.f32.mrf.mxu3  ;;  %v1962_v26 = vpop.f32.mrf.mxu2 }
 0x192   :  { %v1923_v23 = vadd.f32 %v1922_v20, %v1909_v19  ;;  %v1963_v41 = vadd.f32 %v1962_v26, %v1949_v35  ;;  %2616 = vmatpush.bf16.msrb.mxu0 %v4171_v60  ;;  %v4181_v19 = vld [vmem:[#allocation11 + $0x160] sm:$0xff] }
 0x193   :  { %2604 = vmatpush.bf16.msra.mxu3 %v4161_v44  ;;  %2627 = vmatpush.bf16.msrb.mxu1 %v4182_v16 }
 0x194   :  { %v2156_v25 = vmax.f32 %v1923_v23, 0.0  ;;  %v2004_v53 = vpop.f32.mrf.mxu1 }
 0x195   :  { %v2005_v0 = vadd.f32 %v2004_v53, %v1991_v62 }
 0x196   :  { %v2162_v28 = vpack.c.bf16 %v2156_v25, %v2150_v24  ;;  %v1992_v58 = vpop.f32.mrf.mxu0  ;;  %2617 = vmatpush.bf16.msrb.mxu0 %v4170_v3  ;;  %v4179_v25 = vld [vmem:[#allocation11 + $0x150] sm:$0xff] }
 0x197   :  { %v1993_v1 = vadd.f32 %v1992_v58, %v844_v56  ;;  %2628 = vmatpush.bf16.msrb.mxu1 %v4181_v19 }
 0x198   :  { %2577 = vmatmul.bf16.vlgmr.msra.gmra.mxu1 %v2162_v28 }
 0x199   :  { %v1976_v32 = vpop.f32.mrf.mxu3  ;;  %v1964_v39 = vpop.f32.mrf.mxu2 }
 0x19a   :  { %v1977_v43 = vadd.f32 %v1976_v32, %v1963_v41  ;;  %v1965_v42 = vadd.f32 %v1964_v39, %v1951_v40  ;;  %2618 = vmatpush.bf16.msrb.mxu0 %v4169_v8 }
 0x19b   :  { %2629 = vmatpush.bf16.msrb.mxu1 %v4180_v21 }
 0x19c   :  { %v2151_v47 = vmax.f32 %v1977_v43, 0.0  ;;  %v2006_v63 = vpop.f32.mrf.mxu1 }
 0x19d   :  { %v2007_v4 = vadd.f32 %v2006_v63, %v1993_v1 }
 0x19f   :  { %2630 = vmatpush.bf16.msrb.mxu1 %v4179_v25 }
 0x1a1   :  { %v1978_v46 = vpop.f32.mrf.mxu3 }
 0x1a2   :  { %v1979_v9 = vadd.f32 %v1978_v46, %v1965_v42 }
 0x1a3   :  { %2631 = vmatpush.bf16.msrb.mxu1 %v4178_v45 }
 0x1a4   :  { %v2157_v48 = vmax.f32 %v1979_v9, 0.0 }
 0x1a6   :  { %v2163_v50 = vpack.c.bf16 %v2157_v48, %v2151_v47 }
 0x1a7   :  { %2632 = vmatpush.bf16.msrb.mxu1 %v4177_v37 }
 0x1a8   :  { %2591 = vmatmul.bf16.vlgmr.msra.gmra.mxu2 %v2163_v50 }
 0x1ac   :  { %v2046_v17 = vpop.f32.mrf.mxu0 }
 0x1ad   :  { %v2047_v26 = vadd.f32 %v2046_v17, %v845_v22 }
 0x1b4   :  { %v2060_v18 = vpop.f32.mrf.mxu1  ;;  %v2048_v23 = vpop.f32.mrf.mxu0 }
 0x1b5   :  { %v2018_v29 = vpop.f32.mrf.mxu2  ;;  %v2061_v28 = vadd.f32 %v2060_v18, %v2047_v26  ;;  %v2049_v30 = vadd.f32 %v2048_v23, %v845_v22 }
 0x1b6   :  { %v2019_v5 = vadd.f32 %v2018_v29, %v2005_v0 }
 0x1b9   :  { %v2032_v59 = vpop.f32.mrf.mxu3 }
 0x1ba   :  { %v2033_v6 = vadd.f32 %v2032_v59, %v2019_v5  ;;  %v4205_v5 = vld [vmem:[%s4533_s6] ss:$0 sm:$0xff]  ;;  %s2649_s6 = sshll.u32 %s4534_s7, 4  ;;  %s2650_s6 = int_to_ptr.hbm [resolvable:$true] %s2649_s6 }
 0x1bc   :  { %v2152_v12 = vmax.f32 %v2033_v6, 0.0  ;;  %v2062_v27 = vpop.f32.mrf.mxu1 }
 0x1bd   :  { %v2020_v2 = vpop.f32.mrf.mxu2  ;;  %v2063_v32 = vadd.f32 %v2062_v27, %v2049_v30 }
 0x1be   :  { %v2021_v49 = vadd.f32 %v2020_v2, %v2007_v4 }
 0x1c1   :  { %v2034_v7 = vpop.f32.mrf.mxu3 }
 0x1c2   :  { %v2035_v10 = vadd.f32 %v2034_v7, %v2021_v49 }
 0x1c4   :  { %v2158_v13 = vmax.f32 %v2035_v10, 0.0 }
 0x1c6   :  { %v2164_v15 = vpack.c.bf16 %v2158_v13, %v2152_v12 }
 0x1c8   :  { %2605 = vmatmul.bf16.vlgmr.msra.gmra.mxu3 %v2164_v15 }
 0x1cc   :  { %v2102_v42 = vpop.f32.mrf.mxu0 }
 0x1cd   :  { %v2103_v48 = vadd.f32 %v2102_v42, %v846_v57 }
 0x1d3   :  { %v2074_v20 = vpop.f32.mrf.mxu2 }
 0x1d4   :  { %v2075_v33 = vadd.f32 %v2074_v20, %v2061_v28  ;;  %v2116_v44 = vpop.f32.mrf.mxu1  ;;  %v2104_v9 = vpop.f32.mrf.mxu0 }
 0x1d5   :  { %v2117_v50 = vadd.f32 %v2116_v44, %v2103_v48  ;;  %v2105_v51 = vadd.f32 %v2104_v9, %v846_v57 }
 0x1d9   :  { %v2088_v24 = vpop.f32.mrf.mxu3 }
 0x1da   :  { %v2089_v34 = vadd.f32 %v2088_v24, %v2075_v33 }
 0x1db   :  { %v2076_v31 = vpop.f32.mrf.mxu2 }
 0x1dc   :  { %v2077_v35 = vadd.f32 %v2076_v31, %v2063_v32  ;;  %v2153_v40 = vmax.f32 %v2089_v34, 0.0  ;;  %v2118_v61 = vpop.f32.mrf.mxu1 }
 0x1dd   :  { %v2119_v53 = vadd.f32 %v2118_v61, %v2105_v51 }
 0x1e1   :  { %v2090_v36 = vpop.f32.mrf.mxu3 }
 0x1e2   :  { %v2091_v39 = vadd.f32 %v2090_v36, %v2077_v35 }
 0x1e4   :  { %v2159_v41 = vmax.f32 %v2091_v39, 0.0 }
 0x1e6   :  { %v2165_v43 = vpack.c.bf16 %v2159_v41, %v2153_v40 }
 0x1e8   :  { %2619 = vmatmul.bf16.vlgmr.msrb.gmra.mxu0 %v2165_v43 }
 0x1f3   :  { %v2130_v46 = vpop.f32.mrf.mxu2 }
 0x1f4   :  { %v2131_v54 = vadd.f32 %v2130_v46, %v2117_v50 }
 0x1f9   :  { %v2144_v47 = vpop.f32.mrf.mxu3 }
 0x1fa   :  { %v2145_v29 = vadd.f32 %v2144_v47, %v2131_v54 }
 0x1fb   :  { %v2132_v52 = vpop.f32.mrf.mxu2 }
 0x1fc   :  { %v2133_v55 = vadd.f32 %v2132_v52, %v2119_v53  ;;  %v2154_v59 = vmax.f32 %v2145_v29, 0.0 }
 0x201   :  { %v2146_v56 = vpop.f32.mrf.mxu3 }
 0x202   :  { %v2147_v58 = vadd.f32 %v2146_v56, %v2133_v55 }
 0x204   :  { %v2160_v60 = vmax.f32 %v2147_v58, 0.0 }
 0x205   :  { %v2564_v63 = vpop.f32.mrf.mxu0 }
 0x206   :  { %v2166_v62 = vpack.c.bf16 %v2160_v60, %v2154_v59  ;;  %v2565_v6 = vadd.f32 %v4205_v5, %v2564_v63 }
 0x208   :  { %2633 = vmatmul.bf16.vlgmr.msrb.gmra.mxu1 %v2166_v62 }
 0x20d   :  { %v2566_v38 = vpop.f32.mrf.mxu0 }
 0x20e   :  { %v2567_v49 = vadd.f32 %v4205_v5, %v2566_v38 }
 0x215   :  { %v2578_v0 = vpop.f32.mrf.mxu1 }
 0x216   :  { %v2579_v10 = vadd.f32 %v2578_v0, %v2565_v6 }
 0x21d   :  { %v2580_v2 = vpop.f32.mrf.mxu1 }
 0x21e   :  { %v2581_v11 = vadd.f32 %v2580_v2, %v2567_v49 }
 0x22b   :  { %v2592_v1 = vpop.f32.mrf.mxu2 }
 0x22c   :  { %v2593_v13 = vadd.f32 %v2592_v1, %v2579_v10 }
 0x233   :  { %v2594_v7 = vpop.f32.mrf.mxu2 }
 0x234   :  { %v2595_v14 = vadd.f32 %v2594_v7, %v2581_v11 }
 0x24b   :  { %v2606_v3 = vpop.f32.mrf.mxu3 }
 0x24c   :  { %v2607_v16 = vadd.f32 %v2606_v3, %v2593_v13 }
 0x253   :  { %v2608_v12 = vpop.f32.mrf.mxu3 }
 0x254   :  { %v2609_v17 = vadd.f32 %v2608_v12, %v2595_v14 }
 0x265   :  { %v2620_v4 = vpop.f32.mrf.mxu0 }
 0x266   :  { %v2621_v18 = vadd.f32 %v2620_v4, %v2607_v16 }
 0x26d   :  { %v2622_v15 = vpop.f32.mrf.mxu0 }
 0x26e   :  { %v2623_v19 = vadd.f32 %v2622_v15, %v2609_v17 }
 0x285   :  { %v2634_v8 = vpop.f32.mrf.mxu1 }
 0x286   :  { %v2635_v21 = vadd.f32 %v2634_v8, %v2621_v18 }
 0x28d   :  { %v2636_v20 = vpop.f32.mrf.mxu1 }
 0x28e   :  { %v2637_v22 = vadd.f32 %v2636_v20, %v2623_v19 }
 0x290   :  { %v4188_v23 = vpack.c.bf16 %v2637_v22, %v2635_v21 }
 0x292   :  { %4189 = vst [vmem:[#allocation13] sm:$0xff] %v4188_v23  }
 0x293   :  { %2655 = dma.vmem_to_hbm [thread:$0]  %s2648_s13, 128, %s2650_s6, [#allocation4], %s4396_s10, %s4396_s10, %s4397_s11  }
 0x294   :  { %4382 = dma.done.wait [#allocation4], 128  }
 0x295   :  { %4383 = vsyncadd [#allocation4], 4294967168 }
 0x296   :  { %2660 = vsyncpa [#allocation3], 1 }
 0x297   :  { %2661 = vsyncpa [#allocation6], 1 }
 0x298   :  { %2662 = vsyncpa [#allocation9], 1 }
 0x299   :  { %2663 = vsyncpa [#allocation12], 1 }
 0x29a   :  { %2664 = vsyncpa [#allocation4], 1 }

</bundles_post_ra>
